<compile_context>
chip_gen: v6e
topology: v6e:2x2x1
jax: 0.10.0
libtpu: 0.0.40
codegen_flags: <defaults>
</compile_context>

<pallas_src>
import jax
import jax.numpy as jnp
from jax import lax
from jax.experimental import pallas as pl
from jax.experimental.pallas import tpu as pltpu


EPS = 1e-6


def layernorm_kernel(x_ref, gb_ref, o_ref):
    # x_ref: (tm, C) rows to normalize; gb_ref: (2, C) = [gamma; beta].
    x = x_ref[...].astype(jnp.float32)
    c_inv = 1.0 / x.shape[-1]

    # Two-pass statistics (numerically safe vs. E[x^2]-E[x]^2).
    mean = jnp.sum(x, axis=-1, keepdims=True) * c_inv
    xc = x - mean
    var = jnp.sum(xc * xc, axis=-1, keepdims=True) * c_inv
    inv = lax.rsqrt(var + EPS)  # rides the EUP slot, essentially free

    g = gb_ref[0:1, :].astype(jnp.float32)
    b = gb_ref[1:2, :].astype(jnp.float32)
    o_ref[...] = (xc * inv * g + b).astype(o_ref.dtype)


def _two_tensorcores():
    """True on chips with 2 TensorCores (v7x); False on v5e/v6e or unknown."""
    try:
        dev = jax.devices()[0]
        kind = str(getattr(dev, "device_kind", "")).lower()
        if any(tag in kind for tag in ("v7", "7x", "tpu7")):
            return True
        # Some runtimes expose a per-device core count directly.
        if int(getattr(dev, "num_cores", 1)) >= 2:
            return True
    except Exception:  # detection failure -> safe single-core default
        pass
    return False


def _pallas_layernorm(x2, gb, tm, semantics):
    rows, C = x2.shape
    return pl.pallas_call(
        layernorm_kernel,
        out_shape=jax.ShapeDtypeStruct((rows, C), x2.dtype),
        grid_spec=pl.GridSpec(
            grid=(rows // tm,),
            in_specs=[
                pl.BlockSpec((tm, C), lambda i: (i, 0)),
                pl.BlockSpec((2, C), lambda i: (0, 0)),
            ],
            out_specs=pl.BlockSpec((tm, C), lambda i: (i, 0)),
        ),
        compiler_params=pltpu.CompilerParams(dimension_semantics=semantics),
    )(x2, gb)


def layernorm(x, gamma, beta, *, tm=None):
    # x: (N, H, W, C) with C = 384. Flatten leading dims to rows.
    N, H, W, C = x.shape
    rows = N * H * W
    two_cores = _two_tensorcores()

    if tm is None:
        if two_cores and rows % 2 == 0 and (rows // 2) % 8 == 0:
            tm = rows // 2  # one tile per TensorCore on v7x
        else:
            tm = rows       # single grid step on v5e/v6e
    assert rows % tm == 0, "row tile must divide number of rows"

    x2 = x.reshape(rows, C)
    gb = jnp.concatenate(
        [gamma.reshape(1, C), beta.reshape(1, C)], axis=0
    ).astype(x.dtype)

    steps = rows // tm
    if steps > 1 and two_cores:
        # CORE_PARALLEL actually shards the grid axis across TensorCores;
        # fall back to "parallel" if it fails to lower on this runtime.
        candidates = ((pltpu.CORE_PARALLEL,), ("parallel",))
    elif steps > 1:
        candidates = (("parallel",),)
    else:
        candidates = (("arbitrary",),)

    out = None
    last_err = None
    for sem in candidates:
        try:
            out = _pallas_layernorm(x2, gb, tm, sem)
            out = jax.block_until_ready(out)
            break
        except Exception as e:  # lowering/compile failure -> next candidate
            last_err = e
            out = None
    if out is None:
        raise last_err
    return out.reshape(N, H, W, C)


def layernorm_ref(x, gamma, beta):
    xf = x.astype(jnp.float32)
    mean = jnp.mean(xf, axis=-1, keepdims=True)
    var = jnp.mean((xf - mean) ** 2, axis=-1, keepdims=True)
    return ((xf - mean) * lax.rsqrt(var + EPS) * gamma + beta).astype(x.dtype)


if __name__ == "__main__":
    key = jax.random.PRNGKey(0)
    x = jax.random.normal(key, (1, 28, 28, 384), dtype=jnp.float32)

    # nn.LayerNorm default init: weight = ones(384), bias = zeros(384).
    gamma = jnp.ones((384,), dtype=jnp.float32)
    beta = jnp.zeros((384,), dtype=jnp.float32)

    out = layernorm(x, gamma, beta)
    out = jax.block_until_ready(out)

    ref = layernorm_ref(x, gamma, beta)
    assert out.shape == (1, 28, 28, 384)
    assert jnp.allclose(out, ref, atol=1e-5, rtol=1e-5)

    print("KERNEL_OK")
</pallas_src>

<mosaic_0001>
module attributes {stable_mosaic.version = 11 : i64} {
  func.func @layernorm_kernel(%arg0: i32, %arg1: memref<784x384xf32, #tpu.memory_space<vmem>>, %arg2: memref<2x384xf32, #tpu.memory_space<vmem>>, %arg3: memref<784x384xf32, #tpu.memory_space<vmem>>) attributes {dimension_semantics = [#tpu.dimension_semantics<arbitrary>], iteration_bounds = array<i64: 1>, scalar_prefetch = 0 : i64, scratch_operands = 0 : i64, tpu.core_type = #tpu.core_type<tc>, window_params = [{transform_indices = @transform_0, window_bounds = array<i64: 784, 384>}, {pipeline_mode = #tpu.pipeline_mode<synchronous>, transform_indices = @transform_1, window_bounds = array<i64: 2, 384>}, {transform_indices = @transform_2, window_bounds = array<i64: 784, 384>}]} {
    %c0 = arith.constant 0 : index
    %c0_0 = arith.constant 0 : index
    %0 = vector.load %arg1[%c0, %c0_0] : memref<784x384xf32, #tpu.memory_space<vmem>>, vector<784x384xf32>
    %cst = arith.constant dense<0.000000e+00> : vector<784xf32>
    %1 = vector.multi_reduction <add>, %0, %cst [1] : vector<784x384xf32> to vector<784xf32>
    %2 = vector.shape_cast %1 : vector<784xf32> to vector<784x1xf32>
    %cst_1 = arith.constant 0.00260416674 : f32
    %3 = vector.broadcast %cst_1 : f32 to vector<784x1xf32>
    %4 = arith.mulf %2, %3 : vector<784x1xf32>
    %5 = vector.broadcast %4 : vector<784x1xf32> to vector<784x384xf32>
    %6 = arith.subf %0, %5 : vector<784x384xf32>
    %7 = arith.mulf %6, %6 : vector<784x384xf32>
    %cst_2 = arith.constant dense<0.000000e+00> : vector<784xf32>
    %8 = vector.multi_reduction <add>, %7, %cst_2 [1] : vector<784x384xf32> to vector<784xf32>
    %9 = vector.shape_cast %8 : vector<784xf32> to vector<784x1xf32>
    %cst_3 = arith.constant 0.00260416674 : f32
    %10 = vector.broadcast %cst_3 : f32 to vector<784x1xf32>
    %11 = arith.mulf %9, %10 : vector<784x1xf32>
    %cst_4 = arith.constant 9.99999997E-7 : f32
    %12 = vector.broadcast %cst_4 : f32 to vector<784x1xf32>
    %13 = arith.addf %11, %12 : vector<784x1xf32>
    %14 = math.rsqrt %13 : vector<784x1xf32>
    %c0_5 = arith.constant 0 : index
    %c0_6 = arith.constant 0 : index
    %15 = vector.load %arg2[%c0_5, %c0_6] : memref<2x384xf32, #tpu.memory_space<vmem>>, vector<1x384xf32>
    %c1 = arith.constant 1 : index
    %c0_7 = arith.constant 0 : index
    %16 = vector.load %arg2[%c1, %c0_7] : memref<2x384xf32, #tpu.memory_space<vmem>>, vector<1x384xf32>
    %17 = vector.broadcast %14 : vector<784x1xf32> to vector<784x384xf32>
    %18 = arith.mulf %6, %17 : vector<784x384xf32>
    %19 = vector.broadcast %15 : vector<1x384xf32> to vector<784x384xf32>
    %20 = arith.mulf %18, %19 : vector<784x384xf32>
    %21 = vector.broadcast %16 : vector<1x384xf32> to vector<784x384xf32>
    %22 = arith.addf %20, %21 : vector<784x384xf32>
    %c0_8 = arith.constant 0 : index
    %c0_9 = arith.constant 0 : index
    %23 = vector.load %arg3[%c0_8, %c0_9] : memref<784x384xf32, #tpu.memory_space<vmem>>, vector<784x384xf32>
    tpu.vector_store %arg3[%c0_8, %c0_9], %22 {strides = array<i32>} : memref<784x384xf32, #tpu.memory_space<vmem>>, vector<784x384xf32>,
    return
  }
  func.func @transform_0(%arg0: i32) -> (i32, i32) {
    %c0_i32 = arith.constant 0 : i32
    %c0_i32_0 = arith.constant 0 : i32
    return %arg0, %c0_i32 : i32, i32
  }
  func.func @transform_1(%arg0: i32) -> (i32, i32) {
    %c0_i32 = arith.constant 0 : i32
    %c0_i32_0 = arith.constant 0 : i32
    %c0_i32_1 = arith.constant 0 : i32
    return %c0_i32, %c0_i32_0 : i32, i32
  }
  func.func @transform_2(%arg0: i32) -> (i32, i32) {
    %c0_i32 = arith.constant 0 : i32
    %c0_i32_0 = arith.constant 0 : i32
    return %arg0, %c0_i32 : i32, i32
  }
}

</mosaic_0001>

<bundles_post_ra>
// kernel: tpu_custom_call.1
= control target key start
LH: loop header
LB: loop body
LE: loop exit
PB: predicated region body
PF: predicated region fallthrough
CT: control target
= control target key end

     0   :  { %7 = vsyncpa [#allocation3], 0  ;;  %s6750_s0 = inlined_call_operand.hbm [shape: f32[784,384], index: 0, kind: input, shape index: {}]   ;;  %s6751_s1 = inlined_call_operand.hbm [shape: f32[2,384], index: 1, kind: input, shape index: {}]   ;;  %s6752_s2 = inlined_call_operand.hbm [shape: f32[784,384], index: 2, kind: output, shape index: {}]  }
   0x1   :  { %8 = vsyncpa [#allocation6], 0 }
   0x2   :  { %9 = vsyncpa [#allocation4], 0  ;;  %s3886_s9 = smov [#allocation2]  }
   0x3   :  { %s15_s10 = sshll.u32 %s3886_s9, 4  ;;  %s16_s10 = int_to_ptr.vmem [resolvable:$true] %s15_s10 }
   0x4   :  { %s3828_s11 = scalar_lea.vmem %s16_s10, 37632  ;;  %p3833_p1 = scmp.lt.s32.totalorder %s16_s10, %s16_s10 }
   0x5   :  { %p3829_p0 = scmp.ne.s32.totalorder %s16_s10, %s3828_s11  ;;  %p3834_p2 = scmp.lt.s32.totalorder %s3828_s11, %s3828_s11 }
   0x7   :  { %p3835_p3 = por %p3834_p2, %p3833_p1 }
   0x9   :  { %p3836_p4 = pnand %p3835_p3, %p3829_p0 }
   0xb   :  { %3839 = shalt.err (!%p3836_p4)
}
   0xc   :  { %s3887_s12 = smov 384   ;;  %s3888_s13 = smov 24  }
   0xd   :  { %21 = dma.hbm_to_vmem [thread:$0]  %s6750_s0, 37632, %s16_s10, [#allocation3], %s3887_s12, %s3887_s12, %s3888_s13  }
   0xe   :  { %s3889_s16 = smov [#allocation5]  }
   0xf   :  { %s28_s17 = sshll.u32 %s3889_s16, 4  ;;  %s29_s17 = int_to_ptr.vmem [resolvable:$true] %s28_s17 }
  0x10   :  { %s3848_s18 = scalar_lea.vmem %s29_s17, 96  ;;  %p3853_p6 = scmp.lt.s32.totalorder %s29_s17, %s29_s17 }
  0x11   :  { %p3849_p5 = scmp.ne.s32.totalorder %s29_s17, %s3848_s18  ;;  %p3854_p7 = scmp.lt.s32.totalorder %s3848_s18, %s3848_s18 }
  0x13   :  { %p3855_p8 = por %p3854_p7, %p3853_p6 }
  0x15   :  { %p3856_p9 = pnand %p3855_p8, %p3849_p5 }
  0x17   :  { %3859 = shalt.err (!%p3856_p9)
}
  0x18   :  { %31 = dma.hbm_to_vmem [thread:$0]  %s6751_s1, 96, %s29_s17, [#allocation6]  }
  0x19   :  { %3880 = dma.done.wait [#allocation3], 37632  }
  0x1a   :  { %3881 = vsyncadd [#allocation3], 4294929664 }
  0x1b   :  { %3882 = dma.done.wait [#allocation6], 96  }
  0x1c   :  { %3883 = vsyncadd [#allocation6], 4294967200  ;;  %v44_v0 = vld [vmem:[#allocation2 + $0x30] sm:$0xff]  ;;  %v45_v1 = vld [vmem:[#allocation2 + $0x38] sm:$0xff]  ;;  %s3890_s0 = smov [#allocation7]  }
  0x1d   :  { %v46_v2 = vld [vmem:[#allocation2 + $0x40] sm:$0xff]  ;;  %v340_v3 = vadd.f32 %v45_v1, %v44_v0  ;;  %v39_v5 = vld [vmem:[#allocation2 + $0x8] sm:$0xff]  ;;  %v40_v6 = vld [vmem:[#allocation2 + $0x10] sm:$0xff]  ;;  %s3312_s1 = sshll.u32 %s3890_s0, 4  ;;  %s3313_s1 = int_to_ptr.vmem [resolvable:$true] %s3312_s1 }
  0x1e   :  { %v38_v4 = vld [vmem:[#allocation2] sm:$0xff]  ;;  %v47_v8 = vld [vmem:[#allocation2 + $0x48] sm:$0xff]  ;;  %v48_v9 = vld [vmem:[#allocation2 + $0x50] sm:$0xff]  ;;  %s3860_s21 = scalar_lea.vmem %s3313_s1, 37632  ;;  %p3865_p11 = scmp.lt.s32.totalorder %s3313_s1, %s3313_s1 }
  0x1f   :  { %v332_v7 = vadd.f32 %v39_v5, %v38_v4  ;;  %v49_v10 = vld [vmem:[#allocation2 + $0x58] sm:$0xff]  ;;  %v341_v11 = vadd.f32 %v340_v3, %v46_v2  ;;  %v344_v12 = vadd.f32 %v48_v9, %v47_v8  ;;  %v42_v14 = vld [vmem:[#allocation2 + $0x20] sm:$0xff]  ;;  %v43_v15 = vld [vmem:[#allocation2 + $0x28] sm:$0xff]  ;;  %p3861_p10 = scmp.ne.s32.totalorder %s3313_s1, %s3860_s21  ;;  %p3866_p12 = scmp.lt.s32.totalorder %s3860_s21, %s3860_s21 }
  0x20   :  { %v41_v13 = vld [vmem:[#allocation2 + $0x18] sm:$0xff]  ;;  %v54_v19 = vld [vmem:[#allocation2 + $0x80] sm:$0xff]  ;;  %v51_v23 = vld [vmem:[#allocation2 + $0x68] sm:$0xff] }
  0x21   :  { %v333_v16 = vadd.f32 %v332_v7, %v40_v6  ;;  %v336_v17 = vadd.f32 %v42_v14, %v41_v13  ;;  %v53_v18 = vld [vmem:[#allocation2 + $0x78] sm:$0xff]  ;;  %342 = vadd.xlane.f32.xlu1 %v341_v11  ;;  %v345_v20 = vadd.f32 %v344_v12, %v49_v10  ;;  %v50_v22 = vld [vmem:[#allocation2 + $0x60] sm:$0xff]  ;;  %v55_v25 = vld [vmem:[#allocation2 + $0x88] sm:$0xff]  ;;  %p3867_p13 = por %p3866_p12, %p3865_p11 }
  0x22   :  { %v352_v21 = vadd.f32 %v54_v19, %v53_v18  ;;  %v348_v26 = vadd.f32 %v51_v23, %v50_v22  ;;  %v59_v27 = vld [vmem:[#allocation2 + $0xa8] sm:$0xff]  ;;  %v60_v28 = vld [vmem:[#allocation2 + $0xb0] sm:$0xff]  ;;  %v57_v31 = vld [vmem:[#allocation2 + $0x98] sm:$0xff] }
  0x23   :  { %334 = vadd.xlane.f32.xlu0 %v333_v16  ;;  %v337_v24 = vadd.f32 %v336_v17, %v43_v15  ;;  %v52_v29 = vld [vmem:[#allocation2 + $0x70] sm:$0xff]  ;;  %v360_v33 = vadd.f32 %v60_v28, %v59_v27  ;;  %v61_v35 = vld [vmem:[#allocation2 + $0xb8] sm:$0xff]  ;;  %v66_v38 = vld [vmem:[#allocation2 + $0xe0] sm:$0xff]  ;;  %p3868_p0 = pnand %p3867_p13, %p3861_p10 }
  0x24   :  { %v56_v30 = vld [vmem:[#allocation2 + $0x90] sm:$0xff]  ;;  %v353_v32 = vadd.f32 %v352_v21, %v55_v25  ;;  %v349_v34 = vadd.f32 %v348_v26, %v52_v29  ;;  %v65_v37 = vld [vmem:[#allocation2 + $0xd8] sm:$0xff]  ;;  %v58_v39 = vld [vmem:[#allocation2 + $0xa0] sm:$0xff] }
  0x25   :  { %346 = vadd.xlane.f32.xlu1 %v345_v20  ;;  %v356_v36 = vadd.f32 %v57_v31, %v56_v30  ;;  %v62_v40 = vld [vmem:[#allocation2 + $0xc0] sm:$0xff]  ;;  %v63_v41 = vld [vmem:[#allocation2 + $0xc8] sm:$0xff]  ;;  %v361_v42 = vadd.f32 %v360_v33, %v61_v35  ;;  %v368_v43 = vadd.f32 %v66_v38, %v65_v37  ;;  %v72_v48 = vld [vmem:[#allocation2 + $0x110] sm:$0xff] }
  0x26   :  { %v67_v45 = vld [vmem:[#allocation2 + $0xe8] sm:$0xff]  ;;  %v364_v46 = vadd.f32 %v63_v41, %v62_v40  ;;  %v64_v49 = vld [vmem:[#allocation2 + $0xd0] sm:$0xff]  ;;  %v69_v51 = vld [vmem:[#allocation2 + $0xf8] sm:$0xff] }
  0x27   :  { %338 = vadd.xlane.f32.xlu0 %v337_v24  ;;  %v357_v44 = vadd.f32 %v356_v36, %v58_v39  ;;  %v71_v47 = vld [vmem:[#allocation2 + $0x108] sm:$0xff]  ;;  %v68_v50 = vld [vmem:[#allocation2 + $0xf0] sm:$0xff]  ;;  %v369_v52 = vadd.f32 %v368_v43, %v67_v45  ;;  %v73_v55 = vld [vmem:[#allocation2 + $0x118] sm:$0xff] }
  0x28   :  { %v376_v53 = vadd.f32 %v72_v48, %v71_v47  ;;  %v365_v54 = vadd.f32 %v364_v46, %v64_v49  ;;  %v372_v56 = vadd.f32 %v69_v51, %v68_v50  ;;  %v77_v57 = vld [vmem:[#allocation2 + $0x138] sm:$0xff]  ;;  %v78_v58 = vld [vmem:[#allocation2 + $0x140] sm:$0xff]  ;;  %v75_v61 = vld [vmem:[#allocation2 + $0x128] sm:$0xff] }
  0x29   :  { %354 = vadd.xlane.f32.xlu1 %v353_v32  ;;  %v70_v59 = vld [vmem:[#allocation2 + $0x100] sm:$0xff]  ;;  %v384_v63 = vadd.f32 %v78_v58, %v77_v57  ;;  %v79_v1 = vld [vmem:[#allocation2 + $0x148] sm:$0xff]  ;;  %v84_v4 = vld [vmem:[#allocation2 + $0x170] sm:$0xff] }
  0x2a   :  { %v74_v60 = vld [vmem:[#allocation2 + $0x120] sm:$0xff]  ;;  %v377_v62 = vadd.f32 %v376_v53, %v73_v55  ;;  %v373_v0 = vadd.f32 %v372_v56, %v70_v59  ;;  %v83_v3 = vld [vmem:[#allocation2 + $0x168] sm:$0xff]  ;;  %v76_v5 = vld [vmem:[#allocation2 + $0x130] sm:$0xff] }
  0x2b   :  { %350 = vadd.xlane.f32.xlu0 %v349_v34  ;;  %v380_v2 = vadd.f32 %v75_v61, %v74_v60  ;;  %v80_v6 = vld [vmem:[#allocation2 + $0x150] sm:$0xff]  ;;  %v81_v7 = vld [vmem:[#allocation2 + $0x158] sm:$0xff]  ;;  %v385_v8 = vadd.f32 %v384_v63, %v79_v1  ;;  %v392_v9 = vadd.f32 %v84_v4, %v83_v3  ;;  %v90_v14 = vld [vmem:[#allocation2 + $0x1a0] sm:$0xff] }
  0x2c   :  { %v85_v11 = vld [vmem:[#allocation2 + $0x178] sm:$0xff]  ;;  %v388_v12 = vadd.f32 %v81_v7, %v80_v6  ;;  %v82_v15 = vld [vmem:[#allocation2 + $0x160] sm:$0xff]  ;;  %v87_v17 = vld [vmem:[#allocation2 + $0x188] sm:$0xff] }
  0x2d   :  { %362 = vadd.xlane.f32.xlu1 %v361_v42  ;;  %v381_v10 = vadd.f32 %v380_v2, %v76_v5  ;;  %v89_v13 = vld [vmem:[#allocation2 + $0x198] sm:$0xff]  ;;  %v86_v16 = vld [vmem:[#allocation2 + $0x180] sm:$0xff]  ;;  %v393_v18 = vadd.f32 %v392_v9, %v85_v11  ;;  %v91_v21 = vld [vmem:[#allocation2 + $0x1a8] sm:$0xff] }
  0x2e   :  { %v400_v19 = vadd.f32 %v90_v14, %v89_v13  ;;  %v389_v20 = vadd.f32 %v388_v12, %v82_v15  ;;  %v396_v22 = vadd.f32 %v87_v17, %v86_v16  ;;  %v95_v23 = vld [vmem:[#allocation2 + $0x1c8] sm:$0xff]  ;;  %v96_v24 = vld [vmem:[#allocation2 + $0x1d0] sm:$0xff]  ;;  %v93_v27 = vld [vmem:[#allocation2 + $0x1b8] sm:$0xff] }
  0x2f   :  { %358 = vadd.xlane.f32.xlu0 %v357_v44  ;;  %v88_v25 = vld [vmem:[#allocation2 + $0x190] sm:$0xff]  ;;  %v408_v29 = vadd.f32 %v96_v24, %v95_v23  ;;  %v97_v31 = vld [vmem:[#allocation2 + $0x1d8] sm:$0xff]  ;;  %v102_v34 = vld [vmem:[#allocation2 + $0x200] sm:$0xff] }
  0x30   :  { %v92_v26 = vld [vmem:[#allocation2 + $0x1b0] sm:$0xff]  ;;  %v401_v28 = vadd.f32 %v400_v19, %v91_v21  ;;  %v397_v30 = vadd.f32 %v396_v22, %v88_v25  ;;  %v101_v33 = vld [vmem:[#allocation2 + $0x1f8] sm:$0xff]  ;;  %v94_v35 = vld [vmem:[#allocation2 + $0x1c0] sm:$0xff] }
  0x31   :  { %370 = vadd.xlane.f32.xlu1 %v369_v52  ;;  %v404_v32 = vadd.f32 %v93_v27, %v92_v26  ;;  %v98_v36 = vld [vmem:[#allocation2 + $0x1e0] sm:$0xff]  ;;  %v99_v37 = vld [vmem:[#allocation2 + $0x1e8] sm:$0xff]  ;;  %v409_v38 = vadd.f32 %v408_v29, %v97_v31  ;;  %v416_v39 = vadd.f32 %v102_v34, %v101_v33  ;;  %v108_v44 = vld [vmem:[#allocation2 + $0x230] sm:$0xff] }
  0x32   :  { %v103_v41 = vld [vmem:[#allocation2 + $0x208] sm:$0xff]  ;;  %v412_v42 = vadd.f32 %v99_v37, %v98_v36  ;;  %v100_v45 = vld [vmem:[#allocation2 + $0x1f0] sm:$0xff]  ;;  %v105_v47 = vld [vmem:[#allocation2 + $0x218] sm:$0xff] }
  0x33   :  { %366 = vadd.xlane.f32.xlu0 %v365_v54  ;;  %v405_v40 = vadd.f32 %v404_v32, %v94_v35  ;;  %v107_v43 = vld [vmem:[#allocation2 + $0x228] sm:$0xff]  ;;  %v104_v46 = vld [vmem:[#allocation2 + $0x210] sm:$0xff]  ;;  %v417_v48 = vadd.f32 %v416_v39, %v103_v41  ;;  %v109_v51 = vld [vmem:[#allocation2 + $0x238] sm:$0xff] }
  0x34   :  { %v424_v49 = vadd.f32 %v108_v44, %v107_v43  ;;  %v413_v50 = vadd.f32 %v412_v42, %v100_v45  ;;  %v420_v52 = vadd.f32 %v105_v47, %v104_v46  ;;  %v113_v53 = vld [vmem:[#allocation2 + $0x258] sm:$0xff]  ;;  %v114_v54 = vld [vmem:[#allocation2 + $0x260] sm:$0xff]  ;;  %v111_v57 = vld [vmem:[#allocation2 + $0x248] sm:$0xff] }
  0x35   :  { %378 = vadd.xlane.f32.xlu1 %v377_v62  ;;  %v106_v55 = vld [vmem:[#allocation2 + $0x220] sm:$0xff]  ;;  %v432_v59 = vadd.f32 %v114_v54, %v113_v53  ;;  %v115_v61 = vld [vmem:[#allocation2 + $0x268] sm:$0xff]  ;;  %v112_v1 = vld [vmem:[#allocation2 + $0x250] sm:$0xff] }
  0x36   :  { %v110_v56 = vld [vmem:[#allocation2 + $0x240] sm:$0xff]  ;;  %v425_v58 = vadd.f32 %v424_v49, %v109_v51  ;;  %v421_v60 = vadd.f32 %v420_v52, %v106_v55  ;;  %v119_v63 = vld [vmem:[#allocation2 + $0x288] sm:$0xff]  ;;  %v116_v2 = vld [vmem:[#allocation2 + $0x270] sm:$0xff] }
  0x37   :  { %374 = vadd.xlane.f32.xlu0 %v373_v0  ;;  %v428_v62 = vadd.f32 %v111_v57, %v110_v56  ;;  %v120_v0 = vld [vmem:[#allocation2 + $0x290] sm:$0xff]  ;;  %v117_v3 = vld [vmem:[#allocation2 + $0x278] sm:$0xff]  ;;  %v433_v4 = vadd.f32 %v432_v59, %v115_v61  ;;  %v118_v11 = vld [vmem:[#allocation2 + $0x280] sm:$0xff] }
  0x38   :  { %v440_v5 = vadd.f32 %v120_v0, %v119_v63  ;;  %v121_v7 = vld [vmem:[#allocation2 + $0x298] sm:$0xff]  ;;  %v122_v12 = vld [vmem:[#allocation2 + $0x2a0] sm:$0xff]  ;;  %v123_v13 = vld [vmem:[#allocation2 + $0x2a8] sm:$0xff] }
  0x39   :  { %386 = vadd.xlane.f32.xlu1 %v385_v8  ;;  %v429_v6 = vadd.f32 %v428_v62, %v112_v1  ;;  %v436_v8 = vadd.f32 %v117_v3, %v116_v2  ;;  %v125_v9 = vld [vmem:[#allocation2 + $0x2b8] sm:$0xff]  ;;  %v127_v17 = vld [vmem:[#allocation2 + $0x2c8] sm:$0xff]  ;;  %v124_v21 = vld [vmem:[#allocation2 + $0x2b0] sm:$0xff] }
  0x3a   :  { %v441_v14 = vadd.f32 %v440_v5, %v121_v7  ;;  %v131_v19 = vld [vmem:[#allocation2 + $0x2e8] sm:$0xff]  ;;  %v128_v22 = vld [vmem:[#allocation2 + $0x2d0] sm:$0xff]  ;;  %v129_v23 = vld [vmem:[#allocation2 + $0x2d8] sm:$0xff] }
  0x3b   :  { %382 = vadd.xlane.f32.xlu0 %v381_v10  ;;  %v126_v10 = vld [vmem:[#allocation2 + $0x2c0] sm:$0xff]  ;;  %v437_v16 = vadd.f32 %v436_v8, %v118_v11  ;;  %v133_v27 = vld [vmem:[#allocation2 + $0x2f8] sm:$0xff]  ;;  %v135_v33 = vld [vmem:[#allocation2 + $0x308] sm:$0xff] }
  0x3c   :  { %v448_v15 = vadd.f32 %v126_v10, %v125_v9  ;;  %v137_v29 = vld [vmem:[#allocation2 + $0x318] sm:$0xff]  ;;  %v130_v31 = vld [vmem:[#allocation2 + $0x2e0] sm:$0xff]  ;;  %v139_v37 = vld [vmem:[#allocation2 + $0x328] sm:$0xff] }
  0x3d   :  { %394 = vadd.xlane.f32.xlu1 %v393_v18  ;;  %v444_v18 = vadd.f32 %v123_v13, %v122_v12  ;;  %v134_v32 = vld [vmem:[#allocation2 + $0x300] sm:$0xff]  ;;  %v143_v39 = vld [vmem:[#allocation2 + $0x348] sm:$0xff]  ;;  %v136_v41 = vld [vmem:[#allocation2 + $0x310] sm:$0xff] }
  0x3e   :  { %v449_v24 = vadd.f32 %v448_v15, %v127_v17  ;;  %v140_v42 = vld [vmem:[#allocation2 + $0x330] sm:$0xff]  ;;  %v141_v43 = vld [vmem:[#allocation2 + $0x338] sm:$0xff]  ;;  %v142_v51 = vld [vmem:[#allocation2 + $0x340] sm:$0xff] }
  0x3f   :  { %390 = vadd.xlane.f32.xlu0 %v389_v20  ;;  %v132_v20 = vld [vmem:[#allocation2 + $0x2f0] sm:$0xff]  ;;  %v445_v26 = vadd.f32 %v444_v18, %v124_v21  ;;  %v145_v47 = vld [vmem:[#allocation2 + $0x358] sm:$0xff]  ;;  %v146_v52 = vld [vmem:[#allocation2 + $0x360] sm:$0xff] }
  0x40   :  { %v456_v25 = vadd.f32 %v132_v20, %v131_v19  ;;  %v149_v49 = vld [vmem:[#allocation2 + $0x378] sm:$0xff]  ;;  %v147_v53 = vld [vmem:[#allocation2 + $0x368] sm:$0xff]  ;;  %v148_v61 = vld [vmem:[#allocation2 + $0x370] sm:$0xff] }
  0x41   :  { %402 = vadd.xlane.f32.xlu1 %v401_v28  ;;  %v452_v28 = vadd.f32 %v129_v23, %v128_v22  ;;  %v151_v57 = vld [vmem:[#allocation2 + $0x388] sm:$0xff]  ;;  %v152_v62 = vld [vmem:[#allocation2 + $0x390] sm:$0xff]  ;;  %v153_v63 = vld [vmem:[#allocation2 + $0x398] sm:$0xff] }
  0x42   :  { %v457_v34 = vadd.f32 %v456_v25, %v133_v27  ;;  %v155_v59 = vld [vmem:[#allocation2 + $0x3a8] sm:$0xff]  ;;  %v157_v3 = vld [vmem:[#allocation2 + $0x3b8] sm:$0xff]  ;;  %v154_v7 = vld [vmem:[#allocation2 + $0x3a0] sm:$0xff] }
  0x43   :  { %398 = vadd.xlane.f32.xlu0 %v397_v30  ;;  %v138_v30 = vld [vmem:[#allocation2 + $0x320] sm:$0xff]  ;;  %v453_v36 = vadd.f32 %v452_v28, %v130_v31  ;;  %v161_v5 = vld [vmem:[#allocation2 + $0x3d8] sm:$0xff]  ;;  %v159_v9 = vld [vmem:[#allocation2 + $0x3c8] sm:$0xff] }
  0x44   :  { %v464_v35 = vadd.f32 %v138_v30, %v137_v29  ;;  %v158_v8 = vld [vmem:[#allocation2 + $0x3c0] sm:$0xff]  ;;  %v163_v13 = vld [vmem:[#allocation2 + $0x3e8] sm:$0xff]  ;;  %v160_v17 = vld [vmem:[#allocation2 + $0x3d0] sm:$0xff] }
  0x45   :  { %410 = vadd.xlane.f32.xlu1 %v409_v38  ;;  %v460_v38 = vadd.f32 %v135_v33, %v134_v32  ;;  %v167_v15 = vld [vmem:[#allocation2 + $0x408] sm:$0xff]  ;;  %v164_v18 = vld [vmem:[#allocation2 + $0x3f0] sm:$0xff]  ;;  %v165_v19 = vld [vmem:[#allocation2 + $0x3f8] sm:$0xff] }
  0x46   :  { %v465_v44 = vadd.f32 %v464_v35, %v139_v37  ;;  %v169_v23 = vld [vmem:[#allocation2 + $0x418] sm:$0xff]  ;;  %v166_v27 = vld [vmem:[#allocation2 + $0x400] sm:$0xff]  ;;  %v171_v29 = vld [vmem:[#allocation2 + $0x428] sm:$0xff] }
  0x47   :  { %406 = vadd.xlane.f32.xlu0 %v405_v40  ;;  %v144_v40 = vld [vmem:[#allocation2 + $0x350] sm:$0xff]  ;;  %v461_v46 = vadd.f32 %v460_v38, %v136_v41  ;;  %v173_v25 = vld [vmem:[#allocation2 + $0x438] sm:$0xff]  ;;  %v170_v28 = vld [vmem:[#allocation2 + $0x420] sm:$0xff] }
  0x48   :  { %v472_v45 = vadd.f32 %v144_v40, %v143_v39  ;;  %v175_v33 = vld [vmem:[#allocation2 + $0x448] sm:$0xff]  ;;  %v172_v37 = vld [vmem:[#allocation2 + $0x430] sm:$0xff]  ;;  %v177_v39 = vld [vmem:[#allocation2 + $0x458] sm:$0xff] }
  0x49   :  { %418 = vadd.xlane.f32.xlu1 %v417_v48  ;;  %v468_v48 = vadd.f32 %v141_v43, %v140_v42  ;;  %v179_v35 = vld [vmem:[#allocation2 + $0x468] sm:$0xff]  ;;  %v176_v38 = vld [vmem:[#allocation2 + $0x450] sm:$0xff]  ;;  %v181_v43 = vld [vmem:[#allocation2 + $0x478] sm:$0xff] }
  0x4a   :  { %v473_v54 = vadd.f32 %v472_v45, %v145_v47  ;;  %v185_v45 = vld [vmem:[#allocation2 + $0x498] sm:$0xff]  ;;  %v178_v47 = vld [vmem:[#allocation2 + $0x460] sm:$0xff] }
  0x4b   :  { %414 = vadd.xlane.f32.xlu0 %v413_v50  ;;  %v150_v50 = vld [vmem:[#allocation2 + $0x380] sm:$0xff]  ;;  %v469_v56 = vadd.f32 %v468_v48, %v142_v51 }
  0x4c   :  { %v480_v55 = vadd.f32 %v150_v50, %v149_v49  ;;  %v182_v48 = vld [vmem:[#allocation2 + $0x480] sm:$0xff]  ;;  %v183_v49 = vld [vmem:[#allocation2 + $0x488] sm:$0xff] }
  0x4d   :  { %426 = vadd.xlane.f32.xlu1 %v425_v58  ;;  %v476_v58 = vadd.f32 %v147_v53, %v146_v52  ;;  %v187_v53 = vld [vmem:[#allocation2 + $0x4a8] sm:$0xff] }
  0x4e   :  { %v481_v0 = vadd.f32 %v480_v55, %v151_v57  ;;  %v191_v55 = vld [vmem:[#allocation2 + $0x4c8] sm:$0xff]  ;;  %v184_v57 = vld [vmem:[#allocation2 + $0x490] sm:$0xff] }
  0x4f   :  { %422 = vadd.xlane.f32.xlu0 %v421_v60  ;;  %v156_v60 = vld [vmem:[#allocation2 + $0x3b0] sm:$0xff]  ;;  %v477_v2 = vadd.f32 %v476_v58, %v148_v61 }
  0x50   :  { %v488_v1 = vadd.f32 %v156_v60, %v155_v59  ;;  %v188_v58 = vld [vmem:[#allocation2 + $0x4b0] sm:$0xff]  ;;  %v189_v59 = vld [vmem:[#allocation2 + $0x4b8] sm:$0xff] }
  0x51   :  { %434 = vadd.xlane.f32.xlu1 %v433_v4  ;;  %v484_v4 = vadd.f32 %v153_v63, %v152_v62  ;;  %v193_v63 = vld [vmem:[#allocation2 + $0x4d8] sm:$0xff] }
  0x52   :  { %v489_v10 = vadd.f32 %v488_v1, %v157_v3  ;;  %v197_v1 = vld [vmem:[#allocation2 + $0x4f8] sm:$0xff]  ;;  %v190_v3 = vld [vmem:[#allocation2 + $0x4c0] sm:$0xff] }
  0x53   :  { %430 = vadd.xlane.f32.xlu0 %v429_v6  ;;  %v162_v6 = vld [vmem:[#allocation2 + $0x3e0] sm:$0xff]  ;;  %v485_v12 = vadd.f32 %v484_v4, %v154_v7 }
  0x54   :  { %v496_v11 = vadd.f32 %v162_v6, %v161_v5  ;;  %v194_v4 = vld [vmem:[#allocation2 + $0x4e0] sm:$0xff]  ;;  %v195_v5 = vld [vmem:[#allocation2 + $0x4e8] sm:$0xff] }
  0x55   :  { %442 = vadd.xlane.f32.xlu1 %v441_v14  ;;  %v492_v14 = vadd.f32 %v159_v9, %v158_v8  ;;  %v199_v9 = vld [vmem:[#allocation2 + $0x508] sm:$0xff] }
  0x56   :  { %v497_v20 = vadd.f32 %v496_v11, %v163_v13  ;;  %v203_v11 = vld [vmem:[#allocation2 + $0x528] sm:$0xff]  ;;  %v196_v13 = vld [vmem:[#allocation2 + $0x4f0] sm:$0xff] }
  0x57   :  { %438 = vadd.xlane.f32.xlu0 %v437_v16  ;;  %v168_v16 = vld [vmem:[#allocation2 + $0x410] sm:$0xff]  ;;  %v493_v22 = vadd.f32 %v492_v14, %v160_v17 }
  0x58   :  { %v504_v21 = vadd.f32 %v168_v16, %v167_v15  ;;  %v200_v14 = vld [vmem:[#allocation2 + $0x510] sm:$0xff]  ;;  %v201_v15 = vld [vmem:[#allocation2 + $0x518] sm:$0xff] }
  0x59   :  { %450 = vadd.xlane.f32.xlu1 %v449_v24  ;;  %v500_v24 = vadd.f32 %v165_v19, %v164_v18  ;;  %v205_v19 = vld [vmem:[#allocation2 + $0x538] sm:$0xff] }
  0x5a   :  { %v505_v30 = vadd.f32 %v504_v21, %v169_v23  ;;  %v209_v21 = vld [vmem:[#allocation2 + $0x558] sm:$0xff]  ;;  %v202_v23 = vld [vmem:[#allocation2 + $0x520] sm:$0xff] }
  0x5b   :  { %446 = vadd.xlane.f32.xlu0 %v445_v26  ;;  %v174_v26 = vld [vmem:[#allocation2 + $0x440] sm:$0xff]  ;;  %v501_v32 = vadd.f32 %v500_v24, %v166_v27 }
  0x5c   :  { %v512_v31 = vadd.f32 %v174_v26, %v173_v25  ;;  %v206_v24 = vld [vmem:[#allocation2 + $0x540] sm:$0xff]  ;;  %v207_v25 = vld [vmem:[#allocation2 + $0x548] sm:$0xff] }
  0x5d   :  { %458 = vadd.xlane.f32.xlu1 %v457_v34  ;;  %v508_v34 = vadd.f32 %v171_v29, %v170_v28  ;;  %v211_v29 = vld [vmem:[#allocation2 + $0x568] sm:$0xff] }
  0x5e   :  { %v513_v40 = vadd.f32 %v512_v31, %v175_v33  ;;  %v215_v31 = vld [vmem:[#allocation2 + $0x588] sm:$0xff]  ;;  %v208_v33 = vld [vmem:[#allocation2 + $0x550] sm:$0xff] }
  0x5f   :  { %454 = vadd.xlane.f32.xlu0 %v453_v36  ;;  %v180_v36 = vld [vmem:[#allocation2 + $0x470] sm:$0xff]  ;;  %v509_v42 = vadd.f32 %v508_v34, %v172_v37 }
  0x60   :  { %v520_v41 = vadd.f32 %v180_v36, %v179_v35  ;;  %v212_v34 = vld [vmem:[#allocation2 + $0x570] sm:$0xff]  ;;  %v213_v35 = vld [vmem:[#allocation2 + $0x578] sm:$0xff] }
  0x61   :  { %466 = vadd.xlane.f32.xlu1 %v465_v44  ;;  %v516_v44 = vadd.f32 %v177_v39, %v176_v38  ;;  %v217_v39 = vld [vmem:[#allocation2 + $0x598] sm:$0xff] }
  0x62   :  { %v521_v50 = vadd.f32 %v520_v41, %v181_v43  ;;  %v221_v41 = vld [vmem:[#allocation2 + $0x5b8] sm:$0xff]  ;;  %v214_v43 = vld [vmem:[#allocation2 + $0x580] sm:$0xff] }
  0x63   :  { %462 = vadd.xlane.f32.xlu0 %v461_v46  ;;  %v186_v46 = vld [vmem:[#allocation2 + $0x4a0] sm:$0xff]  ;;  %v517_v52 = vadd.f32 %v516_v44, %v178_v47 }
  0x64   :  { %v528_v51 = vadd.f32 %v186_v46, %v185_v45  ;;  %v218_v44 = vld [vmem:[#allocation2 + $0x5a0] sm:$0xff]  ;;  %v219_v45 = vld [vmem:[#allocation2 + $0x5a8] sm:$0xff] }
  0x65   :  { %474 = vadd.xlane.f32.xlu1 %v473_v54  ;;  %v524_v54 = vadd.f32 %v183_v49, %v182_v48  ;;  %v223_v49 = vld [vmem:[#allocation2 + $0x5c8] sm:$0xff] }
  0x66   :  { %v529_v60 = vadd.f32 %v528_v51, %v187_v53  ;;  %v227_v51 = vld [vmem:[#allocation2 + $0x5e8] sm:$0xff]  ;;  %v220_v53 = vld [vmem:[#allocation2 + $0x5b0] sm:$0xff] }
  0x67   :  { %470 = vadd.xlane.f32.xlu0 %v469_v56  ;;  %v192_v56 = vld [vmem:[#allocation2 + $0x4d0] sm:$0xff]  ;;  %v525_v62 = vadd.f32 %v524_v54, %v184_v57 }
  0x68   :  { %v536_v61 = vadd.f32 %v192_v56, %v191_v55  ;;  %v224_v54 = vld [vmem:[#allocation2 + $0x5d0] sm:$0xff]  ;;  %v225_v55 = vld [vmem:[#allocation2 + $0x5d8] sm:$0xff] }
  0x69   :  { %482 = vadd.xlane.f32.xlu1 %v481_v0  ;;  %v532_v0 = vadd.f32 %v189_v59, %v188_v58  ;;  %v229_v56 = vld [vmem:[#allocation2 + $0x5f8] sm:$0xff]  ;;  %v226_v59 = vld [vmem:[#allocation2 + $0x5e0] sm:$0xff] }
  0x6a   :  { %v537_v6 = vadd.f32 %v536_v61, %v193_v63  ;;  %v234_v61 = vld [vmem:[#allocation2 + $0x620] sm:$0xff]  ;;  %v580_v63 = vadd.f32 %v225_v55, %v224_v54 }
  0x6b   :  { %478 = vadd.xlane.f32.xlu0 %v477_v2  ;;  %v198_v2 = vld [vmem:[#allocation2 + $0x500] sm:$0xff]  ;;  %v533_v8 = vadd.f32 %v532_v0, %v190_v3  ;;  %v240_v3 = vld [vmem:[#allocation2 + $0x650] sm:$0xff] }
  0x6c   :  { %v544_v7 = vadd.f32 %v198_v2, %v197_v1  ;;  %v230_v0 = vld [vmem:[#allocation2 + $0x600] sm:$0xff]  ;;  %v231_v1 = vld [vmem:[#allocation2 + $0x608] sm:$0xff] }
  0x6d   :  { %490 = vadd.xlane.f32.xlu1 %v489_v10  ;;  %v540_v10 = vadd.f32 %v195_v5, %v194_v4  ;;  %v239_v2 = vld [vmem:[#allocation2 + $0x648] sm:$0xff]  ;;  %v236_v4 = vld [vmem:[#allocation2 + $0x630] sm:$0xff]  ;;  %v237_v5 = vld [vmem:[#allocation2 + $0x638] sm:$0xff] }
  0x6e   :  { %v545_v16 = vadd.f32 %v544_v7, %v199_v9  ;;  %v245_v7 = vld [vmem:[#allocation2 + $0x678] sm:$0xff]  ;;  %v242_v9 = vld [vmem:[#allocation2 + $0x660] sm:$0xff] }
  0x6f   :  { %486 = vadd.xlane.f32.xlu0 %v485_v12  ;;  %v204_v12 = vld [vmem:[#allocation2 + $0x530] sm:$0xff]  ;;  %v541_v18 = vadd.f32 %v540_v10, %v196_v13  ;;  %v243_v10 = vld [vmem:[#allocation2 + $0x668] sm:$0xff] }
  0x70   :  { %v552_v17 = vadd.f32 %v204_v12, %v203_v11  ;;  %v251_v11 = vld [vmem:[#allocation2 + $0x6a8] sm:$0xff]  ;;  %v252_v12 = vld [vmem:[#allocation2 + $0x6b0] sm:$0xff] }
  0x71   :  { %498 = vadd.xlane.f32.xlu1 %v497_v20  ;;  %v548_v20 = vadd.f32 %v201_v15, %v200_v14  ;;  %v232_v15 = vld [vmem:[#allocation2 + $0x610] sm:$0xff] }
  0x72   :  { %v553_v26 = vadd.f32 %v552_v17, %v205_v19  ;;  %v249_v17 = vld [vmem:[#allocation2 + $0x698] sm:$0xff]  ;;  %v258_v19 = vld [vmem:[#allocation2 + $0x6e0] sm:$0xff] }
  0x73   :  { %494 = vadd.xlane.f32.xlu0 %v493_v22  ;;  %v210_v22 = vld [vmem:[#allocation2 + $0x560] sm:$0xff]  ;;  %v549_v28 = vadd.f32 %v548_v20, %v202_v23  ;;  %v588_v23 = vadd.f32 %v231_v1, %v230_v0 }
  0x74   :  { %v560_v27 = vadd.f32 %v210_v22, %v209_v21  ;;  %v254_v20 = vld [vmem:[#allocation2 + $0x6c0] sm:$0xff]  ;;  %v255_v21 = vld [vmem:[#allocation2 + $0x6c8] sm:$0xff]  ;;  %v581_v22 = vadd.f32 %v580_v63, %v226_v59 }
  0x75   :  { %506 = vadd.xlane.f32.xlu1 %v505_v30  ;;  %v556_v30 = vadd.f32 %v207_v25, %v206_v24  ;;  %v241_v24 = vld [vmem:[#allocation2 + $0x658] sm:$0xff]  ;;  %v263_v25 = vld [vmem:[#allocation2 + $0x708] sm:$0xff]  ;;  %v620_v55 = vadd.f32 %v255_v21, %v254_v20  ;;  %v278_v59 = vld [vmem:[#allocation2 + $0x780] sm:$0xff] }
  0x76   :  { %v561_v36 = vadd.f32 %v560_v27, %v211_v29  ;;  %v260_v27 = vld [vmem:[#allocation2 + $0x6f0] sm:$0xff]  ;;  %v269_v29 = vld [vmem:[#allocation2 + $0x738] sm:$0xff] }
  0x77   :  { %502 = vadd.xlane.f32.xlu0 %v501_v32  ;;  %v216_v32 = vld [vmem:[#allocation2 + $0x590] sm:$0xff]  ;;  %v557_v38 = vadd.f32 %v556_v30, %v208_v33  ;;  %v600_v30 = vadd.f32 %v240_v3, %v239_v2  ;;  %v266_v33 = vld [vmem:[#allocation2 + $0x720] sm:$0xff]  ;;  %v277_v3 = vld [vmem:[#allocation2 + $0x778] sm:$0xff] }
  0x78   :  { %v568_v37 = vadd.f32 %v216_v32, %v215_v31  ;;  %v238_v31 = vld [vmem:[#allocation2 + $0x640] sm:$0xff]  ;;  %v268_v2 = vld [vmem:[#allocation2 + $0x730] sm:$0xff] }
  0x79   :  { %514 = vadd.xlane.f32.xlu1 %v513_v40  ;;  %v564_v40 = vadd.f32 %v213_v35, %v212_v34  ;;  %v270_v32 = vld [vmem:[#allocation2 + $0x740] sm:$0xff]  ;;  %v267_v34 = vld [vmem:[#allocation2 + $0x728] sm:$0xff]  ;;  %v596_v35 = vadd.f32 %v237_v5, %v236_v4  ;;  %v288_v5 = vld [vmem:[#allocation2 + $0x7d0] sm:$0xff] }
  0x7a   :  { %v569_v46 = vadd.f32 %v568_v37, %v217_v39  ;;  %v244_v37 = vld [vmem:[#allocation2 + $0x670] sm:$0xff]  ;;  %v275_v39 = vld [vmem:[#allocation2 + $0x768] sm:$0xff]  ;;  %v640_v1 = vadd.f32 %v270_v32, %v269_v29  ;;  %v274_v4 = vld [vmem:[#allocation2 + $0x760] sm:$0xff] }
  0x7b   :  { %510 = vadd.xlane.f32.xlu0 %v509_v42  ;;  %v222_v42 = vld [vmem:[#allocation2 + $0x5c0] sm:$0xff]  ;;  %v565_v48 = vadd.f32 %v564_v40, %v214_v43  ;;  %v276_v40 = vld [vmem:[#allocation2 + $0x770] sm:$0xff]  ;;  %v303_v29 = vld [vmem:[#allocation2 + $0x848] sm:$0xff] }
  0x7c   :  { %v576_v47 = vadd.f32 %v222_v42, %v221_v41  ;;  %v272_v41 = vld [vmem:[#allocation2 + $0x750] sm:$0xff] }
  0x7d   :  { %522 = vadd.xlane.f32.xlu1 %v521_v50  ;;  %v572_v50 = vadd.f32 %v219_v45, %v218_v44  ;;  %v604_v44 = vadd.f32 %v243_v10, %v242_v9  ;;  %v616_v45 = vadd.f32 %v252_v12, %v251_v11  ;;  %v636_v9 = vadd.f32 %v267_v34, %v266_v33  ;;  %v283_v12 = vld [vmem:[#allocation2 + $0x7a8] sm:$0xff]  ;;  %v289_v34 = vld [vmem:[#allocation2 + $0x7d8] sm:$0xff] }
  0x7e   :  { %v577_v57 = vadd.f32 %v576_v47, %v223_v49  ;;  %v259_v47 = vld [vmem:[#allocation2 + $0x6e8] sm:$0xff]  ;;  %v273_v49 = vld [vmem:[#allocation2 + $0x758] sm:$0xff]  ;;  %v648_v10 = vadd.f32 %v276_v40, %v275_v39 }
  0x7f   :  { %518 = vadd.xlane.f32.xlu0 %v517_v52  ;;  %v228_v52 = vld [vmem:[#allocation2 + $0x5f0] sm:$0xff]  ;;  %v644_v11 = vadd.f32 %v273_v49, %v272_v41  ;;  %v3917_v20 = vadd.f32 %v604_v44, %v244_v37  ;;  %v317_v44 = vld [vmem:[#allocation2 + $0x8b8] sm:$0xff] }
  0x80   :  { %v584_v58 = vadd.f32 %v228_v52, %v227_v51  ;;  %v282_v51 = vld [vmem:[#allocation2 + $0x7a0] sm:$0xff]  ;;  %v589_v52 = vadd.f32 %v588_v23, %v232_v15  ;;  %v280_v23 = vld [vmem:[#allocation2 + $0x790] sm:$0xff] }
  0x81   :  { %530 = vadd.xlane.f32.xlu1 %v529_v60  ;;  %v233_v60 = vld [vmem:[#allocation2 + $0x618] sm:$0xff]  ;;  %v290_v15 = vld [vmem:[#allocation2 + $0x7e0] sm:$0xff]  ;;  %v308_v37 = vld [vmem:[#allocation2 + $0x870] sm:$0xff] }
  0x82   :  { %v585_v13 = vadd.f32 %v584_v58, %v229_v56  ;;  %v592_v14 = vadd.f32 %v234_v61, %v233_v60  ;;  %v265_v56 = vld [vmem:[#allocation2 + $0x718] sm:$0xff]  ;;  %v271_v58 = vld [vmem:[#allocation2 + $0x748] sm:$0xff] }
  0x83   :  { %526 = vadd.xlane.f32.xlu0 %v525_v62  ;;  %v573_v62 = vadd.f32 %v572_v50, %v220_v53  ;;  %v281_v50 = vld [vmem:[#allocation2 + $0x798] sm:$0xff]  ;;  %v279_v60 = vld [vmem:[#allocation2 + $0x788] sm:$0xff]  ;;  %v3931_v40 = vadd.f32 %v640_v1, %v271_v58 }
  0x84   :  { %v287_v61 = vld [vmem:[#allocation2 + $0x7c8] sm:$0xff]  ;;  %v652_v33 = vadd.f32 %v279_v60, %v278_v59  ;;  %v298_v60 = vld [vmem:[#allocation2 + $0x820] sm:$0xff] }
  0x85   :  { %538 = vadd.xlane.f32.xlu1 %v537_v6  ;;  %v235_v6 = vld [vmem:[#allocation2 + $0x628] sm:$0xff]  ;;  %v664_v41 = vadd.f32 %v288_v5, %v287_v61  ;;  %v324_v61 = vld [vmem:[#allocation2 + $0x8f0] sm:$0xff] }
  0x86   :  { %v593_v42 = vadd.f32 %v592_v14, %v235_v6  ;;  %v284_v6 = vld [vmem:[#allocation2 + $0x7b0] sm:$0xff]  ;;  %v294_v14 = vld [vmem:[#allocation2 + $0x800] sm:$0xff]  ;;  %v3941_v1 = vadd.f32 %v652_v33, %v280_v23 }
  0x87   :  { %534 = vadd.xlane.f32.xlu0 %v533_v8  ;;  %v246_v8 = vld [vmem:[#allocation2 + $0x680] sm:$0xff] }
  0x88   :  { %v608_v43 = vadd.f32 %v246_v8, %v245_v7  ;;  %v285_v7 = vld [vmem:[#allocation2 + $0x7b8] sm:$0xff]  ;;  %v597_v8 = vadd.f32 %v596_v35, %v238_v31  ;;  %v311_v35 = vld [vmem:[#allocation2 + $0x888] sm:$0xff] }
  0x89   :  { %546 = vadd.xlane.f32.xlu1 %v545_v16  ;;  %v248_v16 = vld [vmem:[#allocation2 + $0x690] sm:$0xff]  ;;  %v660_v49 = vadd.f32 %v285_v7, %v284_v6  ;;  %v329_v6 = vld [vmem:[#allocation2 + $0x918] sm:$0xff]  ;;  %v330_v7 = vld [vmem:[#allocation2 + $0x920] sm:$0xff] }
  0x8a   :  { %v612_v53 = vadd.f32 %v249_v17, %v248_v16  ;;  %v291_v16 = vld [vmem:[#allocation2 + $0x7e8] sm:$0xff]  ;;  %v720_v33 = vadd.f32 %v330_v7, %v329_v6 }
  0x8b   :  { %542 = vadd.xlane.f32.xlu0 %v541_v18  ;;  %v257_v18 = vld [vmem:[#allocation2 + $0x6d8] sm:$0xff]  ;;  %v299_v17 = vld [vmem:[#allocation2 + $0x828] sm:$0xff]  ;;  %v668_v58 = vadd.f32 %v291_v16, %v290_v15 }
  0x8c   :  { %v624_v54 = vadd.f32 %v258_v19, %v257_v18  ;;  %v300_v18 = vld [vmem:[#allocation2 + $0x830] sm:$0xff]  ;;  %v313_v16 = vld [vmem:[#allocation2 + $0x898] sm:$0xff] }
  0x8d   :  { %554 = vadd.xlane.f32.xlu1 %v553_v26  ;;  %v264_v26 = vld [vmem:[#allocation2 + $0x710] sm:$0xff]  ;;  %v680_v59 = vadd.f32 %v300_v18, %v299_v17  ;;  %v319_v17 = vld [vmem:[#allocation2 + $0x8c8] sm:$0xff] }
  0x8e   :  { %v632_v63 = vadd.f32 %v264_v26, %v263_v25  ;;  %v297_v25 = vld [vmem:[#allocation2 + $0x818] sm:$0xff]  ;;  %v3923_v31 = vadd.f32 %v624_v54, %v259_v47  ;;  %v3935_v47 = vadd.f32 %v648_v10, %v277_v3  ;;  %v315_v54 = vld [vmem:[#allocation2 + $0x8a8] sm:$0xff] }
  0x8f   :  { %550 = vadd.xlane.f32.xlu0 %v549_v28  ;;  %v261_v28 = vld [vmem:[#allocation2 + $0x6f8] sm:$0xff]  ;;  %v307_v3 = vld [vmem:[#allocation2 + $0x868] sm:$0xff] }
  0x90   :  { %v628_v0 = vadd.f32 %v261_v28, %v260_v27  ;;  %v305_v26 = vld [vmem:[#allocation2 + $0x858] sm:$0xff]  ;;  %v306_v27 = vld [vmem:[#allocation2 + $0x860] sm:$0xff] }
  0x91   :  { %562 = vadd.xlane.f32.xlu1 %v561_v36  ;;  %v247_v36 = vld [vmem:[#allocation2 + $0x688] sm:$0xff]  ;;  %v302_v28 = vld [vmem:[#allocation2 + $0x840] sm:$0xff] }
  0x92   :  { %v3915_v19 = vadd.f32 %v608_v43, %v247_v36  ;;  %v312_v36 = vld [vmem:[#allocation2 + $0x890] sm:$0xff]  ;;  %v309_v43 = vld [vmem:[#allocation2 + $0x878] sm:$0xff]  ;;  %v684_v5 = vadd.f32 %v303_v29, %v302_v28  ;;  %v322_v29 = vld [vmem:[#allocation2 + $0x8e0] sm:$0xff] }
  0x93   :  { %558 = vadd.xlane.f32.xlu0 %v557_v38  ;;  %v253_v38 = vld [vmem:[#allocation2 + $0x6b8] sm:$0xff]  ;;  %v696_v10 = vadd.f32 %v312_v36, %v311_v35 }
  0x94   :  { %v3919_v21 = vadd.f32 %v616_v45, %v253_v38  ;;  %v3927_v38 = vadd.f32 %v632_v63, %v265_v56  ;;  %v318_v45 = vld [vmem:[#allocation2 + $0x8c0] sm:$0xff]  ;;  %v320_v63 = vld [vmem:[#allocation2 + $0x8d0] sm:$0xff]  ;;  %v325_v28 = vld [vmem:[#allocation2 + $0x8f8] sm:$0xff] }
  0x95   :  { %570 = vadd.xlane.f32.xlu1 %v569_v46  ;;  %v250_v46 = vld [vmem:[#allocation2 + $0x6a0] sm:$0xff] }
  0x97   :  { %566 = vadd.xlane.f32.xlu0 %v565_v48  ;;  %v256_v48 = vld [vmem:[#allocation2 + $0x6d0] sm:$0xff] }
  0x98   :  { %v3925_v32 = vadd.f32 %v620_v55, %v256_v48  ;;  %v3937_v48 = vadd.f32 %v644_v11, %v274_v4  ;;  %v323_v55 = vld [vmem:[#allocation2 + $0x8e8] sm:$0xff]  ;;  %v688_v4 = vadd.f32 %v306_v27, %v305_v26  ;;  %v692_v11 = vadd.f32 %v309_v43, %v308_v37  ;;  %v316_v27 = vld [vmem:[#allocation2 + $0x8b0] sm:$0xff] }
  0x99   :  { %578 = vadd.xlane.f32.xlu1 %v577_v57  ;;  %v262_v57 = vld [vmem:[#allocation2 + $0x700] sm:$0xff] }
  0x9a   :  { %v3929_v39 = vadd.f32 %v628_v0, %v262_v57  ;;  %v321_v0 = vld [vmem:[#allocation2 + $0x8d8] sm:$0xff]  ;;  %v3957_v36 = vadd.f32 %v688_v4, %v307_v3  ;;  %v3531_v4 = vld [vmem:[#allocation2 + $0x10] sm:$0xff] }
  0x9b   :  { %574 = vadd.xlane.f32.xlu0 %v573_v62  ;;  %v601_v62 = vadd.f32 %v600_v30, %v241_v24  ;;  %v296_v24 = vld [vmem:[#allocation2 + $0x810] sm:$0xff]  ;;  %v3921_v30 = vadd.f32 %v612_v53, %v250_v46  ;;  %v3933_v46 = vadd.f32 %v636_v9, %v268_v2  ;;  %v314_v53 = vld [vmem:[#allocation2 + $0x8a0] sm:$0xff]  ;;  %v3943_v9 = vadd.f32 %v664_v41, %v289_v34 }
  0x9c   :  { %v676_v2 = vadd.f32 %v297_v25, %v296_v24  ;;  %v700_v18 = vadd.f32 %v315_v54, %v314_v53  ;;  %v708_v23 = vadd.f32 %v321_v0, %v320_v63  ;;  %v3526_v54 = vld [vmem:[#allocation2 + $0x30] sm:$0xff]  ;;  %v3529_v63 = vld [vmem:[#allocation2] sm:$0xff] }
  0x9d   :  { %586 = vadd.xlane.f32.xlu1 %v585_v13  ;;  %v293_v13 = vld [vmem:[#allocation2 + $0x7f8] sm:$0xff] }
  0x9e   :  { %v672_v57 = vadd.f32 %v294_v14, %v293_v13  ;;  %v326_v13 = vld [vmem:[#allocation2 + $0x900] sm:$0xff]  ;;  %v327_v14 = vld [vmem:[#allocation2 + $0x908] sm:$0xff]  ;;  %v3955_v35 = vadd.f32 %v676_v2, %v298_v60  ;;  %v3971_v53 = vadd.f32 %v708_v23, %v322_v29  ;;  %v3534_v23 = vld [vmem:[#allocation2 + $0x58] sm:$0xff] }
  0x9f   :  { %582 = vadd.xlane.f32.xlu0 %v581_v22  ;;  %v656_v22 = vadd.f32 %v282_v51, %v281_v50  ;;  %v295_v50 = vld [vmem:[#allocation2 + $0x808] sm:$0xff]  ;;  %v292_v51 = vld [vmem:[#allocation2 + $0x7f0] sm:$0xff]  ;;  %v716_v41 = vadd.f32 %v327_v14, %v326_v13  ;;  %v3535_v29 = vld [vmem:[#allocation2 + $0x18] sm:$0xff] }
  0xa0   :  { %v3948_v24 = vadd.f32 %v672_v57, %v295_v50  ;;  %v3950_v25 = vadd.f32 %v668_v58, %v292_v51  ;;  %v328_v50 = vld [vmem:[#allocation2 + $0x910] sm:$0xff]  ;;  %v3527_v57 = vld [vmem:[#allocation2 + $0x38] sm:$0xff]  ;;  %v3530_v2 = vld [vmem:[#allocation2 + $0x8] sm:$0xff] }
  0xa1   :  { %594 = vadd.xlane.f32.xlu1 %v593_v42  ;;  %v286_v42 = vld [vmem:[#allocation2 + $0x7c0] sm:$0xff]  ;;  %v3939_v56 = vadd.f32 %v656_v22, %v283_v12  ;;  %v704_v12 = vadd.f32 %v318_v45, %v317_v44  ;;  %v712_v22 = vadd.f32 %v324_v61, %v323_v55  ;;  %v3961_v44 = vadd.f32 %v696_v10, %v313_v16 }
  0xa2   :  { %v3945_v15 = vadd.f32 %v660_v49, %v286_v42  ;;  %v3989_v7 = vadd.f32 %v716_v41, %v328_v50  ;;  %v3537_v41 = vld [vmem:[#allocation2 + $0x28] sm:$0xff] }
  0xa3   :  { %590 = vadd.xlane.f32.xlu0 %v589_v52  ;;  %v301_v52 = vld [vmem:[#allocation2 + $0x838] sm:$0xff]  ;;  %v3965_v49 = vadd.f32 %v704_v12, %v319_v17 }
  0xa4   :  { %v3952_v26 = vadd.f32 %v680_v59, %v301_v52  ;;  %v3969_v52 = vadd.f32 %v712_v22, %v325_v28  ;;  %v3528_v59 = vld [vmem:[#allocation2 + $0x40] sm:$0xff] }
  0xa5   :  { %602 = vadd.xlane.f32.xlu1 %v601_v62  ;;  %v304_v62 = vld [vmem:[#allocation2 + $0x850] sm:$0xff] }
  0xa6   :  { %v3959_v37 = vadd.f32 %v684_v5, %v304_v62 }
  0xa7   :  { %598 = vadd.xlane.f32.xlu0 %v597_v8  ;;  %v310_v8 = vld [vmem:[#allocation2 + $0x880] sm:$0xff] }
  0xa8   :  { %v3963_v45 = vadd.f32 %v692_v11, %v310_v8  ;;  %v3532_v8 = vld [vmem:[#allocation2 + $0x48] sm:$0xff] }
  0xa9   :  { %610 = vadd.xlane.f32.xlu1 %v3915_v19  ;;  %v331_v19 = vld [vmem:[#allocation2 + $0x928] sm:$0xff] }
  0xaa   :  { %v343_v34 = vpop.xlane.xlu1 %342  ;;  %v3980_v61 = vadd.f32 %v720_v33, %v331_v19 }
  0xab   :  { %606 = vadd.xlane.f32.xlu0 %v3917_v20  ;;  %v726_v42 = vmul.f32 0.0026041667, %v343_v34  ;;  %v3967_v20 = vadd.f32 %v700_v18, %v316_v27  ;;  %v3533_v18 = vld [vmem:[#allocation2 + $0x50] sm:$0xff]  ;;  %v3536_v34 = vld [vmem:[#allocation2 + $0x20] sm:$0xff] }
  0xac   :  { %v335_v43 = vpop.xlane.xlu0 %334 }
  0xad   :  { %v724_v51 = vmul.f32 0.0026041667, %v335_v43  ;;  %v3973_v55 = vsub.f32 %v3526_v54, %v726_v42  ;;  %v3975_v58 = vsub.f32 %v3527_v57, %v726_v42  ;;  %v3977_v60 = vsub.f32 %v3528_v59, %v726_v42  ;;  %618 = vadd.xlane.f32.xlu1 %v3919_v21 }
  0xae   :  { %v347_v6 = vpop.xlane.xlu1 %346 }
  0xaf   :  { %7039 = vst [vmem:[#allocation11_spill] sm:$0xff] %v3973_v55  ;;  %7040 = vst [vmem:[#allocation12_spill] sm:$0xff] %v3975_v58  ;;  %v3982_v0 = vsub.f32 %v3529_v63, %v724_v51  ;;  %v3984_v3 = vsub.f32 %v3530_v2, %v724_v51  ;;  %v3986_v5 = vsub.f32 %v3531_v4, %v724_v51  ;;  %614 = vadd.xlane.f32.xlu0 %v3921_v30 }
  0xb0   :  { %7041 = vst [vmem:[#allocation13_spill] sm:$0xff] %v3977_v60  ;;  %v727_v62 = vmul.f32 0.0026041667, %v347_v6  ;;  %v339_v10 = vpop.xlane.xlu0 %338  ;;  %v1122_v21 = vmul.f32 %v3973_v55, %v3973_v55  ;;  %v1123_v11 = vmul.f32 %v3975_v58, %v3975_v58  ;;  %v1124_v12 = vmul.f32 %v3977_v60, %v3977_v60  ;;  %v3538_v6 = vld [vmem:[#allocation2 + $0x78] sm:$0xff] }
  0xb1   :  { %7042 = vst [vmem:[#allocation14_spill] sm:$0xff] %v3982_v0  ;;  %7043 = vst [vmem:[#allocation15_spill] sm:$0xff] %v3984_v3  ;;  %v725_v13 = vmul.f32 0.0026041667, %v339_v10  ;;  %v1116_v14 = vmul.f32 %v3982_v0, %v3982_v0  ;;  %v1117_v30 = vmul.f32 %v3984_v3, %v3984_v3  ;;  %v1118_v16 = vmul.f32 %v3986_v5, %v3986_v5  ;;  %v3539_v10 = vld [vmem:[#allocation2 + $0x80] sm:$0xff] }
  0xb2   :  { %7044 = vst [vmem:[#allocation16_spill] sm:$0xff] %v3986_v5  ;;  %v4003_v17 = vsub.f32 %v3532_v8, %v727_v62  ;;  %v4005_v22 = vsub.f32 %v3533_v18, %v727_v62  ;;  %v4007_v27 = vsub.f32 %v3534_v23, %v727_v62  ;;  %626 = vadd.xlane.f32.xlu1 %v3923_v31  ;;  %v355_v43 = vpop.xlane.xlu1 %354  ;;  %v3542_v8 = vld [vmem:[#allocation2 + $0x68] sm:$0xff]  ;;  %v3543_v23 = vld [vmem:[#allocation2 + $0x70] sm:$0xff] }
  0xb3   :  { %v1418_v28 = vadd.f32 %v1123_v11, %v1122_v21  ;;  %v4010_v33 = vsub.f32 %v3535_v29, %v725_v13  ;;  %v4012_v19 = vsub.f32 %v3536_v34, %v725_v13  ;;  %v4014_v42 = vsub.f32 %v3537_v41, %v725_v13  ;;  %622 = vadd.xlane.f32.xlu0 %v3925_v32  ;;  %v3540_v11 = vld [vmem:[#allocation2 + $0x88] sm:$0xff] }
  0xb4   :  { %7045 = vst [vmem:[#allocation17_spill] sm:$0xff] %v4003_v17  ;;  %7046 = vst [vmem:[#allocation18_spill] sm:$0xff] %v4005_v22  ;;  %v1410_v50 = vadd.f32 %v1117_v30, %v1116_v14  ;;  %v729_v51 = vmul.f32 0.0026041667, %v355_v43  ;;  %v351_v54 = vpop.xlane.xlu0 %350  ;;  %v1125_v57 = vmul.f32 %v4003_v17, %v4003_v17  ;;  %v1126_v31 = vmul.f32 %v4005_v22, %v4005_v22  ;;  %v3541_v30 = vld [vmem:[#allocation2 + $0x60] sm:$0xff] }
  0xb5   :  { %7047 = vst [vmem:[#allocation19_spill] sm:$0xff] %v4007_v27  ;;  %7048 = vst [vmem:[#allocation20_spill] sm:$0xff] %v4010_v33  ;;  %v1127_v59 = vmul.f32 %v4007_v27, %v4007_v27  ;;  %v728_v63 = vmul.f32 0.0026041667, %v351_v54  ;;  %v1119_v4 = vmul.f32 %v4010_v33, %v4010_v33  ;;  %v1120_v32 = vmul.f32 %v4012_v19, %v4012_v19 }
  0xb6   :  { %7049 = vst [vmem:[#allocation21_spill] sm:$0xff] %v4012_v19  ;;  %7050 = vst [vmem:[#allocation22_spill] sm:$0xff] %v4014_v42  ;;  %v4023_v2 = vadd.f32 %v1410_v50, %v1118_v16  ;;  %v4029_v62 = vsub.f32 %v3538_v6, %v729_v51  ;;  %v4031_v21 = vsub.f32 %v3539_v10, %v729_v51  ;;  %634 = vadd.xlane.f32.xlu1 %v3927_v38  ;;  %v363_v34 = vpop.xlane.xlu1 %362 }
  0xb7   :  { %v4033_v13 = vsub.f32 %v3540_v11, %v729_v51  ;;  %v1121_v14 = vmul.f32 %v4014_v42, %v4014_v42  ;;  %v4038_v16 = vsub.f32 %v3541_v30, %v728_v63  ;;  %v4040_v18 = vsub.f32 %v3542_v8, %v728_v63  ;;  %630 = vadd.xlane.f32.xlu0 %v3929_v39  ;;  %v3544_v39 = vld [vmem:[#allocation2 + $0xa8] sm:$0xff]  ;;  %v3548_v8 = vld [vmem:[#allocation2 + $0x98] sm:$0xff] }
  0xb8   :  { %7051 = vst [vmem:[#allocation23_spill] sm:$0xff] %v4029_v62  ;;  %7052 = vst [vmem:[#allocation24_spill] sm:$0xff] %v4031_v21  ;;  %v4042_v29 = vsub.f32 %v3543_v23, %v728_v63  ;;  %v1414_v41 = vadd.f32 %v1120_v32, %v1119_v4  ;;  %v731_v43 = vmul.f32 0.0026041667, %v363_v34  ;;  %v359_v50 = vpop.xlane.xlu0 %358  ;;  %v1422_v51 = vadd.f32 %v1126_v31, %v1125_v57  ;;  %v3545_v4 = vld [vmem:[#allocation2 + $0xb0] sm:$0xff]  ;;  %v3549_v34 = vld [vmem:[#allocation2 + $0xa0] sm:$0xff] }
  0xb9   :  { %7053 = vst [vmem:[#allocation25_spill] sm:$0xff] %v4033_v13  ;;  %7054 = vst [vmem:[#allocation26_spill] sm:$0xff] %v4038_v16  ;;  %v4045_v38 = vadd.f32 %v1418_v28, %v1124_v12  ;;  %v1131_v54 = vmul.f32 %v4029_v62, %v4029_v62  ;;  %v730_v6 = vmul.f32 0.0026041667, %v359_v50  ;;  %v1132_v11 = vmul.f32 %v4031_v21, %v4031_v21  ;;  %v3546_v12 = vld [vmem:[#allocation2 + $0xb8] sm:$0xff]  ;;  %v3547_v31 = vld [vmem:[#allocation2 + $0x90] sm:$0xff] }
  0xba   :  { %7055 = vst [vmem:[#allocation27_spill] sm:$0xff] %v4040_v18  ;;  %7056 = vst [vmem:[#allocation28_spill] sm:$0xff] %v4042_v29  ;;  %v4049_v10 = vadd.f32 %v1414_v41, %v1121_v14  ;;  %v1133_v63 = vmul.f32 %v4033_v13, %v4033_v13  ;;  %v4055_v30 = vsub.f32 %v3544_v39, %v731_v43  ;;  %642 = vadd.xlane.f32.xlu1 %v3931_v40  ;;  %v371_v50 = vpop.xlane.xlu1 %370 }
  0xbb   :  { %v4057_v32 = vsub.f32 %v3545_v4, %v731_v43  ;;  %v4059_v28 = vsub.f32 %v3546_v12, %v731_v43  ;;  %v4062_v57 = vadd.f32 %v1422_v51, %v1127_v59  ;;  %v4064_v14 = vsub.f32 %v3547_v31, %v730_v6  ;;  %638 = vadd.xlane.f32.xlu0 %v3933_v46 }
  0xbc   :  { %7057 = vst [vmem:[#allocation29_spill] sm:$0xff] %v4055_v30  ;;  %v4066_v23 = vsub.f32 %v3548_v8, %v730_v6  ;;  %v4068_v41 = vsub.f32 %v3549_v34, %v730_v6  ;;  %v1430_v39 = vadd.f32 %v1132_v11, %v1131_v54  ;;  %v733_v4 = vmul.f32 0.0026041667, %v371_v50  ;;  %v367_v43 = vpop.xlane.xlu0 %366  ;;  %v3550_v54 = vld [vmem:[#allocation2 + $0xd8] sm:$0xff]  ;;  %v3551_v8 = vld [vmem:[#allocation2 + $0xe0] sm:$0xff]  ;;  %v3552_v50 = vld [vmem:[#allocation2 + $0xe8] sm:$0xff] }
  0xbd   :  { %7058 = vst [vmem:[#allocation30_spill] sm:$0xff] %v4057_v32  ;;  %7059 = vst [vmem:[#allocation31_spill] sm:$0xff] %v4059_v28  ;;  %v1128_v40 = vmul.f32 %v4038_v16, %v4038_v16  ;;  %v1129_v59 = vmul.f32 %v4040_v18, %v4040_v18  ;;  %v1130_v51 = vmul.f32 %v4042_v29, %v4042_v29  ;;  %v732_v12 = vmul.f32 0.0026041667, %v367_v43  ;;  %v3554_v29 = vld [vmem:[#allocation2 + $0xc8] sm:$0xff]  ;;  %v3555_v16 = vld [vmem:[#allocation2 + $0xd0] sm:$0xff] }
  0xbe   :  { %7060 = vst [vmem:[#allocation32_spill] sm:$0xff] %v4064_v14  ;;  %7061 = vst [vmem:[#allocation33_spill] sm:$0xff] %v4066_v23  ;;  %v4077_v31 = vadd.f32 %v1430_v39, %v1133_v63  ;;  %v1137_v6 = vmul.f32 %v4055_v30, %v4055_v30  ;;  %v1138_v46 = vmul.f32 %v4057_v32, %v4057_v32  ;;  %650 = vadd.xlane.f32.xlu1 %v3935_v47  ;;  %v3553_v63 = vld [vmem:[#allocation2 + $0xc0] sm:$0xff] }
  0xbf   :  { %7062 = vst [vmem:[#allocation34_spill] sm:$0xff] %v4068_v41  ;;  %v4083_v11 = vsub.f32 %v3550_v54, %v733_v4  ;;  %v4085_v34 = vsub.f32 %v3551_v8, %v733_v4  ;;  %v4087_v18 = vsub.f32 %v3552_v50, %v733_v4  ;;  %v1426_v43 = vadd.f32 %v1129_v59, %v1128_v40  ;;  %v379_v54 = vpop.xlane.xlu1 %378 }
  0xc0   :  { %v4090_v39 = vsub.f32 %v3553_v63, %v732_v12  ;;  %v4092_v30 = vsub.f32 %v3554_v29, %v732_v12  ;;  %v4094_v32 = vsub.f32 %v3555_v16, %v732_v12  ;;  %646 = vadd.xlane.f32.xlu0 %v3937_v48  ;;  %v1139_v8 = vmul.f32 %v4059_v28, %v4059_v28  ;;  %v375_v50 = vpop.xlane.xlu0 %374  ;;  %v3556_v12 = vld [vmem:[#allocation2 + $0x108] sm:$0xff] }
  0xc1   :  { %7063 = vst [vmem:[#allocation35_spill] sm:$0xff] %v4083_v11  ;;  %7064 = vst [vmem:[#allocation36_spill] sm:$0xff] %v4085_v34  ;;  %v735_v4 = vmul.f32 0.0026041667, %v379_v54  ;;  %v4099_v13 = vadd.f32 %v1426_v43, %v1130_v51  ;;  %v1438_v47 = vadd.f32 %v1138_v46, %v1137_v6  ;;  %v1134_v40 = vmul.f32 %v4064_v14, %v4064_v14  ;;  %v3557_v54 = vld [vmem:[#allocation2 + $0x110] sm:$0xff]  ;;  %v3558_v6 = vld [vmem:[#allocation2 + $0x118] sm:$0xff] }
  0xc2   :  { %7065 = vst [vmem:[#allocation37_spill] sm:$0xff] %v4087_v18  ;;  %7066 = vst [vmem:[#allocation38_spill] sm:$0xff] %v4090_v39  ;;  %v734_v59 = vmul.f32 0.0026041667, %v375_v50  ;;  %v1135_v29 = vmul.f32 %v4066_v23, %v4066_v23  ;;  %v1136_v16 = vmul.f32 %v4068_v41, %v4068_v41  ;;  %v1143_v48 = vmul.f32 %v4083_v11, %v4083_v11  ;;  %v3559_v50 = vld [vmem:[#allocation2 + $0xf0] sm:$0xff]  ;;  %v3560_v41 = vld [vmem:[#allocation2 + $0xf8] sm:$0xff] }
  0xc3   :  { %7067 = vst [vmem:[#allocation39_spill] sm:$0xff] %v4092_v30  ;;  %7068 = vst [vmem:[#allocation40_spill] sm:$0xff] %v4094_v32  ;;  %v4109_v63 = vsub.f32 %v3556_v12, %v735_v4  ;;  %v4111_v51 = vsub.f32 %v3557_v54, %v735_v4  ;;  %v4113_v46 = vsub.f32 %v3558_v6, %v735_v4  ;;  %658 = vadd.xlane.f32.xlu1 %v3939_v56  ;;  %v3561_v11 = vld [vmem:[#allocation2 + $0x100] sm:$0xff]  ;;  %v387_v12 = vpop.xlane.xlu1 %386 }
  0xc4   :  { %v4116_v43 = vadd.f32 %v1438_v47, %v1139_v8  ;;  %v4118_v23 = vsub.f32 %v3559_v50, %v734_v59  ;;  %v4120_v14 = vsub.f32 %v3560_v41, %v734_v59  ;;  %v4122_v28 = vsub.f32 %v3561_v11, %v734_v59  ;;  %654 = vadd.xlane.f32.xlu0 %v3941_v1  ;;  %v383_v4 = vpop.xlane.xlu0 %382 }
  0xc5   :  { %7069 = vst [vmem:[#allocation41_spill] sm:$0xff] %v4109_v63  ;;  %7070 = vst [vmem:[#allocation42_spill] sm:$0xff] %v4111_v51  ;;  %v1434_v54 = vadd.f32 %v1135_v29, %v1134_v40  ;;  %v737_v21 = vmul.f32 0.0026041667, %v387_v12  ;;  %v1144_v56 = vmul.f32 %v4085_v34, %v4085_v34  ;;  %v1145_v8 = vmul.f32 %v4087_v18, %v4087_v18  ;;  %v3562_v40 = vld [vmem:[#allocation2 + $0x138] sm:$0xff]  ;;  %v3563_v29 = vld [vmem:[#allocation2 + $0x140] sm:$0xff] }
  0xc6   :  { %7071 = vst [vmem:[#allocation43_spill] sm:$0xff] %v4113_v46  ;;  %7072 = vst [vmem:[#allocation44_spill] sm:$0xff] %v4118_v23  ;;  %v1140_v47 = vmul.f32 %v4090_v39, %v4090_v39  ;;  %v736_v41 = vmul.f32 0.0026041667, %v383_v4  ;;  %v1141_v11 = vmul.f32 %v4092_v30, %v4092_v30  ;;  %v1142_v1 = vmul.f32 %v4094_v32, %v4094_v32  ;;  %v3564_v12 = vld [vmem:[#allocation2 + $0x148] sm:$0xff]  ;;  %v3567_v34 = vld [vmem:[#allocation2 + $0x130] sm:$0xff] }
  0xc7   :  { %7073 = vst [vmem:[#allocation45_spill] sm:$0xff] %v4120_v14  ;;  %7074 = vst [vmem:[#allocation46_spill] sm:$0xff] %v4122_v28  ;;  %v4131_v6 = vadd.f32 %v1434_v54, %v1136_v16  ;;  %v4137_v59 = vsub.f32 %v3562_v40, %v737_v21  ;;  %v4139_v50 = vsub.f32 %v3563_v29, %v737_v21  ;;  %666 = vadd.xlane.f32.xlu1 %v3943_v9  ;;  %v3565_v16 = vld [vmem:[#allocation2 + $0x120] sm:$0xff]  ;;  %v3566_v39 = vld [vmem:[#allocation2 + $0x128] sm:$0xff]  ;;  %v395_v40 = vpop.xlane.xlu1 %394 }
  0xc8   :  { %v4141_v18 = vsub.f32 %v3564_v12, %v737_v21  ;;  %v1446_v4 = vadd.f32 %v1144_v56, %v1143_v48  ;;  %v4144_v54 = vsub.f32 %v3565_v16, %v736_v41  ;;  %v4146_v30 = vsub.f32 %v3566_v39, %v736_v41  ;;  %662 = vadd.xlane.f32.xlu0 %v3945_v15  ;;  %v391_v60 = vpop.xlane.xlu0 %390  ;;  %v3570_v12 = vld [vmem:[#allocation2 + $0x178] sm:$0xff] }
  0xc9   :  { %7075 = vst [vmem:[#allocation47_spill] sm:$0xff] %v4137_v59  ;;  %7076 = vst [vmem:[#allocation48_spill] sm:$0xff] %v4139_v50  ;;  %v4148_v32 = vsub.f32 %v3567_v34, %v736_v41  ;;  %v1442_v29 = vadd.f32 %v1141_v11, %v1140_v47  ;;  %v739_v62 = vmul.f32 0.0026041667, %v395_v40  ;;  %v1149_v9 = vmul.f32 %v4109_v63, %v4109_v63  ;;  %v3568_v47 = vld [vmem:[#allocation2 + $0x168] sm:$0xff]  ;;  %v3572_v40 = vld [vmem:[#allocation2 + $0x158] sm:$0xff] }
  0xca   :  { %7077 = vst [vmem:[#allocation49_spill] sm:$0xff] %v4141_v18  ;;  %7078 = vst [vmem:[#allocation50_spill] sm:$0xff] %v4144_v54  ;;  %v4151_v21 = vadd.f32 %v1446_v4, %v1145_v8  ;;  %v1150_v48 = vmul.f32 %v4111_v51, %v4111_v51  ;;  %v738_v56 = vmul.f32 0.0026041667, %v391_v60  ;;  %v1151_v34 = vmul.f32 %v4113_v46, %v4113_v46  ;;  %v3569_v8 = vld [vmem:[#allocation2 + $0x170] sm:$0xff]  ;;  %v3573_v46 = vld [vmem:[#allocation2 + $0x160] sm:$0xff] }
  0xcb   :  { %7079 = vst [vmem:[#allocation51_spill] sm:$0xff] %v4146_v30  ;;  %7080 = vst [vmem:[#allocation52_spill] sm:$0xff] %v4148_v32  ;;  %v4157_v39 = vadd.f32 %v1442_v29, %v1142_v1  ;;  %v1146_v15 = vmul.f32 %v4118_v23, %v4118_v23  ;;  %v4163_v41 = vsub.f32 %v3568_v47, %v739_v62  ;;  %674 = vadd.xlane.f32.xlu1 %v3948_v24  ;;  %v3571_v1 = vld [vmem:[#allocation2 + $0x150] sm:$0xff]  ;;  %v403_v47 = vpop.xlane.xlu1 %402 }
  0xcc   :  { %v4165_v11 = vsub.f32 %v3569_v8, %v739_v62  ;;  %v4167_v4 = vsub.f32 %v3570_v12, %v739_v62  ;;  %v1454_v60 = vadd.f32 %v1150_v48, %v1149_v9  ;;  %v4170_v16 = vsub.f32 %v3571_v1, %v738_v56  ;;  %670 = vadd.xlane.f32.xlu0 %v3950_v25  ;;  %v399_v12 = vpop.xlane.xlu0 %398 }
  0xcd   :  { %7081 = vst [vmem:[#allocation53_spill] sm:$0xff] %v4163_v41  ;;  %v4172_v29 = vsub.f32 %v3572_v40, %v738_v56  ;;  %v4174_v23 = vsub.f32 %v3573_v46, %v738_v56  ;;  %v1147_v8 = vmul.f32 %v4120_v14, %v4120_v14  ;;  %v741_v62 = vmul.f32 0.0026041667, %v403_v47  ;;  %v3574_v56 = vld [vmem:[#allocation2 + $0x198] sm:$0xff]  ;;  %v3575_v47 = vld [vmem:[#allocation2 + $0x1a0] sm:$0xff] }
  0xce   :  { %7082 = vst [vmem:[#allocation54_spill] sm:$0xff] %v4165_v11  ;;  %7083 = vst [vmem:[#allocation55_spill] sm:$0xff] %v4167_v4  ;;  %v4179_v51 = vadd.f32 %v1454_v60, %v1151_v34  ;;  %v1148_v24 = vmul.f32 %v4122_v28, %v4122_v28  ;;  %v1155_v9 = vmul.f32 %v4137_v59, %v4137_v59  ;;  %v740_v48 = vmul.f32 0.0026041667, %v399_v12  ;;  %v3576_v60 = vld [vmem:[#allocation2 + $0x1a8] sm:$0xff] }
  0xcf   :  { %7084 = vst [vmem:[#allocation56_spill] sm:$0xff] %v4170_v16  ;;  %7085 = vst [vmem:[#allocation57_spill] sm:$0xff] %v4172_v29  ;;  %v1450_v1 = vadd.f32 %v1147_v8, %v1146_v15  ;;  %v1156_v46 = vmul.f32 %v4139_v50, %v4139_v50  ;;  %v1157_v25 = vmul.f32 %v4141_v18, %v4141_v18  ;;  %682 = vadd.xlane.f32.xlu1 %v3952_v26  ;;  %v3577_v8 = vld [vmem:[#allocation2 + $0x180] sm:$0xff]  ;;  %v3578_v50 = vld [vmem:[#allocation2 + $0x188] sm:$0xff] }
  0xd0   :  { %7086 = vst [vmem:[#allocation58_spill] sm:$0xff] %v4174_v23  ;;  %v4189_v40 = vsub.f32 %v3574_v56, %v741_v62  ;;  %v4191_v34 = vsub.f32 %v3575_v47, %v741_v62  ;;  %v4193_v14 = vsub.f32 %v3576_v60, %v741_v62  ;;  %v1152_v15 = vmul.f32 %v4144_v54, %v4144_v54  ;;  %v3579_v18 = vld [vmem:[#allocation2 + $0x190] sm:$0xff]  ;;  %v411_v47 = vpop.xlane.xlu1 %410  ;;  %v407_v60 = vpop.xlane.xlu0 %406 }
  0xd1   :  { %v4198_v12 = vsub.f32 %v3577_v8, %v740_v48  ;;  %v4200_v59 = vsub.f32 %v3578_v50, %v740_v48  ;;  %v4202_v56 = vsub.f32 %v3579_v18, %v740_v48  ;;  %678 = vadd.xlane.f32.xlu0 %v3955_v35  ;;  %v4205_v28 = vadd.f32 %v1450_v1, %v1148_v24  ;;  %v3580_v24 = vld [vmem:[#allocation2 + $0x1c8] sm:$0xff] }
  0xd2   :  { %7087 = vst [vmem:[#allocation59_spill] sm:$0xff] %v4189_v40  ;;  %7088 = vst [vmem:[#allocation60_spill] sm:$0xff] %v4191_v34  ;;  %v743_v62 = vmul.f32 0.0026041667, %v411_v47  ;;  %v1462_v26 = vadd.f32 %v1156_v46, %v1155_v9  ;;  %v1153_v54 = vmul.f32 %v4146_v30, %v4146_v30  ;;  %v1154_v8 = vmul.f32 %v4148_v32, %v4148_v32  ;;  %v3581_v9 = vld [vmem:[#allocation2 + $0x1d0] sm:$0xff]  ;;  %v3582_v46 = vld [vmem:[#allocation2 + $0x1d8] sm:$0xff] }
  0xd3   :  { %7089 = vst [vmem:[#allocation61_spill] sm:$0xff] %v4193_v14  ;;  %7090 = vst [vmem:[#allocation62_spill] sm:$0xff] %v4198_v12  ;;  %v742_v63 = vmul.f32 0.0026041667, %v407_v60  ;;  %v1161_v50 = vmul.f32 %v4163_v41, %v4163_v41  ;;  %v1162_v18 = vmul.f32 %v4165_v11, %v4165_v11  ;;  %v1163_v35 = vmul.f32 %v4167_v4, %v4167_v4  ;;  %v3583_v41 = vld [vmem:[#allocation2 + $0x1b0] sm:$0xff]  ;;  %v3584_v11 = vld [vmem:[#allocation2 + $0x1b8] sm:$0xff] }
  0xd4   :  { %7091 = vst [vmem:[#allocation63_spill] sm:$0xff] %v4200_v59  ;;  %7092 = vst [vmem:[#allocation64_spill] sm:$0xff] %v4202_v56  ;;  %v4217_v48 = vsub.f32 %v3580_v24, %v743_v62  ;;  %v4219_v1 = vsub.f32 %v3581_v9, %v743_v62  ;;  %v4221_v47 = vsub.f32 %v3582_v46, %v743_v62  ;;  %690 = vadd.xlane.f32.xlu1 %v3957_v36  ;;  %v3585_v4 = vld [vmem:[#allocation2 + $0x1c0] sm:$0xff]  ;;  %v419_v24 = vpop.xlane.xlu1 %418  ;;  %v415_v62 = vpop.xlane.xlu0 %414 }
  0xd5   :  { %v4224_v60 = vadd.f32 %v1462_v26, %v1157_v25  ;;  %v4226_v32 = vsub.f32 %v3583_v41, %v742_v63  ;;  %v4228_v30 = vsub.f32 %v3584_v11, %v742_v63  ;;  %v4230_v58 = vsub.f32 %v3585_v4, %v742_v63  ;;  %686 = vadd.xlane.f32.xlu0 %v3959_v37  ;;  %v3586_v11 = vld [vmem:[#allocation2 + $0x1f8] sm:$0xff]  ;;  %v3587_v4 = vld [vmem:[#allocation2 + $0x200] sm:$0xff] }
  0xd6   :  { %7093 = vst [vmem:[#allocation65_spill] sm:$0xff] %v4217_v48  ;;  %7094 = vst [vmem:[#allocation66_spill] sm:$0xff] %v4219_v1  ;;  %v1458_v9 = vadd.f32 %v1153_v54, %v1152_v15  ;;  %v745_v55 = vmul.f32 0.0026041667, %v419_v24  ;;  %v1470_v46 = vadd.f32 %v1162_v18, %v1161_v50  ;;  %v1158_v36 = vmul.f32 %v4170_v16, %v4170_v16  ;;  %v3588_v50 = vld [vmem:[#allocation2 + $0x208] sm:$0xff] }
  0xd7   :  { %7095 = vst [vmem:[#allocation67_spill] sm:$0xff] %v4221_v47  ;;  %7096 = vst [vmem:[#allocation68_spill] sm:$0xff] %v4226_v32  ;;  %v1159_v41 = vmul.f32 %v4172_v29, %v4172_v29  ;;  %v744_v25 = vmul.f32 0.0026041667, %v415_v62  ;;  %v1160_v63 = vmul.f32 %v4174_v23, %v4174_v23  ;;  %v1167_v37 = vmul.f32 %v4189_v40, %v4189_v40  ;;  %v3590_v62 = vld [vmem:[#allocation2 + $0x1e8] sm:$0xff]  ;;  %v3591_v40 = vld [vmem:[#allocation2 + $0x1f0] sm:$0xff] }
  0xd8   :  { %7097 = vst [vmem:[#allocation69_spill] sm:$0xff] %v4228_v30  ;;  %7098 = vst [vmem:[#allocation70_spill] sm:$0xff] %v4230_v58  ;;  %v4237_v26 = vadd.f32 %v1458_v9, %v1154_v8  ;;  %v4243_v54 = vsub.f32 %v3586_v11, %v745_v55  ;;  %v4245_v15 = vsub.f32 %v3587_v4, %v745_v55  ;;  %698 = vadd.xlane.f32.xlu1 %v3961_v44  ;;  %v3589_v8 = vld [vmem:[#allocation2 + $0x1e0] sm:$0xff]  ;;  %v427_v11 = vpop.xlane.xlu1 %426 }
  0xd9   :  { %v4247_v18 = vsub.f32 %v3588_v50, %v745_v55  ;;  %v4250_v24 = vadd.f32 %v1470_v46, %v1163_v35  ;;  %v4252_v9 = vsub.f32 %v3589_v8, %v744_v25  ;;  %v4254_v23 = vsub.f32 %v3590_v62, %v744_v25  ;;  %694 = vadd.xlane.f32.xlu0 %v3963_v45  ;;  %v423_v55 = vpop.xlane.xlu0 %422 }
  0xda   :  { %7099 = vst [vmem:[#allocation71_spill] sm:$0xff] %v4243_v54  ;;  %7100 = vst [vmem:[#allocation72_spill] sm:$0xff] %v4245_v15  ;;  %v4256_v29 = vsub.f32 %v3591_v40, %v744_v25  ;;  %v1466_v4 = vadd.f32 %v1159_v41, %v1158_v36  ;;  %v747_v16 = vmul.f32 0.0026041667, %v427_v11  ;;  %v1168_v44 = vmul.f32 %v4191_v34, %v4191_v34  ;;  %v3592_v36 = vld [vmem:[#allocation2 + $0x228] sm:$0xff]  ;;  %v3593_v25 = vld [vmem:[#allocation2 + $0x230] sm:$0xff] }
  0xdb   :  { %7101 = vst [vmem:[#allocation73_spill] sm:$0xff] %v4247_v18  ;;  %7102 = vst [vmem:[#allocation74_spill] sm:$0xff] %v4252_v9  ;;  %v1169_v35 = vmul.f32 %v4193_v14, %v4193_v14  ;;  %v1164_v46 = vmul.f32 %v4198_v12, %v4198_v12  ;;  %v746_v50 = vmul.f32 0.0026041667, %v423_v55  ;;  %v1165_v40 = vmul.f32 %v4200_v59, %v4200_v59  ;;  %v3594_v11 = vld [vmem:[#allocation2 + $0x238] sm:$0xff]  ;;  %v3597_v34 = vld [vmem:[#allocation2 + $0x220] sm:$0xff] }
  0xdc   :  { %7103 = vst [vmem:[#allocation75_spill] sm:$0xff] %v4254_v23  ;;  %7104 = vst [vmem:[#allocation76_spill] sm:$0xff] %v4256_v29  ;;  %v4265_v8 = vadd.f32 %v1466_v4, %v1160_v63  ;;  %v1166_v45 = vmul.f32 %v4202_v56, %v4202_v56  ;;  %v4271_v41 = vsub.f32 %v3592_v36, %v747_v16  ;;  %706 = vadd.xlane.f32.xlu1 %v3965_v49  ;;  %v3595_v63 = vld [vmem:[#allocation2 + $0x210] sm:$0xff]  ;;  %v3596_v12 = vld [vmem:[#allocation2 + $0x218] sm:$0xff]  ;;  %v435_v36 = vpop.xlane.xlu1 %434 }
  0xdd   :  { %v4273_v62 = vsub.f32 %v3593_v25, %v747_v16  ;;  %v4275_v14 = vsub.f32 %v3594_v11, %v747_v16  ;;  %v1478_v55 = vadd.f32 %v1168_v44, %v1167_v37  ;;  %v4278_v4 = vsub.f32 %v3595_v63, %v746_v50  ;;  %702 = vadd.xlane.f32.xlu0 %v3967_v20  ;;  %v431_v22 = vpop.xlane.xlu0 %430  ;;  %v3600_v11 = vld [vmem:[#allocation2 + $0x268] sm:$0xff] }
  0xde   :  { %7105 = vst [vmem:[#allocation77_spill] sm:$0xff] %v4271_v41  ;;  %v4280_v59 = vsub.f32 %v3596_v12, %v746_v50  ;;  %v4282_v56 = vsub.f32 %v3597_v34, %v746_v50  ;;  %v1474_v25 = vadd.f32 %v1165_v40, %v1164_v46  ;;  %v749_v27 = vmul.f32 0.0026041667, %v435_v36  ;;  %v3598_v46 = vld [vmem:[#allocation2 + $0x258] sm:$0xff]  ;;  %v3602_v36 = vld [vmem:[#allocation2 + $0x248] sm:$0xff] }
  0xdf   :  { %7106 = vst [vmem:[#allocation78_spill] sm:$0xff] %v4273_v62  ;;  %7107 = vst [vmem:[#allocation79_spill] sm:$0xff] %v4275_v14  ;;  %v4285_v16 = vadd.f32 %v1478_v55, %v1169_v35  ;;  %v1173_v49 = vmul.f32 %v4217_v48, %v4217_v48  ;;  %v1174_v37 = vmul.f32 %v4219_v1, %v4219_v1  ;;  %v748_v44 = vmul.f32 0.0026041667, %v431_v22  ;;  %v3599_v35 = vld [vmem:[#allocation2 + $0x260] sm:$0xff] }
  0xe0   :  { %7108 = vst [vmem:[#allocation80_spill] sm:$0xff] %v4278_v4  ;;  %7109 = vst [vmem:[#allocation81_spill] sm:$0xff] %v4280_v59  ;;  %v4291_v12 = vadd.f32 %v1474_v25, %v1166_v45  ;;  %v1175_v34 = vmul.f32 %v4221_v47, %v4221_v47  ;;  %v1170_v20 = vmul.f32 %v4226_v32, %v4226_v32  ;;  %714 = vadd.xlane.f32.xlu1 %v3969_v52  ;;  %v3601_v45 = vld [vmem:[#allocation2 + $0x240] sm:$0xff]  ;;  %v3603_v47 = vld [vmem:[#allocation2 + $0x250] sm:$0xff] }
  0xe1   :  { %7110 = vst [vmem:[#allocation82_spill] sm:$0xff] %v4282_v56  ;;  %v4297_v50 = vsub.f32 %v3598_v46, %v749_v27  ;;  %v4299_v40 = vsub.f32 %v3599_v35, %v749_v27  ;;  %v4301_v55 = vsub.f32 %v3600_v11, %v749_v27  ;;  %v1486_v22 = vadd.f32 %v1174_v37, %v1173_v49  ;;  %v443_v46 = vpop.xlane.xlu1 %442  ;;  %v439_v11 = vpop.xlane.xlu0 %438 }
  0xe2   :  { %v4304_v63 = vsub.f32 %v3601_v45, %v748_v44  ;;  %v4306_v25 = vsub.f32 %v3602_v36, %v748_v44  ;;  %v4308_v32 = vsub.f32 %v3603_v47, %v748_v44  ;;  %710 = vadd.xlane.f32.xlu0 %v3971_v53  ;;  %v1171_v35 = vmul.f32 %v4228_v30, %v4228_v30  ;;  %v3604_v44 = vld [vmem:[#allocation2 + $0x288] sm:$0xff] }
  0xe3   :  { %7111 = vst [vmem:[#allocation83_spill] sm:$0xff] %v4297_v50  ;;  %7112 = vst [vmem:[#allocation84_spill] sm:$0xff] %v4299_v40  ;;  %v751_v27 = vmul.f32 0.0026041667, %v443_v46  ;;  %v4313_v1 = vadd.f32 %v1486_v22, %v1175_v34  ;;  %v1172_v52 = vmul.f32 %v4230_v58, %v4230_v58  ;;  %v1179_v49 = vmul.f32 %v4243_v54, %v4243_v54  ;;  %v3605_v46 = vld [vmem:[#allocation2 + $0x290] sm:$0xff]  ;;  %v3606_v22 = vld [vmem:[#allocation2 + $0x298] sm:$0xff] }
  0xe4   :  { %7113 = vst [vmem:[#allocation85_spill] sm:$0xff] %v4301_v55  ;;  %7114 = vst [vmem:[#allocation86_spill] sm:$0xff] %v4304_v63  ;;  %v750_v37 = vmul.f32 0.0026041667, %v439_v11  ;;  %v1482_v45 = vadd.f32 %v1171_v35, %v1170_v20  ;;  %v1180_v47 = vmul.f32 %v4245_v15, %v4245_v15  ;;  %v1181_v53 = vmul.f32 %v4247_v18, %v4247_v18  ;;  %v3607_v35 = vld [vmem:[#allocation2 + $0x270] sm:$0xff]  ;;  %v3608_v15 = vld [vmem:[#allocation2 + $0x278] sm:$0xff] }
  0xe5   :  { %7115 = vst [vmem:[#allocation87_spill] sm:$0xff] %v4306_v25  ;;  %7116 = vst [vmem:[#allocation88_spill] sm:$0xff] %v4308_v32  ;;  %v4323_v36 = vsub.f32 %v3604_v44, %v751_v27  ;;  %v4325_v34 = vsub.f32 %v3605_v46, %v751_v27  ;;  %v4327_v30 = vsub.f32 %v3606_v22, %v751_v27  ;;  %722 = vadd.xlane.f32.xlu1 %v3980_v61  ;;  %v3609_v18 = vld [vmem:[#allocation2 + $0x280] sm:$0xff]  ;;  %v451_v46 = vpop.xlane.xlu1 %450  ;;  %v447_v22 = vpop.xlane.xlu0 %446 }
  0xe6   :  { %v1176_v20 = vmul.f32 %v4252_v9, %v4252_v9  ;;  %v4332_v11 = vsub.f32 %v3607_v35, %v750_v37  ;;  %v4334_v54 = vsub.f32 %v3608_v15, %v750_v37  ;;  %v4336_v44 = vsub.f32 %v3609_v18, %v750_v37  ;;  %718 = vadd.xlane.f32.xlu0 %v3989_v7 }
  0xe7   :  { %7117 = vst [vmem:[#allocation89_spill] sm:$0xff] %v4323_v36  ;;  %7118 = vst [vmem:[#allocation90_spill] sm:$0xff] %v4325_v34  ;;  %v4339_v58 = vadd.f32 %v1482_v45, %v1172_v52  ;;  %v753_v27 = vmul.f32 0.0026041667, %v451_v46  ;;  %v1494_v61 = vadd.f32 %v1180_v47, %v1179_v49  ;;  %v1177_v9 = vmul.f32 %v4254_v23, %v4254_v23  ;;  %v3610_v52 = vld [vmem:[#allocation2 + $0x2b8] sm:$0xff]  ;;  %v3611_v49 = vld [vmem:[#allocation2 + $0x2c0] sm:$0xff] }
  0xe8   :  { %7119 = vst [vmem:[#allocation91_spill] sm:$0xff] %v4327_v30  ;;  %7120 = vst [vmem:[#allocation92_spill] sm:$0xff] %v4332_v11  ;;  %v1178_v35 = vmul.f32 %v4256_v29, %v4256_v29  ;;  %v752_v48 = vmul.f32 0.0026041667, %v447_v22  ;;  %v1185_v15 = vmul.f32 %v4271_v41, %v4271_v41  ;;  %v1186_v18 = vmul.f32 %v4273_v62, %v4273_v62  ;;  %v3612_v47 = vld [vmem:[#allocation2 + $0x2c8] sm:$0xff]  ;;  %v3613_v41 = vld [vmem:[#allocation2 + $0x2a0] sm:$0xff] }
  0xe9   :  { %7121 = vst [vmem:[#allocation93_spill] sm:$0xff] %v4334_v54  ;;  %7122 = vst [vmem:[#allocation94_spill] sm:$0xff] %v4336_v44  ;;  %v1187_v7 = vmul.f32 %v4275_v14, %v4275_v14  ;;  %v4351_v37 = vsub.f32 %v3610_v52, %v753_v27  ;;  %v4353_v45 = vsub.f32 %v3611_v49, %v753_v27  ;;  %1416 = vadd.xlane.f32.xlu1 %v4049_v10  ;;  %v3614_v62 = vld [vmem:[#allocation2 + $0x2a8] sm:$0xff]  ;;  %v3615_v14 = vld [vmem:[#allocation2 + $0x2b0] sm:$0xff]  ;;  %v459_v52 = vpop.xlane.xlu1 %458 }
  0xea   :  { %v4355_v46 = vsub.f32 %v3612_v47, %v753_v27  ;;  %v4358_v22 = vadd.f32 %v1494_v61, %v1181_v53  ;;  %v4360_v29 = vsub.f32 %v3613_v41, %v752_v48  ;;  %v4362_v23 = vsub.f32 %v3614_v62, %v752_v48  ;;  %1412 = vadd.xlane.f32.xlu0 %v4023_v2  ;;  %v455_v27 = vpop.xlane.xlu0 %454  ;;  %v3617_v62 = vld [vmem:[#allocation2 + $0x2f0] sm:$0xff] }
  0xeb   :  { %7123 = vst [vmem:[#allocation95_spill] sm:$0xff] %v4351_v37  ;;  %7124 = vst [vmem:[#allocation96_spill] sm:$0xff] %v4353_v45  ;;  %v4364_v17 = vsub.f32 %v3615_v14, %v752_v48  ;;  %v1490_v49 = vadd.f32 %v1177_v9, %v1176_v20  ;;  %v755_v5 = vmul.f32 0.0026041667, %v459_v52  ;;  %v1502_v47 = vadd.f32 %v1186_v18, %v1185_v15  ;;  %v3616_v48 = vld [vmem:[#allocation2 + $0x2e8] sm:$0xff]  ;;  %v3618_v15 = vld [vmem:[#allocation2 + $0x2f8] sm:$0xff] }
  0xec   :  { %7125 = vst [vmem:[#allocation97_spill] sm:$0xff] %v4355_v46  ;;  %7126 = vst [vmem:[#allocation98_spill] sm:$0xff] %v4360_v29  ;;  %v1182_v10 = vmul.f32 %v4278_v4, %v4278_v4  ;;  %v1183_v41 = vmul.f32 %v4280_v59, %v4280_v59  ;;  %v754_v53 = vmul.f32 0.0026041667, %v455_v27  ;;  %v1184_v14 = vmul.f32 %v4282_v56, %v4282_v56  ;;  %v3620_v27 = vld [vmem:[#allocation2 + $0x2d8] sm:$0xff] }
  0xed   :  { %7127 = vst [vmem:[#allocation99_spill] sm:$0xff] %v4362_v23  ;;  %7128 = vst [vmem:[#allocation100_spill] sm:$0xff] %v4364_v17  ;;  %v4371_v61 = vadd.f32 %v1490_v49, %v1178_v35  ;;  %v1191_v2 = vmul.f32 %v4297_v50, %v4297_v50  ;;  %v4377_v9 = vsub.f32 %v3616_v48, %v755_v5  ;;  %1424 = vadd.xlane.f32.xlu1 %v4062_v57  ;;  %v3619_v35 = vld [vmem:[#allocation2 + $0x2d0] sm:$0xff]  ;;  %v3621_v50 = vld [vmem:[#allocation2 + $0x2e0] sm:$0xff]  ;;  %v467_v48 = vpop.xlane.xlu1 %466 }
  0xee   :  { %v4379_v20 = vsub.f32 %v3617_v62, %v755_v5  ;;  %v4381_v18 = vsub.f32 %v3618_v15, %v755_v5  ;;  %v4384_v52 = vadd.f32 %v1502_v47, %v1187_v7  ;;  %v4386_v49 = vsub.f32 %v3619_v35, %v754_v53  ;;  %1420 = vadd.xlane.f32.xlu0 %v4045_v38  ;;  %v463_v5 = vpop.xlane.xlu0 %462 }
  0xef   :  { %7129 = vst [vmem:[#allocation101_spill] sm:$0xff] %v4377_v9  ;;  %v4388_v56 = vsub.f32 %v3620_v27, %v754_v53  ;;  %v4390_v59 = vsub.f32 %v3621_v50, %v754_v53  ;;  %v1498_v62 = vadd.f32 %v1183_v41, %v1182_v10  ;;  %v757_v4 = vmul.f32 0.0026041667, %v467_v48  ;;  %v3622_v10 = vld [vmem:[#allocation2 + $0x318] sm:$0xff]  ;;  %v3623_v53 = vld [vmem:[#allocation2 + $0x320] sm:$0xff]  ;;  %v3624_v48 = vld [vmem:[#allocation2 + $0x328] sm:$0xff] }
  0xf0   :  { %7130 = vst [vmem:[#allocation102_spill] sm:$0xff] %v4379_v20  ;;  %7131 = vst [vmem:[#allocation103_spill] sm:$0xff] %v4381_v18  ;;  %v1192_v57 = vmul.f32 %v4299_v40, %v4299_v40  ;;  %v1193_v7 = vmul.f32 %v4301_v55, %v4301_v55  ;;  %v1188_v47 = vmul.f32 %v4304_v63, %v4304_v63  ;;  %v756_v15 = vmul.f32 0.0026041667, %v463_v5  ;;  %v3626_v63 = vld [vmem:[#allocation2 + $0x308] sm:$0xff]  ;;  %v3627_v40 = vld [vmem:[#allocation2 + $0x310] sm:$0xff] }
  0xf1   :  { %7132 = vst [vmem:[#allocation104_spill] sm:$0xff] %v4386_v49  ;;  %7133 = vst [vmem:[#allocation105_spill] sm:$0xff] %v4388_v56  ;;  %v4399_v35 = vadd.f32 %v1498_v62, %v1184_v14  ;;  %v1189_v50 = vmul.f32 %v4306_v25, %v4306_v25  ;;  %v1190_v38 = vmul.f32 %v4308_v32, %v4308_v32  ;;  %1432 = vadd.xlane.f32.xlu1 %v4077_v31  ;;  %v3625_v14 = vld [vmem:[#allocation2 + $0x300] sm:$0xff] }
  0xf2   :  { %7134 = vst [vmem:[#allocation106_spill] sm:$0xff] %v4390_v59  ;;  %v4405_v41 = vsub.f32 %v3622_v10, %v757_v4  ;;  %v4407_v27 = vsub.f32 %v3623_v53, %v757_v4  ;;  %v4409_v55 = vsub.f32 %v3624_v48, %v757_v4  ;;  %v1510_v5 = vadd.f32 %v1192_v57, %v1191_v2  ;;  %v475_v10 = vpop.xlane.xlu1 %474  ;;  %v471_v0 = vpop.xlane.xlu0 %470  ;;  %v3630_v48 = vld [vmem:[#allocation2 + $0x358] sm:$0xff] }
  0xf3   :  { %v4412_v62 = vsub.f32 %v3625_v14, %v756_v15  ;;  %v4414_v25 = vsub.f32 %v3626_v63, %v756_v15  ;;  %v4416_v32 = vsub.f32 %v3627_v40, %v756_v15  ;;  %1428 = vadd.xlane.f32.xlu0 %v4099_v13  ;;  %v1506_v53 = vadd.f32 %v1189_v50, %v1188_v47  ;;  %v3628_v47 = vld [vmem:[#allocation2 + $0x348] sm:$0xff] }
  0xf4   :  { %7135 = vst [vmem:[#allocation107_spill] sm:$0xff] %v4405_v41  ;;  %7136 = vst [vmem:[#allocation108_spill] sm:$0xff] %v4407_v27  ;;  %v759_v3 = vmul.f32 0.0026041667, %v475_v10  ;;  %v4419_v4 = vadd.f32 %v1510_v5, %v1193_v7  ;;  %v1197_v31 = vmul.f32 %v4323_v36, %v4323_v36  ;;  %v1198_v2 = vmul.f32 %v4325_v34, %v4325_v34  ;;  %v3629_v7 = vld [vmem:[#allocation2 + $0x350] sm:$0xff]  ;;  %v3632_v10 = vld [vmem:[#allocation2 + $0x338] sm:$0xff] }
  0xf5   :  { %7137 = vst [vmem:[#allocation109_spill] sm:$0xff] %v4409_v55  ;;  %7138 = vst [vmem:[#allocation110_spill] sm:$0xff] %v4412_v62  ;;  %v758_v57 = vmul.f32 0.0026041667, %v471_v0  ;;  %v4425_v63 = vadd.f32 %v1506_v53, %v1190_v38  ;;  %v1199_v40 = vmul.f32 %v4327_v30, %v4327_v30  ;;  %v1194_v13 = vmul.f32 %v4332_v11, %v4332_v11  ;;  %v3631_v38 = vld [vmem:[#allocation2 + $0x330] sm:$0xff]  ;;  %v3633_v30 = vld [vmem:[#allocation2 + $0x340] sm:$0xff] }
  0xf6   :  { %7139 = vst [vmem:[#allocation111_spill] sm:$0xff] %v4414_v25  ;;  %7140 = vst [vmem:[#allocation112_spill] sm:$0xff] %v4416_v32  ;;  %v4431_v15 = vsub.f32 %v3628_v47, %v759_v3  ;;  %v4433_v50 = vsub.f32 %v3629_v7, %v759_v3  ;;  %v4435_v5 = vsub.f32 %v3630_v48, %v759_v3  ;;  %1440 = vadd.xlane.f32.xlu1 %v4116_v43  ;;  %v483_v47 = vpop.xlane.xlu1 %482  ;;  %v479_v48 = vpop.xlane.xlu0 %478 }
  0xf7   :  { %v1518_v0 = vadd.f32 %v1198_v2, %v1197_v31  ;;  %v4438_v14 = vsub.f32 %v3631_v38, %v758_v57  ;;  %v4440_v53 = vsub.f32 %v3632_v10, %v758_v57  ;;  %v4442_v11 = vsub.f32 %v3633_v30, %v758_v57  ;;  %1436 = vadd.xlane.f32.xlu0 %v4131_v6  ;;  %v3634_v57 = vld [vmem:[#allocation2 + $0x378] sm:$0xff] }
  0xf8   :  { %7141 = vst [vmem:[#allocation113_spill] sm:$0xff] %v4431_v15  ;;  %7142 = vst [vmem:[#allocation114_spill] sm:$0xff] %v4433_v50  ;;  %v1195_v7 = vmul.f32 %v4334_v54, %v4334_v54  ;;  %v761_v3 = vmul.f32 0.0026041667, %v483_v47  ;;  %v1196_v43 = vmul.f32 %v4336_v44, %v4336_v44  ;;  %v1203_v31 = vmul.f32 %v4351_v37, %v4351_v37  ;;  %v3635_v47 = vld [vmem:[#allocation2 + $0x380] sm:$0xff] }
  0xf9   :  { %7143 = vst [vmem:[#allocation115_spill] sm:$0xff] %v4435_v5  ;;  %7144 = vst [vmem:[#allocation116_spill] sm:$0xff] %v4438_v14  ;;  %v4447_v34 = vadd.f32 %v1518_v0, %v1199_v40  ;;  %v760_v2 = vmul.f32 0.0026041667, %v479_v48  ;;  %v1204_v30 = vmul.f32 %v4353_v45, %v4353_v45  ;;  %v1205_v6 = vmul.f32 %v4355_v46, %v4355_v46  ;;  %v3636_v0 = vld [vmem:[#allocation2 + $0x388] sm:$0xff]  ;;  %v3639_v46 = vld [vmem:[#allocation2 + $0x370] sm:$0xff] }
  0xfa   :  { %7145 = vst [vmem:[#allocation117_spill] sm:$0xff] %v4440_v53  ;;  %7146 = vst [vmem:[#allocation118_spill] sm:$0xff] %v4442_v11  ;;  %v1514_v38 = vadd.f32 %v1195_v7, %v1194_v13  ;;  %v4457_v10 = vsub.f32 %v3634_v57, %v761_v3  ;;  %v4459_v40 = vsub.f32 %v3635_v47, %v761_v3  ;;  %1448 = vadd.xlane.f32.xlu1 %v4151_v21  ;;  %v3637_v7 = vld [vmem:[#allocation2 + $0x360] sm:$0xff]  ;;  %v3638_v45 = vld [vmem:[#allocation2 + $0x368] sm:$0xff]  ;;  %v491_v47 = vpop.xlane.xlu1 %490 }
  0xfb   :  { %v4461_v54 = vsub.f32 %v3636_v0, %v761_v3  ;;  %v1200_v13 = vmul.f32 %v4360_v29, %v4360_v29  ;;  %v4466_v48 = vsub.f32 %v3637_v7, %v760_v2  ;;  %v4468_v37 = vsub.f32 %v3638_v45, %v760_v2  ;;  %1444 = vadd.xlane.f32.xlu0 %v4157_v39  ;;  %v487_v0 = vpop.xlane.xlu0 %486 }
  0xfc   :  { %7147 = vst [vmem:[#allocation119_spill] sm:$0xff] %v4457_v10  ;;  %7148 = vst [vmem:[#allocation120_spill] sm:$0xff] %v4459_v40  ;;  %v4470_v57 = vsub.f32 %v3639_v46, %v760_v2  ;;  %v4473_v44 = vadd.f32 %v1514_v38, %v1196_v43  ;;  %v763_v3 = vmul.f32 0.0026041667, %v491_v47  ;;  %v1526_v21 = vadd.f32 %v1204_v30, %v1203_v31  ;;  %v3640_v43 = vld [vmem:[#allocation2 + $0x3a8] sm:$0xff]  ;;  %v3641_v31 = vld [vmem:[#allocation2 + $0x3b0] sm:$0xff] }
  0xfd   :  { %7149 = vst [vmem:[#allocation121_spill] sm:$0xff] %v4461_v54  ;;  %7150 = vst [vmem:[#allocation122_spill] sm:$0xff] %v4466_v48  ;;  %v1201_v29 = vmul.f32 %v4362_v23, %v4362_v23  ;;  %v1202_v7 = vmul.f32 %v4364_v17, %v4364_v17  ;;  %v762_v36 = vmul.f32 0.0026041667, %v487_v0  ;;  %v1209_v45 = vmul.f32 %v4377_v9, %v4377_v9  ;;  %v3642_v30 = vld [vmem:[#allocation2 + $0x3b8] sm:$0xff]  ;;  %v3643_v9 = vld [vmem:[#allocation2 + $0x390] sm:$0xff] }
  0xfe   :  { %7151 = vst [vmem:[#allocation123_spill] sm:$0xff] %v4468_v37  ;;  %7152 = vst [vmem:[#allocation124_spill] sm:$0xff] %v4470_v57  ;;  %v1210_v46 = vmul.f32 %v4379_v20, %v4379_v20  ;;  %v1211_v39 = vmul.f32 %v4381_v18, %v4381_v18  ;;  %v4485_v2 = vsub.f32 %v3640_v43, %v763_v3  ;;  %1456 = vadd.xlane.f32.xlu1 %v4179_v51  ;;  %v3644_v20 = vld [vmem:[#allocation2 + $0x398] sm:$0xff]  ;;  %v3645_v18 = vld [vmem:[#allocation2 + $0x3a0] sm:$0xff]  ;;  %v499_v43 = vpop.xlane.xlu1 %498 }
  0xff   :  { %v4487_v38 = vsub.f32 %v3641_v31, %v763_v3  ;;  %v4489_v47 = vsub.f32 %v3642_v30, %v763_v3  ;;  %v4492_v0 = vadd.f32 %v1526_v21, %v1205_v6  ;;  %v4494_v17 = vsub.f32 %v3643_v9, %v762_v36  ;;  %1452 = vadd.xlane.f32.xlu0 %v4205_v28  ;;  %v495_v3 = vpop.xlane.xlu0 %494 }
 0x100   :  { %7153 = vst [vmem:[#allocation125_spill] sm:$0xff] %v4485_v2  ;;  %v4496_v23 = vsub.f32 %v3644_v20, %v762_v36  ;;  %v4498_v42 = vsub.f32 %v3645_v18, %v762_v36  ;;  %v1522_v31 = vadd.f32 %v1201_v29, %v1200_v13  ;;  %v765_v19 = vmul.f32 0.0026041667, %v499_v43  ;;  %v3646_v20 = vld [vmem:[#allocation2 + $0x3d8] sm:$0xff]  ;;  %v3647_v18 = vld [vmem:[#allocation2 + $0x3e0] sm:$0xff] }
 0x101   :  { %7154 = vst [vmem:[#allocation126_spill] sm:$0xff] %v4487_v38  ;;  %7155 = vst [vmem:[#allocation127_spill] sm:$0xff] %v4489_v47  ;;  %v1534_v30 = vadd.f32 %v1210_v46, %v1209_v45  ;;  %v1206_v51 = vmul.f32 %v4386_v49, %v4386_v49  ;;  %v1207_v9 = vmul.f32 %v4388_v56, %v4388_v56  ;;  %v764_v6 = vmul.f32 0.0026041667, %v495_v3  ;;  %v3648_v45 = vld [vmem:[#allocation2 + $0x3e8] sm:$0xff] }
 0x102   :  { %7156 = vst [vmem:[#allocation128_spill] sm:$0xff] %v4494_v17  ;;  %7157 = vst [vmem:[#allocation129_spill] sm:$0xff] %v4496_v23  ;;  %v4505_v21 = vadd.f32 %v1522_v31, %v1202_v7  ;;  %v1208_v36 = vmul.f32 %v4390_v59, %v4390_v59  ;;  %v1215_v28 = vmul.f32 %v4405_v41, %v4405_v41  ;;  %1464 = vadd.xlane.f32.xlu1 %v4224_v60  ;;  %v3649_v7 = vld [vmem:[#allocation2 + $0x3c0] sm:$0xff]  ;;  %v3650_v3 = vld [vmem:[#allocation2 + $0x3c8] sm:$0xff] }
 0x103   :  { %7158 = vst [vmem:[#allocation130_spill] sm:$0xff] %v4498_v42  ;;  %v4511_v29 = vsub.f32 %v3646_v20, %v765_v19  ;;  %v4513_v13 = vsub.f32 %v3647_v18, %v765_v19  ;;  %v4515_v46 = vsub.f32 %v3648_v45, %v765_v19  ;;  %v4518_v43 = vadd.f32 %v1534_v30, %v1211_v39  ;;  %v3651_v41 = vld [vmem:[#allocation2 + $0x3d0] sm:$0xff]  ;;  %v507_v20 = vpop.xlane.xlu1 %506  ;;  %v503_v19 = vpop.xlane.xlu0 %502 }
 0x104   :  { %v4520_v31 = vsub.f32 %v3649_v7, %v764_v6  ;;  %v4522_v59 = vsub.f32 %v3650_v3, %v764_v6  ;;  %v4524_v56 = vsub.f32 %v3651_v41, %v764_v6  ;;  %1460 = vadd.xlane.f32.xlu0 %v4237_v26  ;;  %v1530_v18 = vadd.f32 %v1207_v9, %v1206_v51  ;;  %v3652_v51 = vld [vmem:[#allocation2 + $0x408] sm:$0xff]  ;;  %v3653_v6 = vld [vmem:[#allocation2 + $0x410] sm:$0xff] }
 0x105   :  { %7159 = vst [vmem:[#allocation131_spill] sm:$0xff] %v4511_v29  ;;  %7160 = vst [vmem:[#allocation132_spill] sm:$0xff] %v4513_v13  ;;  %v767_v49 = vmul.f32 0.0026041667, %v507_v20  ;;  %v1216_v60 = vmul.f32 %v4407_v27, %v4407_v27  ;;  %v1217_v39 = vmul.f32 %v4409_v55, %v4409_v55  ;;  %v1212_v30 = vmul.f32 %v4412_v62, %v4412_v62  ;;  %v3654_v20 = vld [vmem:[#allocation2 + $0x418] sm:$0xff]  ;;  %v3657_v27 = vld [vmem:[#allocation2 + $0x400] sm:$0xff] }
 0x106   :  { %7161 = vst [vmem:[#allocation133_spill] sm:$0xff] %v4515_v46  ;;  %7162 = vst [vmem:[#allocation134_spill] sm:$0xff] %v4520_v31  ;;  %v766_v45 = vmul.f32 0.0026041667, %v503_v19  ;;  %v4533_v7 = vadd.f32 %v1530_v18, %v1208_v36  ;;  %v1213_v41 = vmul.f32 %v4414_v25, %v4414_v25  ;;  %v1214_v26 = vmul.f32 %v4416_v32, %v4416_v32  ;;  %v3655_v36 = vld [vmem:[#allocation2 + $0x3f0] sm:$0xff]  ;;  %v3656_v62 = vld [vmem:[#allocation2 + $0x3f8] sm:$0xff] }
 0x107   :  { %7163 = vst [vmem:[#allocation135_spill] sm:$0xff] %v4522_v59  ;;  %7164 = vst [vmem:[#allocation136_spill] sm:$0xff] %v4524_v56  ;;  %v4539_v9 = vsub.f32 %v3652_v51, %v767_v49  ;;  %v4541_v3 = vsub.f32 %v3653_v6, %v767_v49  ;;  %v4543_v55 = vsub.f32 %v3654_v20, %v767_v49  ;;  %1472 = vadd.xlane.f32.xlu1 %v4250_v24  ;;  %v515_v51 = vpop.xlane.xlu1 %514  ;;  %v3660_v20 = vld [vmem:[#allocation2 + $0x448] sm:$0xff] }
 0x108   :  { %7165 = vst [vmem:[#allocation137_spill] sm:$0xff] %v4533_v7  ;;  %v1542_v19 = vadd.f32 %v1216_v60, %v1215_v28  ;;  %v4546_v18 = vsub.f32 %v3655_v36, %v766_v45  ;;  %v4548_v25 = vsub.f32 %v3656_v62, %v766_v45  ;;  %v4550_v32 = vsub.f32 %v3657_v27, %v766_v45  ;;  %v511_v7 = vpop.xlane.xlu0 %510 }
 0x109   :  { %7166 = vst [vmem:[#allocation138_spill] sm:$0xff] %v4539_v9  ;;  %7167 = vst [vmem:[#allocation139_spill] sm:$0xff] %v4541_v3  ;;  %1468 = vadd.xlane.f32.xlu0 %v4265_v8  ;;  %v1538_v6 = vadd.f32 %v1213_v41, %v1212_v30  ;;  %v769_v33 = vmul.f32 0.0026041667, %v515_v51  ;;  %v1221_v24 = vmul.f32 %v4431_v15, %v4431_v15  ;;  %v768_v60 = vmul.f32 0.0026041667, %v511_v7 }
 0x10a   :  { %7168 = vst [vmem:[#allocation140_spill] sm:$0xff] %v4543_v55  ;;  %7169 = vst [vmem:[#allocation141_spill] sm:$0xff] %v4546_v18  ;;  %v4553_v49 = vadd.f32 %v1542_v19, %v1217_v39  ;;  %v1222_v28 = vmul.f32 %v4433_v50, %v4433_v50  ;;  %v1223_v27 = vmul.f32 %v4435_v5, %v4435_v5  ;;  %v3658_v30 = vld [vmem:[#allocation2 + $0x438] sm:$0xff]  ;;  %v3659_v39 = vld [vmem:[#allocation2 + $0x440] sm:$0xff] }
 0x10b   :  { %7170 = vst [vmem:[#allocation142_spill] sm:$0xff] %v4548_v25  ;;  %7171 = vst [vmem:[#allocation143_spill] sm:$0xff] %v4550_v32  ;;  %v4559_v62 = vadd.f32 %v1538_v6, %v1214_v26  ;;  %v1218_v8 = vmul.f32 %v4438_v14, %v4438_v14  ;;  %v4565_v45 = vsub.f32 %v3658_v30, %v769_v33  ;;  %1480 = vadd.xlane.f32.xlu1 %v4285_v16  ;;  %v3661_v26 = vld [vmem:[#allocation2 + $0x420] sm:$0xff]  ;;  %v3662_v51 = vld [vmem:[#allocation2 + $0x428] sm:$0xff]  ;;  %v523_v30 = vpop.xlane.xlu1 %522 }
 0x10c   :  { %v4567_v41 = vsub.f32 %v3659_v39, %v769_v33  ;;  %v4569_v19 = vsub.f32 %v3660_v20, %v769_v33  ;;  %v1550_v7 = vadd.f32 %v1222_v28, %v1221_v24  ;;  %v4572_v36 = vsub.f32 %v3661_v26, %v768_v60  ;;  %v3663_v5 = vld [vmem:[#allocation2 + $0x430] sm:$0xff]  ;;  %v519_v20 = vpop.xlane.xlu0 %518 }
 0x10d   :  { %7172 = vst [vmem:[#allocation144_spill] sm:$0xff] %v4565_v45  ;;  %v4574_v6 = vsub.f32 %v3662_v51, %v768_v60  ;;  %v4576_v14 = vsub.f32 %v3663_v5, %v768_v60  ;;  %1476 = vadd.xlane.f32.xlu0 %v4291_v12  ;;  %v1219_v39 = vmul.f32 %v4440_v53, %v4440_v53  ;;  %v771_v33 = vmul.f32 0.0026041667, %v523_v30  ;;  %v3664_v60 = vld [vmem:[#allocation2 + $0x468] sm:$0xff]  ;;  %v3665_v30 = vld [vmem:[#allocation2 + $0x470] sm:$0xff] }
 0x10e   :  { %7173 = vst [vmem:[#allocation145_spill] sm:$0xff] %v4567_v41  ;;  %7174 = vst [vmem:[#allocation146_spill] sm:$0xff] %v4569_v19  ;;  %v4581_v50 = vadd.f32 %v1550_v7, %v1223_v27  ;;  %v1220_v16 = vmul.f32 %v4442_v11, %v4442_v11  ;;  %v1227_v24 = vmul.f32 %v4457_v10, %v4457_v10  ;;  %v770_v28 = vmul.f32 0.0026041667, %v519_v20  ;;  %v3666_v7 = vld [vmem:[#allocation2 + $0x478] sm:$0xff] }
 0x10f   :  { %7175 = vst [vmem:[#allocation147_spill] sm:$0xff] %v4572_v36  ;;  %7176 = vst [vmem:[#allocation148_spill] sm:$0xff] %v4574_v6  ;;  %v1546_v26 = vadd.f32 %v1219_v39, %v1218_v8  ;;  %v1228_v5 = vmul.f32 %v4459_v40, %v4459_v40  ;;  %v1229_v12 = vmul.f32 %v4461_v54, %v4461_v54  ;;  %1488 = vadd.xlane.f32.xlu1 %v4313_v1  ;;  %v3667_v39 = vld [vmem:[#allocation2 + $0x450] sm:$0xff]  ;;  %v3668_v40 = vld [vmem:[#allocation2 + $0x458] sm:$0xff] }
 0x110   :  { %7177 = vst [vmem:[#allocation149_spill] sm:$0xff] %v4576_v14  ;;  %7178 = vst [vmem:[#allocation150_spill] sm:$0xff] %v4581_v50  ;;  %v4591_v51 = vsub.f32 %v3664_v60, %v771_v33  ;;  %v4593_v27 = vsub.f32 %v3665_v30, %v771_v33  ;;  %v4595_v53 = vsub.f32 %v3666_v7, %v771_v33  ;;  %v3669_v54 = vld [vmem:[#allocation2 + $0x460] sm:$0xff]  ;;  %v531_v30 = vpop.xlane.xlu1 %530  ;;  %v527_v7 = vpop.xlane.xlu0 %526 }
 0x111   :  { %v1224_v8 = vmul.f32 %v4466_v48, %v4466_v48  ;;  %v4600_v20 = vsub.f32 %v3667_v39, %v770_v28  ;;  %v4602_v10 = vsub.f32 %v3668_v40, %v770_v28  ;;  %v4604_v60 = vsub.f32 %v3669_v54, %v770_v28  ;;  %1484 = vadd.xlane.f32.xlu0 %v4339_v58 }
 0x112   :  { %7179 = vst [vmem:[#allocation151_spill] sm:$0xff] %v4591_v51  ;;  %7180 = vst [vmem:[#allocation152_spill] sm:$0xff] %v4593_v27  ;;  %v4607_v11 = vadd.f32 %v1546_v26, %v1220_v16  ;;  %v773_v33 = vmul.f32 0.0026041667, %v531_v30  ;;  %v1558_v1 = vadd.f32 %v1228_v5, %v1227_v24  ;;  %v1225_v48 = vmul.f32 %v4468_v37, %v4468_v37  ;;  %v3670_v16 = vld [vmem:[#allocation2 + $0x498] sm:$0xff]  ;;  %v3671_v24 = vld [vmem:[#allocation2 + $0x4a0] sm:$0xff] }
 0x113   :  { %7181 = vst [vmem:[#allocation153_spill] sm:$0xff] %v4595_v53  ;;  %7182 = vst [vmem:[#allocation154_spill] sm:$0xff] %v4600_v20  ;;  %v1226_v39 = vmul.f32 %v4470_v57, %v4470_v57  ;;  %v772_v15 = vmul.f32 0.0026041667, %v527_v7  ;;  %v1233_v40 = vmul.f32 %v4485_v2, %v4485_v2  ;;  %v1234_v54 = vmul.f32 %v4487_v38, %v4487_v38  ;;  %v3672_v5 = vld [vmem:[#allocation2 + $0x4a8] sm:$0xff]  ;;  %v3673_v2 = vld [vmem:[#allocation2 + $0x480] sm:$0xff] }
 0x114   :  { %7183 = vst [vmem:[#allocation155_spill] sm:$0xff] %v4602_v10  ;;  %7184 = vst [vmem:[#allocation156_spill] sm:$0xff] %v4604_v60  ;;  %v1235_v58 = vmul.f32 %v4489_v47, %v4489_v47  ;;  %v4619_v28 = vsub.f32 %v3670_v16, %v773_v33  ;;  %v4621_v26 = vsub.f32 %v3671_v24, %v773_v33  ;;  %1496 = vadd.xlane.f32.xlu1 %v4358_v22  ;;  %v3674_v38 = vld [vmem:[#allocation2 + $0x488] sm:$0xff]  ;;  %v3675_v47 = vld [vmem:[#allocation2 + $0x490] sm:$0xff]  ;;  %v539_v16 = vpop.xlane.xlu1 %538 }
 0x115   :  { %7185 = vst [vmem:[#allocation157_spill] sm:$0xff] %v4607_v11  ;;  %v4623_v30 = vsub.f32 %v3672_v5, %v773_v33  ;;  %v4626_v7 = vadd.f32 %v1558_v1, %v1229_v12  ;;  %v4628_v57 = vsub.f32 %v3673_v2, %v772_v15  ;;  %v4630_v37 = vsub.f32 %v3674_v38, %v772_v15  ;;  %v535_v33 = vpop.xlane.xlu0 %534  ;;  %v3676_v38 = vld [vmem:[#allocation2 + $0x4c8] sm:$0xff] }
 0x116   :  { %7186 = vst [vmem:[#allocation158_spill] sm:$0xff] %v4619_v28  ;;  %7187 = vst [vmem:[#allocation159_spill] sm:$0xff] %v4621_v26  ;;  %v4632_v11 = vsub.f32 %v3675_v47, %v772_v15  ;;  %1492 = vadd.xlane.f32.xlu0 %v4371_v61  ;;  %v1554_v24 = vadd.f32 %v1225_v48, %v1224_v8  ;;  %v775_v50 = vmul.f32 0.0026041667, %v539_v16  ;;  %v774_v12 = vmul.f32 0.0026041667, %v535_v33 }
 0x117   :  { %7188 = vst [vmem:[#allocation160_spill] sm:$0xff] %v4623_v30  ;;  %7189 = vst [vmem:[#allocation161_spill] sm:$0xff] %v4628_v57  ;;  %v1566_v5 = vadd.f32 %v1234_v54, %v1233_v40  ;;  %v1230_v22 = vmul.f32 %v4494_v17, %v4494_v17  ;;  %v1231_v2 = vmul.f32 %v4496_v23, %v4496_v23  ;;  %v3677_v47 = vld [vmem:[#allocation2 + $0x4d0] sm:$0xff]  ;;  %v3678_v40 = vld [vmem:[#allocation2 + $0x4d8] sm:$0xff] }
 0x118   :  { %7190 = vst [vmem:[#allocation162_spill] sm:$0xff] %v4630_v37  ;;  %7191 = vst [vmem:[#allocation163_spill] sm:$0xff] %v4632_v11  ;;  %v4639_v1 = vadd.f32 %v1554_v24, %v1226_v39  ;;  %v1232_v15 = vmul.f32 %v4498_v42, %v4498_v42  ;;  %v1239_v61 = vmul.f32 %v4511_v29, %v4511_v29  ;;  %1504 = vadd.xlane.f32.xlu1 %v4384_v52  ;;  %v3679_v39 = vld [vmem:[#allocation2 + $0x4b0] sm:$0xff]  ;;  %v3680_v33 = vld [vmem:[#allocation2 + $0x4b8] sm:$0xff] }
 0x119   :  { %v4645_v48 = vsub.f32 %v3676_v38, %v775_v50  ;;  %v4647_v8 = vsub.f32 %v3677_v47, %v775_v50  ;;  %v4649_v54 = vsub.f32 %v3678_v40, %v775_v50  ;;  %v4652_v16 = vadd.f32 %v1566_v5, %v1235_v58  ;;  %v3681_v29 = vld [vmem:[#allocation2 + $0x4c0] sm:$0xff]  ;;  %v547_v38 = vpop.xlane.xlu1 %546  ;;  %v543_v50 = vpop.xlane.xlu0 %542 }
 0x11a   :  { %v4654_v24 = vsub.f32 %v3679_v39, %v774_v12  ;;  %v4656_v42 = vsub.f32 %v3680_v33, %v774_v12  ;;  %v4658_v23 = vsub.f32 %v3681_v29, %v774_v12  ;;  %1500 = vadd.xlane.f32.xlu0 %v4399_v35  ;;  %v1562_v47 = vadd.f32 %v1231_v2, %v1230_v22  ;;  %v3682_v22 = vld [vmem:[#allocation2 + $0x4f8] sm:$0xff]  ;;  %v3683_v12 = vld [vmem:[#allocation2 + $0x500] sm:$0xff] }
 0x11b   :  { %7192 = vst [vmem:[#allocation164_spill] sm:$0xff] %v4645_v48  ;;  %7193 = vst [vmem:[#allocation165_spill] sm:$0xff] %v4647_v8  ;;  %v777_v17 = vmul.f32 0.0026041667, %v547_v38  ;;  %v1240_v52 = vmul.f32 %v4513_v13, %v4513_v13  ;;  %v1241_v58 = vmul.f32 %v4515_v46, %v4515_v46  ;;  %v1236_v5 = vmul.f32 %v4520_v31, %v4520_v31  ;;  %v3684_v38 = vld [vmem:[#allocation2 + $0x508] sm:$0xff]  ;;  %v3687_v13 = vld [vmem:[#allocation2 + $0x4f0] sm:$0xff] }
 0x11c   :  { %7194 = vst [vmem:[#allocation166_spill] sm:$0xff] %v4649_v54  ;;  %7195 = vst [vmem:[#allocation167_spill] sm:$0xff] %v4652_v16  ;;  %v776_v40 = vmul.f32 0.0026041667, %v543_v50  ;;  %v4667_v39 = vadd.f32 %v1562_v47, %v1232_v15  ;;  %v1237_v29 = vmul.f32 %v4522_v59, %v4522_v59  ;;  %v1238_v35 = vmul.f32 %v4524_v56, %v4524_v56  ;;  %v3685_v15 = vld [vmem:[#allocation2 + $0x4e0] sm:$0xff]  ;;  %v3686_v31 = vld [vmem:[#allocation2 + $0x4e8] sm:$0xff] }
 0x11d   :  { %7196 = vst [vmem:[#allocation168_spill] sm:$0xff] %v4654_v24  ;;  %7197 = vst [vmem:[#allocation169_spill] sm:$0xff] %v4656_v42  ;;  %v4673_v2 = vsub.f32 %v3682_v22, %v777_v17  ;;  %v4675_v33 = vsub.f32 %v3683_v12, %v777_v17  ;;  %v4677_v46 = vsub.f32 %v3684_v38, %v777_v17  ;;  %1512 = vadd.xlane.f32.xlu1 %v4419_v4  ;;  %v555_v22 = vpop.xlane.xlu1 %554  ;;  %v551_v16 = vpop.xlane.xlu0 %550  ;;  %v3690_v38 = vld [vmem:[#allocation2 + $0x538] sm:$0xff] }
 0x11e   :  { %7198 = vst [vmem:[#allocation170_spill] sm:$0xff] %v4658_v23  ;;  %7199 = vst [vmem:[#allocation171_spill] sm:$0xff] %v4667_v39  ;;  %v1574_v50 = vadd.f32 %v1240_v52, %v1239_v61  ;;  %v4680_v47 = vsub.f32 %v3685_v15, %v776_v40  ;;  %v4682_v59 = vsub.f32 %v3686_v31, %v776_v40  ;;  %1508 = vadd.xlane.f32.xlu0 %v4425_v63 }
 0x11f   :  { %7200 = vst [vmem:[#allocation172_spill] sm:$0xff] %v4673_v2  ;;  %7201 = vst [vmem:[#allocation173_spill] sm:$0xff] %v4675_v33  ;;  %v4684_v56 = vsub.f32 %v3687_v13, %v776_v40  ;;  %v1570_v12 = vadd.f32 %v1237_v29, %v1236_v5  ;;  %v779_v39 = vmul.f32 0.0026041667, %v555_v22  ;;  %v1245_v4 = vmul.f32 %v4539_v9, %v4539_v9  ;;  %v3688_v5 = vld [vmem:[#allocation2 + $0x528] sm:$0xff]  ;;  %v3692_v22 = vld [vmem:[#allocation2 + $0x518] sm:$0xff] }
 0x120   :  { %7202 = vst [vmem:[#allocation174_spill] sm:$0xff] %v4677_v46  ;;  %7203 = vst [vmem:[#allocation175_spill] sm:$0xff] %v4680_v47  ;;  %v4687_v17 = vadd.f32 %v1574_v50, %v1241_v58  ;;  %v1246_v61 = vmul.f32 %v4541_v3, %v4541_v3  ;;  %v778_v52 = vmul.f32 0.0026041667, %v551_v16  ;;  %v1247_v13 = vmul.f32 %v4543_v55, %v4543_v55  ;;  %v3689_v58 = vld [vmem:[#allocation2 + $0x530] sm:$0xff]  ;;  %v3693_v55 = vld [vmem:[#allocation2 + $0x520] sm:$0xff] }
 0x121   :  { %7204 = vst [vmem:[#allocation176_spill] sm:$0xff] %v4682_v59  ;;  %7205 = vst [vmem:[#allocation177_spill] sm:$0xff] %v4684_v56  ;;  %v4693_v31 = vadd.f32 %v1570_v12, %v1238_v35  ;;  %v1242_v63 = vmul.f32 %v4546_v18, %v4546_v18  ;;  %v4699_v40 = vsub.f32 %v3688_v5, %v779_v39  ;;  %1520 = vadd.xlane.f32.xlu1 %v4447_v34  ;;  %v3691_v35 = vld [vmem:[#allocation2 + $0x510] sm:$0xff]  ;;  %v563_v5 = vpop.xlane.xlu1 %562 }
 0x122   :  { %v4701_v29 = vsub.f32 %v3689_v58, %v779_v39  ;;  %v4703_v50 = vsub.f32 %v3690_v38, %v779_v39  ;;  %v1582_v16 = vadd.f32 %v1246_v61, %v1245_v4  ;;  %v4706_v15 = vsub.f32 %v3691_v35, %v778_v52  ;;  %1516 = vadd.xlane.f32.xlu0 %v4473_v44  ;;  %v559_v38 = vpop.xlane.xlu0 %558 }
 0x123   :  { %7206 = vst [vmem:[#allocation178_spill] sm:$0xff] %v4699_v40  ;;  %v4708_v12 = vsub.f32 %v3692_v22, %v778_v52  ;;  %v4710_v18 = vsub.f32 %v3693_v55, %v778_v52  ;;  %v1243_v58 = vmul.f32 %v4548_v25, %v4548_v25  ;;  %v781_v39 = vmul.f32 0.0026041667, %v563_v5  ;;  %v3694_v52 = vld [vmem:[#allocation2 + $0x558] sm:$0xff]  ;;  %v3695_v5 = vld [vmem:[#allocation2 + $0x560] sm:$0xff] }
 0x124   :  { %7207 = vst [vmem:[#allocation179_spill] sm:$0xff] %v4701_v29  ;;  %7208 = vst [vmem:[#allocation180_spill] sm:$0xff] %v4703_v50  ;;  %v4715_v3 = vadd.f32 %v1582_v16, %v1247_v13  ;;  %v1244_v34 = vmul.f32 %v4550_v32, %v4550_v32  ;;  %v1251_v4 = vmul.f32 %v4565_v45, %v4565_v45  ;;  %v780_v61 = vmul.f32 0.0026041667, %v559_v38  ;;  %v3696_v16 = vld [vmem:[#allocation2 + $0x568] sm:$0xff] }
 0x125   :  { %7209 = vst [vmem:[#allocation181_spill] sm:$0xff] %v4706_v15  ;;  %7210 = vst [vmem:[#allocation182_spill] sm:$0xff] %v4708_v12  ;;  %v1578_v35 = vadd.f32 %v1243_v58, %v1242_v63  ;;  %v1252_v55 = vmul.f32 %v4567_v41, %v4567_v41  ;;  %v1253_v44 = vmul.f32 %v4569_v19, %v4569_v19  ;;  %1528 = vadd.xlane.f32.xlu1 %v4492_v0  ;;  %v3697_v58 = vld [vmem:[#allocation2 + $0x540] sm:$0xff]  ;;  %v3698_v41 = vld [vmem:[#allocation2 + $0x548] sm:$0xff] }
 0x126   :  { %7211 = vst [vmem:[#allocation183_spill] sm:$0xff] %v4710_v18  ;;  %v4725_v22 = vsub.f32 %v3694_v52, %v781_v39  ;;  %v4727_v13 = vsub.f32 %v3695_v5, %v781_v39  ;;  %v4729_v25 = vsub.f32 %v3696_v16, %v781_v39  ;;  %v1248_v63 = vmul.f32 %v4572_v36, %v4572_v36  ;;  %v3699_v19 = vld [vmem:[#allocation2 + $0x550] sm:$0xff]  ;;  %v571_v5 = vpop.xlane.xlu1 %570  ;;  %v567_v16 = vpop.xlane.xlu0 %566 }
 0x127   :  { %v4734_v38 = vsub.f32 %v3697_v58, %v780_v61  ;;  %v4736_v45 = vsub.f32 %v3698_v41, %v780_v61  ;;  %v4738_v52 = vsub.f32 %v3699_v19, %v780_v61  ;;  %1524 = vadd.xlane.f32.xlu0 %v4505_v21  ;;  %v4741_v32 = vadd.f32 %v1578_v35, %v1244_v34  ;;  %v3700_v34 = vld [vmem:[#allocation2 + $0x588] sm:$0xff] }
 0x128   :  { %7212 = vst [vmem:[#allocation184_spill] sm:$0xff] %v4725_v22  ;;  %7213 = vst [vmem:[#allocation185_spill] sm:$0xff] %v4727_v13  ;;  %v783_v39 = vmul.f32 0.0026041667, %v571_v5  ;;  %v1590_v0 = vadd.f32 %v1252_v55, %v1251_v4  ;;  %v1249_v36 = vmul.f32 %v4574_v6, %v4574_v6  ;;  %v1250_v58 = vmul.f32 %v4576_v14, %v4576_v14  ;;  %v3701_v4 = vld [vmem:[#allocation2 + $0x590] sm:$0xff]  ;;  %v3702_v55 = vld [vmem:[#allocation2 + $0x598] sm:$0xff] }
 0x129   :  { %7214 = vst [vmem:[#allocation186_spill] sm:$0xff] %v4729_v25  ;;  %7215 = vst [vmem:[#allocation187_spill] sm:$0xff] %v4734_v38  ;;  %v782_v9 = vmul.f32 0.0026041667, %v567_v16  ;;  %v1257_v41 = vmul.f32 %v4591_v51, %v4591_v51  ;;  %v1258_v19 = vmul.f32 %v4593_v27, %v4593_v27  ;;  %v1259_v21 = vmul.f32 %v4595_v53, %v4595_v53  ;;  %v3703_v51 = vld [vmem:[#allocation2 + $0x570] sm:$0xff]  ;;  %v3704_v27 = vld [vmem:[#allocation2 + $0x578] sm:$0xff] }
 0x12a   :  { %7216 = vst [vmem:[#allocation188_spill] sm:$0xff] %v4736_v45  ;;  %7217 = vst [vmem:[#allocation189_spill] sm:$0xff] %v4738_v52  ;;  %v4753_v61 = vsub.f32 %v3700_v34, %v783_v39  ;;  %v4755_v35 = vsub.f32 %v3701_v4, %v783_v39  ;;  %v4757_v5 = vsub.f32 %v3702_v55, %v783_v39  ;;  %1536 = vadd.xlane.f32.xlu1 %v4518_v43  ;;  %v3705_v53 = vld [vmem:[#allocation2 + $0x580] sm:$0xff]  ;;  %v7224_v34 = vld [vmem:[#allocation137_spill] sm:$0xff]  ;;  %v579_v4 = vpop.xlane.xlu1 %578  ;;  %v575_v39 = vpop.xlane.xlu0 %574 }
 0x12b   :  { %v4760_v16 = vadd.f32 %v1590_v0, %v1253_v44  ;;  %v4762_v14 = vsub.f32 %v3703_v51, %v782_v9  ;;  %v4764_v6 = vsub.f32 %v3704_v27, %v782_v9  ;;  %v4766_v52 = vsub.f32 %v3705_v53, %v782_v9  ;;  %1532 = vadd.xlane.f32.xlu0 %v7224_v34  ;;  %v3706_v27 = vld [vmem:[#allocation2 + $0x5b8] sm:$0xff] }
 0x12c   :  { %7218 = vst [vmem:[#allocation190_spill] sm:$0xff] %v4753_v61  ;;  %7219 = vst [vmem:[#allocation191_spill] sm:$0xff] %v4755_v35  ;;  %v1586_v35 = vadd.f32 %v1249_v36, %v1248_v63  ;;  %v785_v61 = vmul.f32 0.0026041667, %v579_v4  ;;  %v1598_v55 = vadd.f32 %v1258_v19, %v1257_v41  ;;  %v1254_v43 = vmul.f32 %v4600_v20, %v4600_v20  ;;  %v3707_v63 = vld [vmem:[#allocation2 + $0x5c0] sm:$0xff]  ;;  %v3708_v19 = vld [vmem:[#allocation2 + $0x5c8] sm:$0xff] }
 0x12d   :  { %7220 = vst [vmem:[#allocation192_spill] sm:$0xff] %v4757_v5  ;;  %7221 = vst [vmem:[#allocation193_spill] sm:$0xff] %v4762_v14  ;;  %v1255_v51 = vmul.f32 %v4602_v10, %v4602_v10  ;;  %v784_v44 = vmul.f32 0.0026041667, %v575_v39  ;;  %v1256_v53 = vmul.f32 %v4604_v60, %v4604_v60  ;;  %v1263_v9 = vmul.f32 %v4619_v28, %v4619_v28  ;;  %v3710_v39 = vld [vmem:[#allocation2 + $0x5a8] sm:$0xff]  ;;  %v3711_v28 = vld [vmem:[#allocation2 + $0x5b0] sm:$0xff] }
 0x12e   :  { %7222 = vst [vmem:[#allocation194_spill] sm:$0xff] %v4764_v6  ;;  %7223 = vst [vmem:[#allocation195_spill] sm:$0xff] %v4766_v52  ;;  %v4773_v0 = vadd.f32 %v1586_v35, %v1250_v58  ;;  %v4779_v36 = vsub.f32 %v3706_v27, %v785_v61  ;;  %v4781_v41 = vsub.f32 %v3707_v63, %v785_v61  ;;  %1544 = vadd.xlane.f32.xlu1 %v4553_v49  ;;  %v3709_v58 = vld [vmem:[#allocation2 + $0x5a0] sm:$0xff]  ;;  %v587_v27 = vpop.xlane.xlu1 %586 }
 0x12f   :  { %v4783_v34 = vsub.f32 %v3708_v19, %v785_v61  ;;  %v4786_v4 = vadd.f32 %v1598_v55, %v1259_v21  ;;  %v4788_v35 = vsub.f32 %v3709_v58, %v784_v44  ;;  %v4790_v60 = vsub.f32 %v3710_v39, %v784_v44  ;;  %1540 = vadd.xlane.f32.xlu0 %v4559_v62  ;;  %v583_v61 = vpop.xlane.xlu0 %582 }
 0x130   :  { %7225 = vst [vmem:[#allocation137_spill] sm:$0xff] %v4779_v36  ;;  %7226 = vst [vmem:[#allocation196_spill] sm:$0xff] %v4781_v41  ;;  %v4792_v10 = vsub.f32 %v3711_v28, %v784_v44  ;;  %v1594_v63 = vadd.f32 %v1255_v51, %v1254_v43  ;;  %v787_v20 = vmul.f32 0.0026041667, %v587_v27  ;;  %v1264_v49 = vmul.f32 %v4621_v26, %v4621_v26  ;;  %v3712_v43 = vld [vmem:[#allocation2 + $0x5e8] sm:$0xff]  ;;  %v3713_v44 = vld [vmem:[#allocation2 + $0x5f0] sm:$0xff] }
 0x131   :  { %7227 = vst [vmem:[#allocation197_spill] sm:$0xff] %v4783_v34  ;;  %7228 = vst [vmem:[#allocation198_spill] sm:$0xff] %v4788_v35  ;;  %v1265_v21 = vmul.f32 %v4623_v30, %v4623_v30  ;;  %v1260_v55 = vmul.f32 %v4628_v57, %v4628_v57  ;;  %v786_v19 = vmul.f32 0.0026041667, %v583_v61  ;;  %v1261_v28 = vmul.f32 %v4630_v37, %v4630_v37  ;;  %v3714_v27 = vld [vmem:[#allocation2 + $0x5f8] sm:$0xff] }
 0x132   :  { %7229 = vst [vmem:[#allocation199_spill] sm:$0xff] %v4790_v60  ;;  %7230 = vst [vmem:[#allocation200_spill] sm:$0xff] %v4792_v10  ;;  %v4801_v58 = vadd.f32 %v1594_v63, %v1256_v53  ;;  %v1262_v62 = vmul.f32 %v4632_v11, %v4632_v11  ;;  %v4807_v51 = vsub.f32 %v3712_v43, %v787_v20  ;;  %v7234_v26 = vld [vmem:[#allocation150_spill] sm:$0xff]  ;;  %v3715_v53 = vld [vmem:[#allocation2 + $0x5d0] sm:$0xff] }
 0x133   :  { %v4809_v39 = vsub.f32 %v3713_v44, %v787_v20  ;;  %v4811_v30 = vsub.f32 %v3714_v27, %v787_v20  ;;  %1552 = vadd.xlane.f32.xlu1 %v7234_v26  ;;  %v1606_v61 = vadd.f32 %v1264_v49, %v1263_v9  ;;  %v4814_v63 = vsub.f32 %v3715_v53, %v786_v19  ;;  %v3716_v57 = vld [vmem:[#allocation2 + $0x5d8] sm:$0xff]  ;;  %v3717_v10 = vld [vmem:[#allocation2 + $0x5e0] sm:$0xff]  ;;  %v591_v60 = vpop.xlane.xlu0 %590  ;;  %v3720_v27 = vld [vmem:[#allocation2 + $0x628] sm:$0xff] }
 0x134   :  { %7231 = vst [vmem:[#allocation201_spill] sm:$0xff] %v4807_v51  ;;  %v4816_v37 = vsub.f32 %v3716_v57, %v786_v19  ;;  %v4818_v11 = vsub.f32 %v3717_v10, %v786_v19  ;;  %v7238_v43 = vld [vmem:[#allocation157_spill] sm:$0xff]  ;;  %v595_v51 = vpop.xlane.xlu1 %594  ;;  %v1602_v44 = vadd.f32 %v1261_v28, %v1260_v55  ;;  %v1269_v26 = vmul.f32 %v4645_v48, %v4645_v48  ;;  %v7252_v48 = vld [vmem:[#allocation171_spill] sm:$0xff] }
 0x135   :  { %7232 = vst [vmem:[#allocation202_spill] sm:$0xff] %v4809_v39  ;;  %7233 = vst [vmem:[#allocation203_spill] sm:$0xff] %v4811_v30  ;;  %1548 = vadd.xlane.f32.xlu0 %v7238_v43  ;;  %v789_v39 = vmul.f32 0.0026041667, %v595_v51  ;;  %v4821_v20 = vadd.f32 %v1606_v61, %v1265_v21  ;;  %v1270_v9 = vmul.f32 %v4647_v8, %v4647_v8  ;;  %v788_v49 = vmul.f32 0.0026041667, %v591_v60 }
 0x136   :  { %7235 = vst [vmem:[#allocation150_spill] sm:$0xff] %v4814_v63  ;;  %7236 = vst [vmem:[#allocation204_spill] sm:$0xff] %v4816_v37  ;;  %v4827_v57 = vadd.f32 %v1602_v44, %v1262_v62  ;;  %v1271_v10 = vmul.f32 %v4649_v54, %v4649_v54  ;;  %v1266_v19 = vmul.f32 %v4654_v24, %v4654_v24  ;;  %v3718_v55 = vld [vmem:[#allocation2 + $0x618] sm:$0xff]  ;;  %v3719_v21 = vld [vmem:[#allocation2 + $0x620] sm:$0xff] }
 0x137   :  { %7237 = vst [vmem:[#allocation205_spill] sm:$0xff] %v4818_v11  ;;  %v4833_v28 = vsub.f32 %v3718_v55, %v789_v39  ;;  %v4835_v51 = vsub.f32 %v3719_v21, %v789_v39  ;;  %v4837_v61 = vsub.f32 %v3720_v27, %v789_v39  ;;  %1560 = vadd.xlane.f32.xlu1 %v4626_v7  ;;  %v3721_v62 = vld [vmem:[#allocation2 + $0x600] sm:$0xff]  ;;  %v3722_v43 = vld [vmem:[#allocation2 + $0x608] sm:$0xff]  ;;  %v3723_v54 = vld [vmem:[#allocation2 + $0x610] sm:$0xff]  ;;  %v599_v27 = vpop.xlane.xlu0 %598 }
 0x138   :  { %v1614_v60 = vadd.f32 %v1270_v9, %v1269_v26  ;;  %v4840_v53 = vsub.f32 %v3721_v62, %v788_v49  ;;  %v4842_v44 = vsub.f32 %v3722_v43, %v788_v49  ;;  %v4844_v24 = vsub.f32 %v3723_v54, %v788_v49  ;;  %v603_v55 = vpop.xlane.xlu1 %602  ;;  %v3724_v49 = vld [vmem:[#allocation2 + $0x648] sm:$0xff] }
 0x139   :  { %7239 = vst [vmem:[#allocation157_spill] sm:$0xff] %v4833_v28  ;;  %7240 = vst [vmem:[#allocation206_spill] sm:$0xff] %v4835_v51  ;;  %1556 = vadd.xlane.f32.xlu0 %v4639_v1  ;;  %v1267_v21 = vmul.f32 %v4656_v42, %v4656_v42  ;;  %v791_v39 = vmul.f32 0.0026041667, %v603_v55  ;;  %v1268_v7 = vmul.f32 %v4658_v23, %v4658_v23  ;;  %v790_v9 = vmul.f32 0.0026041667, %v599_v27 }
 0x13a   :  { %7241 = vst [vmem:[#allocation207_spill] sm:$0xff] %v4837_v61  ;;  %7242 = vst [vmem:[#allocation208_spill] sm:$0xff] %v4840_v53  ;;  %v4849_v8 = vadd.f32 %v1614_v60, %v1271_v10  ;;  %v1275_v26 = vmul.f32 %v4673_v2, %v4673_v2  ;;  %v1276_v54 = vmul.f32 %v4675_v33, %v4675_v33  ;;  %v3725_v55 = vld [vmem:[#allocation2 + $0x650] sm:$0xff]  ;;  %v3726_v60 = vld [vmem:[#allocation2 + $0x658] sm:$0xff] }
 0x13b   :  { %7243 = vst [vmem:[#allocation209_spill] sm:$0xff] %v4842_v44  ;;  %7244 = vst [vmem:[#allocation210_spill] sm:$0xff] %v4844_v24  ;;  %v1610_v62 = vadd.f32 %v1267_v21, %v1266_v19  ;;  %v1277_v1 = vmul.f32 %v4677_v46, %v4677_v46  ;;  %v4859_v43 = vsub.f32 %v3724_v49, %v791_v39  ;;  %v7248_v23 = vld [vmem:[#allocation167_spill] sm:$0xff]  ;;  %v3727_v21 = vld [vmem:[#allocation2 + $0x630] sm:$0xff] }
 0x13c   :  { %v4861_v10 = vsub.f32 %v3725_v55, %v791_v39  ;;  %v4863_v42 = vsub.f32 %v3726_v60, %v791_v39  ;;  %1568 = vadd.xlane.f32.xlu1 %v7248_v23  ;;  %v1272_v19 = vmul.f32 %v4680_v47, %v4680_v47  ;;  %v4868_v27 = vsub.f32 %v3727_v21, %v790_v9  ;;  %v3728_v33 = vld [vmem:[#allocation2 + $0x638] sm:$0xff]  ;;  %v3729_v46 = vld [vmem:[#allocation2 + $0x640] sm:$0xff]  ;;  %v611_v55 = vpop.xlane.xlu1 %610  ;;  %v607_v60 = vpop.xlane.xlu0 %606 }
 0x13d   :  { %7245 = vst [vmem:[#allocation211_spill] sm:$0xff] %v4859_v43  ;;  %v4870_v2 = vsub.f32 %v3728_v33, %v790_v9  ;;  %v4872_v49 = vsub.f32 %v3729_v46, %v790_v9  ;;  %1564 = vadd.xlane.f32.xlu0 %v7252_v48  ;;  %v793_v39 = vmul.f32 0.0026041667, %v611_v55  ;;  %v1622_v23 = vadd.f32 %v1276_v54, %v1275_v26  ;;  %v3731_v26 = vld [vmem:[#allocation2 + $0x680] sm:$0xff]  ;;  %v3732_v54 = vld [vmem:[#allocation2 + $0x688] sm:$0xff] }
 0x13e   :  { %7246 = vst [vmem:[#allocation212_spill] sm:$0xff] %v4861_v10  ;;  %7247 = vst [vmem:[#allocation213_spill] sm:$0xff] %v4863_v42  ;;  %v4875_v10 = vadd.f32 %v1610_v62, %v1268_v7  ;;  %v1273_v47 = vmul.f32 %v4682_v59, %v4682_v59  ;;  %v1274_v21 = vmul.f32 %v4684_v56, %v4684_v56  ;;  %v3730_v7 = vld [vmem:[#allocation2 + $0x678] sm:$0xff] }
 0x13f   :  { %7249 = vst [vmem:[#allocation167_spill] sm:$0xff] %v4868_v27  ;;  %7250 = vst [vmem:[#allocation214_spill] sm:$0xff] %v4870_v2  ;;  %v792_v27 = vmul.f32 0.0026041667, %v607_v60  ;;  %v1281_v33 = vmul.f32 %v4699_v40, %v4699_v40  ;;  %v1282_v46 = vmul.f32 %v4701_v29, %v4701_v29  ;;  %v1283_v48 = vmul.f32 %v4703_v50, %v4703_v50  ;;  %v3733_v40 = vld [vmem:[#allocation2 + $0x660] sm:$0xff]  ;;  %v3734_v29 = vld [vmem:[#allocation2 + $0x668] sm:$0xff] }
 0x140   :  { %7251 = vst [vmem:[#allocation215_spill] sm:$0xff] %v4872_v49  ;;  %v4887_v9 = vsub.f32 %v3730_v7, %v793_v39  ;;  %v4889_v62 = vsub.f32 %v3731_v26, %v793_v39  ;;  %v4891_v55 = vsub.f32 %v3732_v54, %v793_v39  ;;  %1576 = vadd.xlane.f32.xlu1 %v4687_v17  ;;  %v3735_v50 = vld [vmem:[#allocation2 + $0x670] sm:$0xff]  ;;  %v619_v7 = vpop.xlane.xlu1 %618  ;;  %v615_v39 = vpop.xlane.xlu0 %614 }
 0x141   :  { %v4894_v60 = vadd.f32 %v1622_v23, %v1277_v1  ;;  %v4896_v56 = vsub.f32 %v3733_v40, %v792_v27  ;;  %v4898_v59 = vsub.f32 %v3734_v29, %v792_v27  ;;  %v4900_v49 = vsub.f32 %v3735_v50, %v792_v27  ;;  %1572 = vadd.xlane.f32.xlu0 %v4693_v31  ;;  %v3736_v50 = vld [vmem:[#allocation2 + $0x6a8] sm:$0xff] }
 0x142   :  { %7253 = vst [vmem:[#allocation171_spill] sm:$0xff] %v4887_v9  ;;  %7254 = vst [vmem:[#allocation216_spill] sm:$0xff] %v4889_v62  ;;  %v1618_v26 = vadd.f32 %v1273_v47, %v1272_v19  ;;  %v795_v62 = vmul.f32 0.0026041667, %v619_v7  ;;  %v1630_v54 = vadd.f32 %v1282_v46, %v1281_v33  ;;  %v1278_v17 = vmul.f32 %v4706_v15, %v4706_v15  ;;  %v3737_v19 = vld [vmem:[#allocation2 + $0x6b0] sm:$0xff]  ;;  %v3738_v33 = vld [vmem:[#allocation2 + $0x6b8] sm:$0xff] }
 0x143   :  { %7255 = vst [vmem:[#allocation217_spill] sm:$0xff] %v4891_v55  ;;  %7256 = vst [vmem:[#allocation218_spill] sm:$0xff] %v4896_v56  ;;  %v1279_v40 = vmul.f32 %v4708_v12, %v4708_v12  ;;  %v794_v1 = vmul.f32 0.0026041667, %v615_v39  ;;  %v1280_v29 = vmul.f32 %v4710_v18, %v4710_v18  ;;  %v1287_v31 = vmul.f32 %v4725_v22, %v4725_v22  ;;  %v3740_v39 = vld [vmem:[#allocation2 + $0x698] sm:$0xff]  ;;  %v3741_v22 = vld [vmem:[#allocation2 + $0x6a0] sm:$0xff] }
 0x144   :  { %7257 = vst [vmem:[#allocation219_spill] sm:$0xff] %v4898_v59  ;;  %7258 = vst [vmem:[#allocation220_spill] sm:$0xff] %v4900_v49  ;;  %v4907_v23 = vadd.f32 %v1618_v26, %v1274_v21  ;;  %v4913_v47 = vsub.f32 %v3736_v50, %v795_v62  ;;  %v4915_v27 = vsub.f32 %v3737_v19, %v795_v62  ;;  %1584 = vadd.xlane.f32.xlu1 %v4715_v3  ;;  %v3739_v21 = vld [vmem:[#allocation2 + $0x690] sm:$0xff]  ;;  %v627_v50 = vpop.xlane.xlu1 %626 }
 0x145   :  { %v4917_v46 = vsub.f32 %v3738_v33, %v795_v62  ;;  %v4920_v7 = vadd.f32 %v1630_v54, %v1283_v48  ;;  %v4922_v26 = vsub.f32 %v3739_v21, %v794_v1  ;;  %v4924_v18 = vsub.f32 %v3740_v39, %v794_v1  ;;  %1580 = vadd.xlane.f32.xlu0 %v4741_v32  ;;  %v623_v62 = vpop.xlane.xlu0 %622  ;;  %v7265_v32 = vld [vmem:[#allocation189_spill] sm:$0xff]  ;;  %v3743_v39 = vld [vmem:[#allocation2 + $0x6e0] sm:$0xff] }
 0x146   :  { %7259 = vst [vmem:[#allocation221_spill] sm:$0xff] %v4913_v47  ;;  %7260 = vst [vmem:[#allocation222_spill] sm:$0xff] %v4915_v27  ;;  %v4926_v12 = vsub.f32 %v3741_v22, %v794_v1  ;;  %v1626_v19 = vadd.f32 %v1279_v40, %v1278_v17  ;;  %v797_v15 = vmul.f32 0.0026041667, %v627_v50  ;;  %v1288_v3 = vmul.f32 %v4727_v13, %v4727_v13  ;;  %v3742_v40 = vld [vmem:[#allocation2 + $0x6d8] sm:$0xff]  ;;  %v3744_v13 = vld [vmem:[#allocation2 + $0x6e8] sm:$0xff] }
 0x147   :  { %7261 = vst [vmem:[#allocation223_spill] sm:$0xff] %v4917_v46  ;;  %7262 = vst [vmem:[#allocation224_spill] sm:$0xff] %v4922_v26  ;;  %v1289_v48 = vmul.f32 %v4729_v25, %v4729_v25  ;;  %v1284_v54 = vmul.f32 %v4734_v38, %v4734_v38  ;;  %v796_v33 = vmul.f32 0.0026041667, %v623_v62  ;;  %v1285_v22 = vmul.f32 %v4736_v45, %v4736_v45  ;;  %v3746_v38 = vld [vmem:[#allocation2 + $0x6c8] sm:$0xff] }
 0x148   :  { %7263 = vst [vmem:[#allocation225_spill] sm:$0xff] %v4924_v18  ;;  %7264 = vst [vmem:[#allocation226_spill] sm:$0xff] %v4926_v12  ;;  %v4935_v21 = vadd.f32 %v1626_v19, %v1280_v29  ;;  %v1286_v17 = vmul.f32 %v7265_v32, %v7265_v32  ;;  %v4941_v1 = vsub.f32 %v3742_v40, %v797_v15  ;;  %1592 = vadd.xlane.f32.xlu1 %v4760_v16  ;;  %v3745_v29 = vld [vmem:[#allocation2 + $0x6c0] sm:$0xff]  ;;  %v3747_v12 = vld [vmem:[#allocation2 + $0x6d0] sm:$0xff]  ;;  %v635_v40 = vpop.xlane.xlu1 %634 }
 0x149   :  { %v4943_v50 = vsub.f32 %v3743_v39, %v797_v15  ;;  %v4945_v25 = vsub.f32 %v3744_v13, %v797_v15  ;;  %v1638_v62 = vadd.f32 %v1288_v3, %v1287_v31  ;;  %v4948_v19 = vsub.f32 %v3745_v29, %v796_v33  ;;  %1588 = vadd.xlane.f32.xlu0 %v4773_v0  ;;  %v7272_v13 = vld [vmem:[#allocation190_spill] sm:$0xff]  ;;  %v7273_v31 = vld [vmem:[#allocation191_spill] sm:$0xff] }
 0x14a   :  { %7266 = vst [vmem:[#allocation227_spill] sm:$0xff] %v4941_v1  ;;  %v4950_v45 = vsub.f32 %v3746_v38, %v796_v33  ;;  %v4952_v32 = vsub.f32 %v3747_v12, %v796_v33  ;;  %v1634_v39 = vadd.f32 %v1285_v22, %v1284_v54  ;;  %v631_v1 = vpop.xlane.xlu0 %630  ;;  %v1293_v16 = vmul.f32 %v7272_v13, %v7272_v13  ;;  %v3748_v54 = vld [vmem:[#allocation2 + $0x708] sm:$0xff]  ;;  %v3753_v13 = vld [vmem:[#allocation2 + $0x700] sm:$0xff] }
 0x14b   :  { %7267 = vst [vmem:[#allocation228_spill] sm:$0xff] %v4943_v50  ;;  %7268 = vst [vmem:[#allocation229_spill] sm:$0xff] %v4945_v25  ;;  %v799_v50 = vmul.f32 0.0026041667, %v635_v40  ;;  %v4955_v15 = vadd.f32 %v1638_v62, %v1289_v48  ;;  %v1294_v3 = vmul.f32 %v7273_v31, %v7273_v31  ;;  %v798_v29 = vmul.f32 0.0026041667, %v631_v1 }
 0x14c   :  { %7269 = vst [vmem:[#allocation230_spill] sm:$0xff] %v4948_v19  ;;  %7270 = vst [vmem:[#allocation231_spill] sm:$0xff] %v4950_v45  ;;  %v4961_v38 = vadd.f32 %v1634_v39, %v1286_v17  ;;  %v1295_v12 = vmul.f32 %v4757_v5, %v4757_v5  ;;  %v1290_v0 = vmul.f32 %v4762_v14, %v4762_v14  ;;  %v3749_v48 = vld [vmem:[#allocation2 + $0x710] sm:$0xff]  ;;  %v3750_v62 = vld [vmem:[#allocation2 + $0x718] sm:$0xff]  ;;  %1600 = vadd.xlane.f32.xlu1 %v4786_v4 }
 0x14d   :  { %7271 = vst [vmem:[#allocation232_spill] sm:$0xff] %v4952_v32  ;;  %v4967_v33 = vsub.f32 %v3748_v54, %v799_v50  ;;  %v4969_v22 = vsub.f32 %v3749_v48, %v799_v50  ;;  %v4971_v40 = vsub.f32 %v3750_v62, %v799_v50  ;;  %v1646_v1 = vadd.f32 %v1294_v3, %v1293_v16  ;;  %v3751_v17 = vld [vmem:[#allocation2 + $0x6f0] sm:$0xff]  ;;  %v3752_v31 = vld [vmem:[#allocation2 + $0x6f8] sm:$0xff]  ;;  %v643_v54 = vpop.xlane.xlu1 %642 }
 0x14e   :  { %v4974_v39 = vsub.f32 %v3751_v17, %v798_v29  ;;  %v4976_v5 = vsub.f32 %v3752_v31, %v798_v29  ;;  %v4978_v14 = vsub.f32 %v3753_v13, %v798_v29  ;;  %1596 = vadd.xlane.f32.xlu0 %v4801_v58  ;;  %v1291_v48 = vmul.f32 %v4764_v6, %v4764_v6  ;;  %v639_v62 = vpop.xlane.xlu0 %638  ;;  %v3754_v29 = vld [vmem:[#allocation2 + $0x738] sm:$0xff] }
 0x14f   :  { %7274 = vst [vmem:[#allocation233_spill] sm:$0xff] %v4967_v33  ;;  %7275 = vst [vmem:[#allocation234_spill] sm:$0xff] %v4969_v22  ;;  %v801_v50 = vmul.f32 0.0026041667, %v643_v54  ;;  %v1292_v4 = vmul.f32 %v4766_v52, %v4766_v52  ;;  %v1299_v16 = vmul.f32 %v4779_v36, %v4779_v36  ;;  %v800_v31 = vmul.f32 0.0026041667, %v639_v62 }
 0x150   :  { %7276 = vst [vmem:[#allocation235_spill] sm:$0xff] %v4971_v40  ;;  %7277 = vst [vmem:[#allocation236_spill] sm:$0xff] %v4974_v39  ;;  %v4983_v40 = vadd.f32 %v1646_v1, %v1295_v12  ;;  %v1642_v3 = vadd.f32 %v1291_v48, %v1290_v0  ;;  %v1300_v13 = vmul.f32 %v4781_v41, %v4781_v41  ;;  %v3755_v54 = vld [vmem:[#allocation2 + $0x740] sm:$0xff]  ;;  %v3756_v1 = vld [vmem:[#allocation2 + $0x748] sm:$0xff]  ;;  %1608 = vadd.xlane.f32.xlu1 %v4821_v20 }
 0x151   :  { %7278 = vst [vmem:[#allocation237_spill] sm:$0xff] %v4976_v5  ;;  %7279 = vst [vmem:[#allocation238_spill] sm:$0xff] %v4978_v14  ;;  %v1301_v58 = vmul.f32 %v4783_v34, %v4783_v34  ;;  %v4993_v17 = vsub.f32 %v3754_v29, %v801_v50  ;;  %v4995_v12 = vsub.f32 %v3755_v54, %v801_v50  ;;  %v3757_v48 = vld [vmem:[#allocation2 + $0x720] sm:$0xff]  ;;  %v3758_v41 = vld [vmem:[#allocation2 + $0x728] sm:$0xff]  ;;  %v651_v54 = vpop.xlane.xlu1 %650 }
 0x152   :  { %v4997_v6 = vsub.f32 %v3756_v1, %v801_v50  ;;  %v1296_v0 = vmul.f32 %v4788_v35, %v4788_v35  ;;  %v5002_v62 = vsub.f32 %v3757_v48, %v800_v31  ;;  %v5004_v36 = vsub.f32 %v3758_v41, %v800_v31  ;;  %v3759_v34 = vld [vmem:[#allocation2 + $0x730] sm:$0xff]  ;;  %1604 = vadd.xlane.f32.xlu0 %v4827_v57  ;;  %v647_v1 = vpop.xlane.xlu0 %646 }
 0x153   :  { %7280 = vst [vmem:[#allocation239_spill] sm:$0xff] %v4993_v17  ;;  %7281 = vst [vmem:[#allocation240_spill] sm:$0xff] %v4995_v12  ;;  %v5006_v29 = vsub.f32 %v3759_v34, %v800_v31  ;;  %v5009_v52 = vadd.f32 %v1642_v3, %v1292_v4  ;;  %v803_v50 = vmul.f32 0.0026041667, %v651_v54  ;;  %v1654_v20 = vadd.f32 %v1300_v13, %v1299_v16  ;;  %v7287_v12 = vld [vmem:[#allocation200_spill] sm:$0xff]  ;;  %v7288_v41 = vld [vmem:[#allocation201_spill] sm:$0xff] }
 0x154   :  { %7282 = vst [vmem:[#allocation241_spill] sm:$0xff] %v4997_v6  ;;  %7283 = vst [vmem:[#allocation242_spill] sm:$0xff] %v5002_v62  ;;  %v7286_v6 = vld [vmem:[#allocation199_spill] sm:$0xff]  ;;  %v1298_v48 = vmul.f32 %v7287_v12, %v7287_v12  ;;  %v802_v62 = vmul.f32 0.0026041667, %v647_v1  ;;  %v7289_v34 = vld [vmem:[#allocation202_spill] sm:$0xff]  ;;  %v1307_v57 = vmul.f32 %v4811_v30, %v4811_v30  ;;  %1616 = vadd.xlane.f32.xlu1 %v4849_v8 }
 0x155   :  { %7284 = vst [vmem:[#allocation243_spill] sm:$0xff] %v5004_v36  ;;  %7285 = vst [vmem:[#allocation244_spill] sm:$0xff] %v5006_v29  ;;  %v1297_v35 = vmul.f32 %v7286_v6, %v7286_v6  ;;  %v1305_v36 = vmul.f32 %v7288_v41, %v7288_v41  ;;  %v1306_v31 = vmul.f32 %v7289_v34, %v7289_v34  ;;  %v3760_v4 = vld [vmem:[#allocation2 + $0x768] sm:$0xff]  ;;  %v3761_v16 = vld [vmem:[#allocation2 + $0x770] sm:$0xff] }
 0x156   :  { %v5021_v3 = vsub.f32 %v3760_v4, %v803_v50  ;;  %v5023_v13 = vsub.f32 %v3761_v16, %v803_v50  ;;  %v3762_v54 = vld [vmem:[#allocation2 + $0x778] sm:$0xff]  ;;  %v5028_v1 = vadd.f32 %v1654_v20, %v1301_v58  ;;  %v3763_v41 = vld [vmem:[#allocation2 + $0x750] sm:$0xff]  ;;  %v3765_v30 = vld [vmem:[#allocation2 + $0x760] sm:$0xff]  ;;  %1612 = vadd.xlane.f32.xlu0 %v4875_v10  ;;  %v659_v4 = vpop.xlane.xlu1 %658  ;;  %v1302_v8 = vmul.f32 %v4814_v63, %v4814_v63 }
 0x157   :  { %v5025_v6 = vsub.f32 %v3762_v54, %v803_v50  ;;  %v5030_v12 = vsub.f32 %v3763_v41, %v802_v62  ;;  %v3764_v34 = vld [vmem:[#allocation2 + $0x758] sm:$0xff]  ;;  %v5034_v17 = vsub.f32 %v3765_v30, %v802_v62  ;;  %v1650_v16 = vadd.f32 %v1297_v35, %v1296_v0  ;;  %v655_v50 = vpop.xlane.xlu0 %654  ;;  %v3767_v0 = vld [vmem:[#allocation2 + $0x7a0] sm:$0xff] }
 0x158   :  { %7290 = vst [vmem:[#allocation245_spill] sm:$0xff] %v5023_v13  ;;  %v5032_v29 = vsub.f32 %v3764_v34, %v802_v62  ;;  %v805_v13 = vmul.f32 0.0026041667, %v659_v4  ;;  %v1662_v54 = vadd.f32 %v1306_v31, %v1305_v36  ;;  %v1303_v58 = vmul.f32 %v4816_v37, %v4816_v37  ;;  %v3766_v62 = vld [vmem:[#allocation2 + $0x798] sm:$0xff]  ;;  %v3768_v34 = vld [vmem:[#allocation2 + $0x7a8] sm:$0xff]  ;;  %1624 = vadd.xlane.f32.xlu1 %v4894_v60 }
 0x159   :  { %v804_v20 = vmul.f32 0.0026041667, %v655_v50  ;;  %v5041_v41 = vadd.f32 %v1650_v16, %v1298_v48  ;;  %v1304_v30 = vmul.f32 %v4818_v11, %v4818_v11  ;;  %v1311_v10 = vmul.f32 %v4833_v28, %v4833_v28  ;;  %v3769_v48 = vld [vmem:[#allocation2 + $0x780] sm:$0xff]  ;;  %v3770_v50 = vld [vmem:[#allocation2 + $0x788] sm:$0xff]  ;;  %v3771_v28 = vld [vmem:[#allocation2 + $0x790] sm:$0xff] }
 0x15a   :  { %v5047_v35 = vsub.f32 %v3766_v62, %v805_v13  ;;  %v5049_v36 = vsub.f32 %v3767_v0, %v805_v13  ;;  %v5051_v31 = vsub.f32 %v3768_v34, %v805_v13  ;;  %v5054_v4 = vadd.f32 %v1662_v54, %v1307_v57  ;;  %1620 = vadd.xlane.f32.xlu0 %v4907_v23  ;;  %v667_v62 = vpop.xlane.xlu1 %666 }
 0x15b   :  { %v5056_v16 = vsub.f32 %v3769_v48, %v804_v20  ;;  %v5058_v11 = vsub.f32 %v3770_v50, %v804_v20  ;;  %v5060_v37 = vsub.f32 %v3771_v28, %v804_v20  ;;  %v1658_v0 = vadd.f32 %v1303_v58, %v1302_v8  ;;  %v663_v13 = vpop.xlane.xlu0 %662  ;;  %v3772_v8 = vld [vmem:[#allocation2 + $0x7c8] sm:$0xff]  ;;  %v3773_v20 = vld [vmem:[#allocation2 + $0x7d0] sm:$0xff] }
 0x15c   :  { %7291 = vst [vmem:[#allocation246_spill] sm:$0xff] %v5047_v35  ;;  %7292 = vst [vmem:[#allocation247_spill] sm:$0xff] %v5049_v36  ;;  %v807_v63 = vmul.f32 0.0026041667, %v667_v62  ;;  %v1312_v60 = vmul.f32 %v4835_v51, %v4835_v51  ;;  %v1313_v57 = vmul.f32 %v4837_v61, %v4837_v61  ;;  %v1308_v54 = vmul.f32 %v4840_v53, %v4840_v53  ;;  %v3774_v62 = vld [vmem:[#allocation2 + $0x7d8] sm:$0xff]  ;;  %v3777_v51 = vld [vmem:[#allocation2 + $0x7c0] sm:$0xff] }
 0x15d   :  { %7293 = vst [vmem:[#allocation248_spill] sm:$0xff] %v5051_v31  ;;  %7294 = vst [vmem:[#allocation249_spill] sm:$0xff] %v5056_v16  ;;  %v806_v34 = vmul.f32 0.0026041667, %v663_v13  ;;  %v5069_v48 = vadd.f32 %v1658_v0, %v1304_v30  ;;  %v1309_v28 = vmul.f32 %v4842_v44, %v4842_v44  ;;  %v1310_v23 = vmul.f32 %v4844_v24, %v4844_v24  ;;  %v3775_v30 = vld [vmem:[#allocation2 + $0x7b0] sm:$0xff]  ;;  %v3776_v53 = vld [vmem:[#allocation2 + $0x7b8] sm:$0xff] }
 0x15e   :  { %7295 = vst [vmem:[#allocation250_spill] sm:$0xff] %v5058_v11  ;;  %7296 = vst [vmem:[#allocation251_spill] sm:$0xff] %v5060_v37  ;;  %v5075_v58 = vsub.f32 %v3772_v8, %v807_v63  ;;  %v5077_v50 = vsub.f32 %v3773_v20, %v807_v63  ;;  %v5079_v61 = vsub.f32 %v3774_v62, %v807_v63  ;;  %1632 = vadd.xlane.f32.xlu1 %v4920_v7  ;;  %v675_v8 = vpop.xlane.xlu1 %674 }
 0x15f   :  { %v1670_v13 = vadd.f32 %v1312_v60, %v1311_v10  ;;  %v5082_v0 = vsub.f32 %v3775_v30, %v806_v34  ;;  %v5084_v44 = vsub.f32 %v3776_v53, %v806_v34  ;;  %v5086_v24 = vsub.f32 %v3777_v51, %v806_v34  ;;  %1628 = vadd.xlane.f32.xlu0 %v4935_v21  ;;  %v7303_v10 = vld [vmem:[#allocation212_spill] sm:$0xff]  ;;  %v7304_v34 = vld [vmem:[#allocation167_spill] sm:$0xff] }
 0x160   :  { %7297 = vst [vmem:[#allocation252_spill] sm:$0xff] %v5075_v58  ;;  %7298 = vst [vmem:[#allocation253_spill] sm:$0xff] %v5077_v50  ;;  %v1666_v20 = vadd.f32 %v1309_v28, %v1308_v54  ;;  %v809_v50 = vmul.f32 0.0026041667, %v675_v8  ;;  %v671_v58 = vpop.xlane.xlu0 %670  ;;  %v1317_v7 = vmul.f32 %v4859_v43, %v4859_v43  ;;  %v1318_v60 = vmul.f32 %v7303_v10, %v7303_v10  ;;  %v3778_v54 = vld [vmem:[#allocation2 + $0x7f8] sm:$0xff]  ;;  %v3780_v30 = vld [vmem:[#allocation2 + $0x808] sm:$0xff] }
 0x161   :  { %7299 = vst [vmem:[#allocation254_spill] sm:$0xff] %v5079_v61  ;;  %7300 = vst [vmem:[#allocation255_spill] sm:$0xff] %v5082_v0  ;;  %v5089_v63 = vadd.f32 %v1670_v13, %v1313_v57  ;;  %v808_v62 = vmul.f32 0.0026041667, %v671_v58  ;;  %v1319_v51 = vmul.f32 %v4863_v42, %v4863_v42  ;;  %v1314_v21 = vmul.f32 %v7304_v34, %v7304_v34  ;;  %v3779_v57 = vld [vmem:[#allocation2 + $0x800] sm:$0xff]  ;;  %v3782_v10 = vld [vmem:[#allocation2 + $0x7e8] sm:$0xff] }
 0x162   :  { %7301 = vst [vmem:[#allocation256_spill] sm:$0xff] %v5084_v44  ;;  %7302 = vst [vmem:[#allocation257_spill] sm:$0xff] %v5086_v24  ;;  %v5095_v53 = vadd.f32 %v1666_v20, %v1310_v23  ;;  %v5101_v28 = vsub.f32 %v3778_v54, %v809_v50  ;;  %v5103_v13 = vsub.f32 %v3779_v57, %v809_v50  ;;  %1640 = vadd.xlane.f32.xlu1 %v4955_v15  ;;  %v3781_v23 = vld [vmem:[#allocation2 + $0x7e0] sm:$0xff]  ;;  %v3783_v43 = vld [vmem:[#allocation2 + $0x7f0] sm:$0xff]  ;;  %v683_v54 = vpop.xlane.xlu1 %682 }
 0x163   :  { %v5105_v8 = vsub.f32 %v3780_v30, %v809_v50  ;;  %v1678_v58 = vadd.f32 %v1318_v60, %v1317_v7  ;;  %v5108_v20 = vsub.f32 %v3781_v23, %v808_v62  ;;  %v5110_v42 = vsub.f32 %v3782_v10, %v808_v62  ;;  %1636 = vadd.xlane.f32.xlu0 %v4961_v38  ;;  %v7309_v15 = vld [vmem:[#allocation215_spill] sm:$0xff] }
 0x164   :  { %7305 = vst [vmem:[#allocation258_spill] sm:$0xff] %v5101_v28  ;;  %v5112_v34 = vsub.f32 %v3783_v43, %v808_v62  ;;  %v1315_v57 = vmul.f32 %v4870_v2, %v4870_v2  ;;  %v811_v50 = vmul.f32 0.0026041667, %v683_v54  ;;  %v679_v30 = vpop.xlane.xlu0 %678  ;;  %v1316_v7 = vmul.f32 %v7309_v15, %v7309_v15  ;;  %v7310_v43 = vld [vmem:[#allocation216_spill] sm:$0xff] }
 0x165   :  { %7306 = vst [vmem:[#allocation259_spill] sm:$0xff] %v5105_v8  ;;  %7307 = vst [vmem:[#allocation260_spill] sm:$0xff] %v5110_v42  ;;  %v5117_v8 = vadd.f32 %v1678_v58, %v1319_v51  ;;  %v1323_v10 = vmul.f32 %v4887_v9, %v4887_v9  ;;  %v810_v60 = vmul.f32 0.0026041667, %v679_v30  ;;  %v1324_v62 = vmul.f32 %v7310_v43, %v7310_v43  ;;  %v3785_v54 = vld [vmem:[#allocation2 + $0x830] sm:$0xff]  ;;  %v3786_v58 = vld [vmem:[#allocation2 + $0x838] sm:$0xff] }
 0x166   :  { %7308 = vst [vmem:[#allocation261_spill] sm:$0xff] %v5112_v34  ;;  %v1674_v23 = vadd.f32 %v1315_v57, %v1314_v21  ;;  %v1325_v38 = vmul.f32 %v4891_v55, %v4891_v55  ;;  %v3784_v34 = vld [vmem:[#allocation2 + $0x828] sm:$0xff]  ;;  %v5129_v51 = vsub.f32 %v3785_v54, %v811_v50  ;;  %v5131_v42 = vsub.f32 %v3786_v58, %v811_v50  ;;  %v3787_v57 = vld [vmem:[#allocation2 + $0x810] sm:$0xff]  ;;  %v3788_v43 = vld [vmem:[#allocation2 + $0x818] sm:$0xff]  ;;  %v691_v54 = vpop.xlane.xlu1 %690 }
 0x167   :  { %v5127_v2 = vsub.f32 %v3784_v34, %v811_v50  ;;  %1648 = vadd.xlane.f32.xlu1 %v4983_v40  ;;  %v1320_v21 = vmul.f32 %v4896_v56, %v4896_v56  ;;  %v5136_v30 = vsub.f32 %v3787_v57, %v810_v60  ;;  %v5138_v9 = vsub.f32 %v3788_v43, %v810_v60  ;;  %v3789_v55 = vld [vmem:[#allocation2 + $0x820] sm:$0xff] }
 0x168   :  { %7311 = vst [vmem:[#allocation262_spill] sm:$0xff] %v5129_v51  ;;  %7312 = vst [vmem:[#allocation263_spill] sm:$0xff] %v5131_v42  ;;  %v5140_v34 = vsub.f32 %v3789_v55, %v810_v60  ;;  %1644 = vadd.xlane.f32.xlu0 %v5009_v52  ;;  %v5143_v15 = vadd.f32 %v1674_v23, %v1316_v7  ;;  %v813_v50 = vmul.f32 0.0026041667, %v691_v54  ;;  %v687_v58 = vpop.xlane.xlu0 %686  ;;  %v2394_v43 = vlaneseq  ;;  %v3790_v60 = vld [vmem:[#allocation2 + $0x858] sm:$0xff]  ;;  %v3791_v23 = vld [vmem:[#allocation2 + $0x860] sm:$0xff] }
 0x169   :  { %7313 = vst [vmem:[#allocation264_spill] sm:$0xff] %v5136_v30  ;;  %7314 = vst [vmem:[#allocation265_spill] sm:$0xff] %v5138_v9  ;;  %v1686_v40 = vadd.f32 %v1324_v62, %v1323_v10  ;;  %v1321_v56 = vmul.f32 %v4898_v59, %v4898_v59  ;;  %v1322_v57 = vmul.f32 %v4900_v49, %v4900_v49  ;;  %v812_v30 = vmul.f32 0.0026041667, %v687_v58  ;;  %v3792_v10 = vld [vmem:[#allocation2 + $0x868] sm:$0xff]  ;;  %v3793_v58 = vld [vmem:[#allocation2 + $0x840] sm:$0xff] }
 0x16a   :  { %7315 = vst [vmem:[#allocation266_spill] sm:$0xff] %v5140_v34  ;;  %v1329_v55 = vmul.f32 %v4913_v47, %v4913_v47  ;;  %v1330_v52 = vmul.f32 %v4915_v27, %v4915_v27  ;;  %v5153_v7 = vsub.f32 %v3790_v60, %v813_v50  ;;  %v5155_v54 = vsub.f32 %v3791_v23, %v813_v50  ;;  %v3794_v47 = vld [vmem:[#allocation2 + $0x848] sm:$0xff]  ;;  %v3795_v27 = vld [vmem:[#allocation2 + $0x850] sm:$0xff]  ;;  %v699_v60 = vpop.xlane.xlu1 %698 }
 0x16b   :  { %v5157_v62 = vsub.f32 %v3792_v10, %v813_v50  ;;  %1656 = vadd.xlane.f32.xlu1 %v5028_v1  ;;  %v5160_v49 = vadd.f32 %v1686_v40, %v1325_v38  ;;  %v5162_v59 = vsub.f32 %v3793_v58, %v812_v30  ;;  %v5164_v34 = vsub.f32 %v3794_v47, %v812_v30  ;;  %v2096_v10 = vld [vmem:[#allocation5] ss:$2 sm:$0x7]  ;;  %v2098_v47 = vld [vmem:[#allocation5 + $0x1] ss:$2 sm:$0x7] }
 0x16c   :  { %7316 = vst [vmem:[#allocation267_spill] sm:$0xff] %v5153_v7  ;;  %7317 = vst [vmem:[#allocation268_spill] sm:$0xff] %v5155_v54  ;;  %v5166_v9 = vsub.f32 %v3795_v27, %v812_v30  ;;  %1652 = vadd.xlane.f32.xlu0 %v5041_v41  ;;  %v1682_v23 = vadd.f32 %v1321_v56, %v1320_v21  ;;  %v815_v54 = vmul.f32 0.0026041667, %v699_v60  ;;  %v695_v50 = vpop.xlane.xlu0 %694  ;;  %v3796_v30 = vld [vmem:[#allocation2 + $0x888] sm:$0xff]  ;;  %v3797_v21 = vld [vmem:[#allocation2 + $0x890] sm:$0xff] }
 0x16d   :  { %7318 = vst [vmem:[#allocation269_spill] sm:$0xff] %v5157_v62  ;;  %7319 = vst [vmem:[#allocation270_spill] sm:$0xff] %v5162_v59  ;;  %v2395_v62 = vshrl.u32 %v2394_v43, 7  ;;  %v1331_v1 = vmul.f32 %v4917_v46, %v4917_v46  ;;  %v1694_v38 = vadd.f32 %v1330_v52, %v1329_v55  ;;  %v814_v40 = vmul.f32 0.0026041667, %v695_v50  ;;  %v3798_v43 = vld [vmem:[#allocation2 + $0x898] sm:$0xff] }
 0x16e   :  { %7320 = vst [vmem:[#allocation271_spill] sm:$0xff] %v5164_v34  ;;  %7321 = vst [vmem:[#allocation272_spill] sm:$0xff] %v5166_v9  ;;  %v5171_v58 = vadd.f32 %v1682_v23, %v1322_v57  ;;  %v1326_v27 = vmul.f32 %v4922_v26, %v4922_v26  ;;  %v1327_v41 = vmul.f32 %v4924_v18, %v4924_v18  ;;  %v3799_v55 = vld [vmem:[#allocation2 + $0x870] sm:$0xff]  ;;  %v3800_v23 = vld [vmem:[#allocation2 + $0x878] sm:$0xff] }
 0x16f   :  { %v5177_v56 = vsub.f32 %v3796_v30, %v815_v54  ;;  %v5179_v60 = vsub.f32 %v3797_v21, %v815_v54  ;;  %v5181_v9 = vsub.f32 %v3798_v43, %v815_v54  ;;  %1664 = vadd.xlane.f32.xlu1 %v5054_v4  ;;  %v2396_v57 = vsub.s32 0, %v2395_v62  ;;  %v3801_v26 = vld [vmem:[#allocation2 + $0x880] sm:$0xff]  ;;  %v707_v30 = vpop.xlane.xlu1 %706 }
 0x170   :  { %v5184_v52 = vsub.f32 %v3799_v55, %v814_v40  ;;  %v5186_v50 = vsub.f32 %v3800_v23, %v814_v40  ;;  %v5188_v18 = vsub.f32 %v3801_v26, %v814_v40  ;;  %1660 = vadd.xlane.f32.xlu0 %v5069_v48  ;;  %v2400_v21 = vsub.s32 1, %v2395_v62  ;;  %v3802_v26 = vld [vmem:[#allocation2 + $0x8b8] sm:$0xff]  ;;  %v3803_v48 = vld [vmem:[#allocation2 + $0x8c0] sm:$0xff] }
 0x171   :  { %7322 = vst [vmem:[#allocation273_spill] sm:$0xff] %v5177_v56  ;;  %7323 = vst [vmem:[#allocation274_spill] sm:$0xff] %v5179_v60  ;;  %v817_v46 = vmul.f32 0.0026041667, %v707_v30  ;;  %v703_v60 = vpop.xlane.xlu0 %702  ;;  %v5191_v54 = vrot.slane %v2096_v10, %v2396_v57  ;;  %v2404_v43 = vsub.s32 2, %v2395_v62  ;;  %v5193_v4 = vrot.slane %v2098_v47, %v2396_v57  ;;  %v3804_v30 = vld [vmem:[#allocation2 + $0x8c8] sm:$0xff] }
 0x172   :  { %7324 = vst [vmem:[#allocation275_spill] sm:$0xff] %v5181_v9  ;;  %7325 = vst [vmem:[#allocation276_spill] sm:$0xff] %v5184_v52  ;;  %v816_v9 = vmul.f32 0.0026041667, %v703_v60  ;;  %v5195_v55 = vrot.slane %v2096_v10, %v2400_v21  ;;  %v5197_v52 = vrot.slane %v2098_v47, %v2400_v21  ;;  %v5199_v23 = vadd.f32 %v1694_v38, %v1331_v1  ;;  %v3805_v60 = vld [vmem:[#allocation2 + $0x8a0] sm:$0xff]  ;;  %v3806_v21 = vld [vmem:[#allocation2 + $0x8a8] sm:$0xff] }
 0x173   :  { %7326 = vst [vmem:[#allocation277_spill] sm:$0xff] %v5186_v50  ;;  %7327 = vst [vmem:[#allocation278_spill] sm:$0xff] %v5188_v18  ;;  %v5201_v40 = vsub.f32 %v3802_v26, %v817_v46  ;;  %v5203_v18 = vsub.f32 %v3803_v48, %v817_v46  ;;  %v5205_v50 = vsub.f32 %v3804_v30, %v817_v46  ;;  %1672 = vadd.xlane.f32.xlu1 %v5089_v63  ;;  %v3807_v1 = vld [vmem:[#allocation2 + $0x8b0] sm:$0xff]  ;;  %v715_v26 = vpop.xlane.xlu1 %714 }
 0x174   :  { %v5208_v62 = vrot.slane %v2096_v10, %v2404_v43  ;;  %v5210_v57 = vsub.f32 %v3805_v60, %v816_v9  ;;  %v5212_v56 = vsub.f32 %v3806_v21, %v816_v9  ;;  %v5214_v38 = vsub.f32 %v3807_v1, %v816_v9  ;;  %1668 = vadd.xlane.f32.xlu0 %v5095_v53  ;;  %v7336_v21 = vld [vmem:[#allocation228_spill] sm:$0xff] }
 0x175   :  { %7328 = vst [vmem:[#allocation279_spill] sm:$0xff] %v5201_v40  ;;  %7329 = vst [vmem:[#allocation280_spill] sm:$0xff] %v5203_v18  ;;  %v5217_v48 = vrot.slane %v2098_v47, %v2404_v43  ;;  %v819_v46 = vmul.f32 0.0026041667, %v715_v26  ;;  %v711_v30 = vpop.xlane.xlu0 %710  ;;  %v1690_v10 = vadd.f32 %v1327_v41, %v1326_v27  ;;  %v7335_v18 = vld [vmem:[#allocation227_spill] sm:$0xff]  ;;  %v1337_v9 = vmul.f32 %v4945_v25, %v4945_v25  ;;  %v3809_v1 = vld [vmem:[#allocation2 + $0x8f0] sm:$0xff] }
 0x176   :  { %7330 = vst [vmem:[#allocation281_spill] sm:$0xff] %v5205_v50  ;;  %7331 = vst [vmem:[#allocation282_spill] sm:$0xff] %v5210_v57  ;;  %v7334_v50 = vld [vmem:[#allocation226_spill] sm:$0xff]  ;;  %v1335_v60 = vmul.f32 %v7335_v18, %v7335_v18  ;;  %v818_v57 = vmul.f32 0.0026041667, %v711_v30  ;;  %v1332_v53 = vmul.f32 %v4948_v19, %v4948_v19  ;;  %v3808_v47 = vld [vmem:[#allocation2 + $0x8e8] sm:$0xff] }
 0x177   :  { %7332 = vst [vmem:[#allocation283_spill] sm:$0xff] %v5212_v56  ;;  %7333 = vst [vmem:[#allocation284_spill] sm:$0xff] %v5214_v38  ;;  %v1328_v63 = vmul.f32 %v7334_v50, %v7334_v50  ;;  %v1336_v56 = vmul.f32 %v7336_v21, %v7336_v21  ;;  %v5229_v43 = vsub.f32 %v3808_v47, %v819_v46  ;;  %v3810_v27 = vld [vmem:[#allocation2 + $0x8f8] sm:$0xff]  ;;  %1680 = vadd.xlane.f32.xlu1 %v5117_v8  ;;  %v3811_v18 = vld [vmem:[#allocation2 + $0x8d0] sm:$0xff]  ;;  %v723_v47 = vpop.xlane.xlu1 %722 }
 0x178   :  { %v5231_v26 = vsub.f32 %v3809_v1, %v819_v46  ;;  %v5233_v41 = vsub.f32 %v3810_v27, %v819_v46  ;;  %v5236_v21 = vsub.f32 %v3811_v18, %v818_v57  ;;  %v3812_v50 = vld [vmem:[#allocation2 + $0x8d8] sm:$0xff]  ;;  %v3813_v38 = vld [vmem:[#allocation2 + $0x8e0] sm:$0xff]  ;;  %1676 = vadd.xlane.f32.xlu0 %v5143_v15  ;;  %v1333_v46 = vmul.f32 %v4950_v45, %v4950_v45 }
 0x179   :  { %7337 = vst [vmem:[#allocation285_spill] sm:$0xff] %v5229_v43  ;;  %v1691_v30 = vadd.f32 %v1690_v10, %v1328_v63  ;;  %v5238_v25 = vsub.f32 %v3812_v50, %v818_v57  ;;  %v5240_v19 = vsub.f32 %v3813_v38, %v818_v57  ;;  %v1702_v1 = vadd.f32 %v1336_v56, %v1335_v60  ;;  %v719_v43 = vpop.xlane.xlu0 %718  ;;  %v7343_v38 = vld [vmem:[#allocation235_spill] sm:$0xff]  ;;  %v3814_v56 = vld [vmem:[#allocation2 + $0x918] sm:$0xff] }
 0x17a   :  { %7338 = vst [vmem:[#allocation286_spill] sm:$0xff] %v5231_v26  ;;  %7339 = vst [vmem:[#allocation287_spill] sm:$0xff] %v5233_v41  ;;  %v821_v26 = vmul.f32 0.0026041667, %v723_v47  ;;  %v1334_v8 = vmul.f32 %v4952_v32, %v4952_v32  ;;  %v1341_v18 = vmul.f32 %v4967_v33, %v4967_v33  ;;  %v820_v50 = vmul.f32 0.0026041667, %v719_v43 }
 0x17b   :  { %7340 = vst [vmem:[#allocation288_spill] sm:$0xff] %v5236_v21  ;;  %7341 = vst [vmem:[#allocation289_spill] sm:$0xff] %v5238_v25  ;;  %v1703_v63 = vadd.f32 %v1702_v1, %v1337_v9  ;;  %v1342_v57 = vmul.f32 %v4969_v22, %v4969_v22  ;;  %v1343_v15 = vmul.f32 %v7343_v38, %v7343_v38  ;;  %v3815_v60 = vld [vmem:[#allocation2 + $0x920] sm:$0xff]  ;;  %v3816_v47 = vld [vmem:[#allocation2 + $0x928] sm:$0xff]  ;;  %1688 = vadd.xlane.f32.xlu1 %v5160_v49 }
 0x17c   :  { %7342 = vst [vmem:[#allocation290_spill] sm:$0xff] %v5240_v19  ;;  %v5253_v10 = vsub.f32 %v3814_v56, %v821_v26  ;;  %v5255_v27 = vsub.f32 %v3815_v60, %v821_v26  ;;  %v5257_v45 = vsub.f32 %v3816_v47, %v821_v26  ;;  %v1698_v33 = vadd.f32 %v1333_v46, %v1332_v53  ;;  %v3817_v43 = vld [vmem:[#allocation2 + $0x900] sm:$0xff]  ;;  %v3818_v1 = vld [vmem:[#allocation2 + $0x908] sm:$0xff]  ;;  %v3819_v32 = vld [vmem:[#allocation2 + $0x910] sm:$0xff]  ;;  %v1417_v56 = vpop.xlane.xlu1 %1416 }
 0x17d   :  { %v5260_v9 = vsub.f32 %v3817_v43, %v820_v50  ;;  %v5262_v22 = vsub.f32 %v3818_v1, %v820_v50  ;;  %v5264_v38 = vsub.f32 %v3819_v32, %v820_v50  ;;  %1684 = vadd.xlane.f32.xlu0 %v5171_v58  ;;  %v1710_v60 = vadd.f32 %v1342_v57, %v1341_v18  ;;  %v7350_v32 = vld [vmem:[#allocation239_spill] sm:$0xff]  ;;  %v7351_v57 = vld [vmem:[#allocation240_spill] sm:$0xff] }
 0x17e   :  { %7344 = vst [vmem:[#allocation291_spill] sm:$0xff] %v5253_v10  ;;  %7345 = vst [vmem:[#allocation292_spill] sm:$0xff] %v5255_v27  ;;  %v1803_v27 = vmul.f32 0.0026041667, %v1417_v56  ;;  %v1413_v10 = vpop.xlane.xlu0 %1412  ;;  %v1699_v26 = vadd.f32 %v1698_v33, %v1334_v8  ;;  %v1338_v49 = vmul.f32 %v4974_v39, %v4974_v39  ;;  %v1339_v53 = vmul.f32 %v4976_v5, %v4976_v5  ;;  %v7352_v8 = vld [vmem:[#allocation241_spill] sm:$0xff] }
 0x17f   :  { %7346 = vst [vmem:[#allocation293_spill] sm:$0xff] %v5257_v45  ;;  %7347 = vst [vmem:[#allocation294_spill] sm:$0xff] %v5260_v9  ;;  %v1802_v46 = vmul.f32 0.0026041667, %v1413_v10  ;;  %v1711_v47 = vadd.f32 %v1710_v60, %v1343_v15  ;;  %v1340_v43 = vmul.f32 %v4978_v14, %v4978_v14  ;;  %v1347_v50 = vmul.f32 %v7350_v32, %v7350_v32  ;;  %v7353_v15 = vld [vmem:[#allocation242_spill] sm:$0xff]  ;;  %v7354_v14 = vld [vmem:[#allocation243_spill] sm:$0xff] }
 0x180   :  { %7348 = vst [vmem:[#allocation295_spill] sm:$0xff] %v5262_v22  ;;  %7349 = vst [vmem:[#allocation296_spill] sm:$0xff] %v5264_v38  ;;  %v1901_v58 = vadd.f32 1e-06, %v1803_v27  ;;  %1696 = vadd.xlane.f32.xlu1 %v5199_v23  ;;  %v1706_v18 = vadd.f32 %v1339_v53, %v1338_v49  ;;  %v1348_v33 = vmul.f32 %v7351_v57, %v7351_v57  ;;  %v1425_v10 = vpop.xlane.xlu1 %1424  ;;  %v7355_v32 = vld [vmem:[#allocation244_spill] sm:$0xff]  ;;  %v7356_v38 = vld [vmem:[#allocation245_spill] sm:$0xff] }
 0x181   :  { %v1349_v1 = vmul.f32 %v7352_v8, %v7352_v8  ;;  %v1900_v56 = vadd.f32 1e-06, %v1802_v46  ;;  %1692 = vadd.xlane.f32.xlu0 %v1691_v30  ;;  %v1344_v60 = vmul.f32 %v7353_v15, %v7353_v15  ;;  %v1345_v5 = vmul.f32 %v7354_v14, %v7354_v14 }
 0x182   :  { %v1346_v27 = vmul.f32 %v7355_v32, %v7355_v32  ;;  %3330 = vrsqrt.f32 %v1901_v58  ;;  %v1805_v23 = vmul.f32 0.0026041667, %v1425_v10  ;;  %v1421_v49 = vpop.xlane.xlu0 %1420  ;;  %v1707_v53 = vadd.f32 %v1706_v18, %v1340_v43 }
 0x183   :  { %v1718_v57 = vadd.f32 %v1348_v33, %v1347_v50  ;;  %3332 = vrsqrt.f32 %v1900_v56  ;;  %v1804_v39 = vmul.f32 0.0026041667, %v1421_v49  ;;  %v1714_v8 = vadd.f32 %v1345_v5, %v1344_v60 }
 0x184   :  { %v1353_v30 = vmul.f32 %v5021_v3, %v5021_v3  ;;  %v1903_v46 = vadd.f32 1e-06, %v1805_v23  ;;  %1704 = vadd.xlane.f32.xlu1 %v1703_v63  ;;  %v1354_v14 = vmul.f32 %v7356_v38, %v7356_v38  ;;  %v1355_v32 = vmul.f32 %v5025_v6, %v5025_v6  ;;  %v1433_v10 = vpop.xlane.xlu1 %1432 }
 0x185   :  { %v1719_v15 = vadd.f32 %v1718_v57, %v1349_v1  ;;  %v1902_v58 = vadd.f32 1e-06, %v1804_v39  ;;  %1700 = vadd.xlane.f32.xlu0 %v1699_v26  ;;  %v1715_v43 = vadd.f32 %v1714_v8, %v1346_v27  ;;  %v1350_v50 = vmul.f32 %v5030_v12, %v5030_v12 }
 0x186   :  { %v1351_v5 = vmul.f32 %v5032_v29, %v5032_v29  ;;  %3334 = vrsqrt.f32 %v1903_v46  ;;  %v1807_v18 = vmul.f32 0.0026041667, %v1433_v10  ;;  %v1429_v63 = vpop.xlane.xlu0 %1428  ;;  %v1726_v57 = vadd.f32 %v1354_v14, %v1353_v30 }
 0x187   :  { %v1352_v33 = vmul.f32 %v5034_v17, %v5034_v17  ;;  %3336 = vrsqrt.f32 %v1902_v58  ;;  %v1806_v1 = vmul.f32 0.0026041667, %v1429_v63  ;;  %v1359_v39 = vmul.f32 %v5047_v35, %v5047_v35 }
 0x188   :  { %v1722_v56 = vadd.f32 %v1351_v5, %v1350_v50  ;;  %v1905_v26 = vadd.f32 1e-06, %v1807_v18  ;;  %1712 = vadd.xlane.f32.xlu1 %v1711_v47  ;;  %v1727_v8 = vadd.f32 %v1726_v57, %v1355_v32  ;;  %v1360_v60 = vmul.f32 %v5049_v36, %v5049_v36  ;;  %v1441_v14 = vpop.xlane.xlu1 %1440  ;;  %v7357_v18 = vld [vmem:[#allocation252_spill] sm:$0xff] }
 0x189   :  { %v1361_v27 = vmul.f32 %v5051_v31, %v5051_v31  ;;  %v1904_v23 = vadd.f32 1e-06, %v1806_v1  ;;  %1708 = vadd.xlane.f32.xlu0 %v1707_v53  ;;  %v1356_v30 = vmul.f32 %v5056_v16, %v5056_v16  ;;  %v1357_v46 = vmul.f32 %v5058_v11, %v5058_v11  ;;  %v7377_v16 = vld [vmem:[#allocation29_spill] sm:$0xff] }
 0x18a   :  { %v1723_v49 = vadd.f32 %v1722_v56, %v1352_v33  ;;  %3338 = vrsqrt.f32 %v1905_v26  ;;  %v1809_v58 = vmul.f32 0.0026041667, %v1441_v14  ;;  %v1437_v47 = vpop.xlane.xlu0 %1436  ;;  %v1734_v32 = vadd.f32 %v1360_v60, %v1359_v39  ;;  %v7358_v33 = vld [vmem:[#allocation253_spill] sm:$0xff] }
 0x18b   :  { %v1358_v10 = vmul.f32 %v5060_v37, %v5060_v37  ;;  %3340 = vrsqrt.f32 %v1904_v23  ;;  %v1808_v50 = vmul.f32 0.0026041667, %v1437_v47  ;;  %v1730_v5 = vadd.f32 %v1357_v46, %v1356_v30  ;;  %v7374_v37 = vld [vmem:[#allocation26_spill] sm:$0xff] }
 0x18c   :  { %v1365_v53 = vmul.f32 %v7357_v18, %v7357_v18  ;;  %v1907_v63 = vadd.f32 1e-06, %v1809_v58  ;;  %1720 = vadd.xlane.f32.xlu1 %v1719_v15  ;;  %v1735_v57 = vadd.f32 %v1734_v32, %v1361_v27  ;;  %v1366_v1 = vmul.f32 %v7358_v33, %v7358_v33  ;;  %v1449_v26 = vpop.xlane.xlu1 %1448 }
 0x18d   :  { %v5316_v56 = vmul.f32 %v5079_v61, %v5079_v61  ;;  %v1906_v39 = vadd.f32 1e-06, %v1808_v50  ;;  %1716 = vadd.xlane.f32.xlu0 %v1715_v43  ;;  %v1731_v60 = vadd.f32 %v1730_v5, %v1358_v10  ;;  %v1362_v23 = vmul.f32 %v5082_v0, %v5082_v0  ;;  %v7359_v50 = vld [vmem:[#allocation20_spill] sm:$0xff]  ;;  %v7363_v61 = vld [vmem:[#allocation15_spill] sm:$0xff] }
 0x18e   :  { %v1363_v14 = vmul.f32 %v5084_v44, %v5084_v44  ;;  %3342 = vrsqrt.f32 %v1907_v63  ;;  %v1811_v15 = vmul.f32 0.0026041667, %v1449_v26  ;;  %v1445_v27 = vpop.xlane.xlu0 %1444  ;;  %v5322_v30 = vadd.f32 %v1366_v1, %v1365_v53  ;;  %v7360_v63 = vld [vmem:[#allocation21_spill] sm:$0xff]  ;;  %v7361_v53 = vld [vmem:[#allocation22_spill] sm:$0xff] }
 0x18f   :  { %v5326_v46 = vmul.f32 %v5086_v24, %v5086_v24  ;;  %v3331_v58 = vpop.eup %3330  ;;  %3344 = vrsqrt.f32 %v1906_v39  ;;  %v1810_v43 = vmul.f32 0.0026041667, %v1445_v27  ;;  %v5332_v32 = vmul.f32 %v5101_v28, %v5101_v28  ;;  %v7362_v24 = vld [vmem:[#allocation14_spill] sm:$0xff]  ;;  %v7364_v27 = vld [vmem:[#allocation16_spill] sm:$0xff] }
 0x190   :  { %v5328_v47 = vadd.f32 %v1363_v14, %v1362_v23  ;;  %v3333_v10 = vpop.eup %3332  ;;  %v2102_v5 = vmul.f32 %v3331_v58, %v7359_v50  ;;  %v2103_v26 = vmul.f32 %v3331_v58, %v7360_v63  ;;  %v2104_v1 = vmul.f32 %v3331_v58, %v7361_v53  ;;  %1728 = vadd.xlane.f32.xlu1 %v1727_v8  ;;  %v1457_v33 = vpop.xlane.xlu1 %1456 }
 0x191   :  { %v1909_v44 = vadd.f32 1e-06, %v1811_v15  ;;  %v2099_v0 = vmul.f32 %v3333_v10, %v7362_v24  ;;  %v2100_v39 = vmul.f32 %v3333_v10, %v7363_v61  ;;  %v2101_v23 = vmul.f32 %v3333_v10, %v7364_v27  ;;  %1724 = vadd.xlane.f32.xlu0 %v1723_v49 }
 0x192   :  { %v1908_v14 = vadd.f32 1e-06, %v1810_v43  ;;  %v2412_v28 = vmul.f32 %v5191_v54, %v2102_v5  ;;  %v2413_v18 = vmul.f32 %v5195_v55, %v2103_v26  ;;  %v2414_v50 = vmul.f32 %v5208_v62, %v2104_v1  ;;  %v1453_v63 = vpop.xlane.xlu0 %1452  ;;  %v7365_v5 = vld [vmem:[#allocation17_spill] sm:$0xff]  ;;  %v7366_v1 = vld [vmem:[#allocation18_spill] sm:$0xff] }
 0x193   :  { %3346 = vrsqrt.f32 %v1909_v44  ;;  %v3335_v58 = vpop.eup %3334  ;;  %v2409_v8 = vmul.f32 %v5191_v54, %v2099_v0  ;;  %v2410_v24 = vmul.f32 %v5195_v55, %v2100_v39  ;;  %v2411_v61 = vmul.f32 %v5208_v62, %v2101_v23 }
 0x194   :  { %3348 = vrsqrt.f32 %v1908_v14  ;;  %v3337_v15 = vpop.eup %3336  ;;  %v2722_v49 = vadd.f32 %v5193_v4, %v2412_v28  ;;  %v2723_v43 = vadd.f32 %v5197_v52, %v2413_v18  ;;  %v2724_v10 = vadd.f32 %v5217_v48, %v2414_v50  ;;  %1736 = vadd.xlane.f32.xlu1 %v1735_v57  ;;  %v5354_v27 = vpop.xlane.xlu1 %1464  ;;  %v7367_v28 = vld [vmem:[#allocation19_spill] sm:$0xff]  ;;  %v7369_v50 = vld [vmem:[#allocation12_spill] sm:$0xff] }
 0x195   :  { %v2108_v26 = vmul.f32 %v3335_v58, %v7365_v5  ;;  %v2719_v44 = vadd.f32 %v5193_v4, %v2409_v8  ;;  %v2720_v53 = vadd.f32 %v5197_v52, %v2410_v24  ;;  %v2721_v0 = vadd.f32 %v5217_v48, %v2411_v61  ;;  %1732 = vadd.xlane.f32.xlu0 %v1731_v60  ;;  %v7368_v14 = vld [vmem:[#allocation11_spill] sm:$0xff]  ;;  %v7370_v61 = vld [vmem:[#allocation13_spill] sm:$0xff] }
 0x196   :  { %v2109_v39 = vmul.f32 %v3335_v58, %v7366_v1  ;;  %3016 = vst [vmem:[#allocation7 + $0x18] sm:$0xff] %v2722_v49  ;;  %3017 = vst [vmem:[#allocation7 + $0x20] sm:$0xff] %v2723_v43  ;;  %v2110_v18 = vmul.f32 %v3335_v58, %v7367_v28  ;;  %v2105_v57 = vmul.f32 %v3337_v15, %v7368_v14  ;;  %v5360_v5 = vpop.xlane.xlu0 %1460  ;;  %v5364_v43 = vmul.f32 0.0026041667, %v1457_v33 }
 0x197   :  { %3018 = vst [vmem:[#allocation7 + $0x28] sm:$0xff] %v2724_v10  ;;  %v2418_v23 = vmul.f32 %v5191_v54, %v2108_v26  ;;  %v2106_v8 = vmul.f32 %v3337_v15, %v7369_v50  ;;  %v3339_v24 = vpop.eup %3338  ;;  %3013 = vst [vmem:[#allocation7] sm:$0xff] %v2719_v44  ;;  %v2107_v49 = vmul.f32 %v3337_v15, %v7370_v61  ;;  %v5366_v10 = vmul.f32 0.0026041667, %v1453_v63  ;;  %v7372_v15 = vld [vmem:[#allocation24_spill] sm:$0xff] }
 0x198   :  { %3014 = vst [vmem:[#allocation7 + $0x8] sm:$0xff] %v2720_v53  ;;  %3015 = vst [vmem:[#allocation7 + $0x10] sm:$0xff] %v2721_v0  ;;  %v2419_v60 = vmul.f32 %v5195_v55, %v2109_v39  ;;  %v3341_v58 = vpop.eup %3340  ;;  %v2420_v26 = vmul.f32 %v5208_v62, %v2110_v18  ;;  %v2415_v28 = vmul.f32 %v5191_v54, %v2105_v57  ;;  %v7371_v0 = vld [vmem:[#allocation23_spill] sm:$0xff]  ;;  %v5376_v50 = vpop.xlane.xlu1 %1472  ;;  %v7373_v57 = vld [vmem:[#allocation25_spill] sm:$0xff] }
 0x199   :  { %v2728_v1 = vadd.f32 %v5193_v4, %v2418_v23  ;;  %v2416_v14 = vmul.f32 %v5195_v55, %v2106_v8  ;;  %v2417_v53 = vmul.f32 %v5208_v62, %v2107_v49  ;;  %v2114_v39 = vmul.f32 %v3339_v24, %v7371_v0 }
 0x19a   :  { %v2729_v44 = vadd.f32 %v5197_v52, %v2419_v60  ;;  %v2115_v33 = vmul.f32 %v3339_v24, %v7372_v15  ;;  %v2730_v63 = vadd.f32 %v5217_v48, %v2420_v26  ;;  %v2725_v18 = vadd.f32 %v5193_v4, %v2415_v28  ;;  %v5382_v8 = vpop.xlane.xlu0 %1468  ;;  %v7375_v28 = vld [vmem:[#allocation27_spill] sm:$0xff] }
 0x19b   :  { %3022 = vst [vmem:[#allocation7 + $0x48] sm:$0xff] %v2728_v1  ;;  %v2726_v23 = vadd.f32 %v5197_v52, %v2416_v14  ;;  %v2116_v61 = vmul.f32 %v3339_v24, %v7373_v57  ;;  %v3343_v60 = vpop.eup %3342  ;;  %v2727_v49 = vadd.f32 %v5217_v48, %v2417_v53  ;;  %v2424_v0 = vmul.f32 %v5191_v54, %v2114_v39  ;;  %v7376_v14 = vld [vmem:[#allocation28_spill] sm:$0xff] }
 0x19c   :  { %3023 = vst [vmem:[#allocation7 + $0x50] sm:$0xff] %v2729_v44  ;;  %v2425_v15 = vmul.f32 %v5195_v55, %v2115_v33  ;;  %v2111_v11 = vmul.f32 %v3341_v58, %v7374_v37  ;;  %v3345_v26 = vpop.eup %3344  ;;  %3024 = vst [vmem:[#allocation7 + $0x58] sm:$0xff] %v2730_v63  ;;  %v2112_v24 = vmul.f32 %v3341_v58, %v7375_v28  ;;  %v7378_v37 = vld [vmem:[#allocation30_spill] sm:$0xff]  ;;  %v5396_v63 = vpop.xlane.xlu1 %1480 }
 0x19d   :  { %3019 = vst [vmem:[#allocation7 + $0x30] sm:$0xff] %v2725_v18  ;;  %3020 = vst [vmem:[#allocation7 + $0x38] sm:$0xff] %v2726_v23  ;;  %v2426_v1 = vmul.f32 %v5208_v62, %v2116_v61  ;;  %v2113_v57 = vmul.f32 %v3341_v58, %v7376_v14  ;;  %v2120_v44 = vmul.f32 %v3343_v60, %v7377_v16  ;;  %v7379_v58 = vld [vmem:[#allocation31_spill] sm:$0xff]  ;;  %v7380_v14 = vld [vmem:[#allocation32_spill] sm:$0xff] }
 0x19e   :  { %3021 = vst [vmem:[#allocation7 + $0x40] sm:$0xff] %v2727_v49  ;;  %v2734_v53 = vadd.f32 %v5193_v4, %v2424_v0  ;;  %v2735_v39 = vadd.f32 %v5197_v52, %v2425_v15  ;;  %v2421_v33 = vmul.f32 %v5191_v54, %v2111_v11  ;;  %v2121_v31 = vmul.f32 %v3343_v60, %v7378_v37  ;;  %v5402_v16 = vpop.xlane.xlu0 %1476 }
 0x19f   :  { %v2736_v18 = vadd.f32 %v5217_v48, %v2426_v1  ;;  %v2422_v23 = vmul.f32 %v5195_v55, %v2112_v24  ;;  %v2423_v61 = vmul.f32 %v5208_v62, %v2113_v57  ;;  %v2122_v28 = vmul.f32 %v3343_v60, %v7379_v58  ;;  %v7381_v58 = vld [vmem:[#allocation33_spill] sm:$0xff] }
 0x1a0   :  { %v3347_v49 = vpop.eup %3346  ;;  %3028 = vst [vmem:[#allocation7 + $0x78] sm:$0xff] %v2734_v53  ;;  %3029 = vst [vmem:[#allocation7 + $0x80] sm:$0xff] %v2735_v39  ;;  %v2731_v0 = vadd.f32 %v5193_v4, %v2421_v33  ;;  %v2430_v11 = vmul.f32 %v5191_v54, %v2120_v44  ;;  %v2431_v15 = vmul.f32 %v5195_v55, %v2121_v31  ;;  %v7382_v44 = vld [vmem:[#allocation34_spill] sm:$0xff] }
 0x1a1   :  { %v2117_v37 = vmul.f32 %v3345_v26, %v7380_v14  ;;  %v3349_v1 = vpop.eup %3348  ;;  %3030 = vst [vmem:[#allocation7 + $0x88] sm:$0xff] %v2736_v18  ;;  %v2732_v24 = vadd.f32 %v5197_v52, %v2422_v23  ;;  %v2733_v57 = vadd.f32 %v5217_v48, %v2423_v61  ;;  %v2432_v60 = vmul.f32 %v5208_v62, %v2122_v28  ;;  %v5416_v14 = vpop.xlane.xlu1 %1488  ;;  %v7383_v61 = vld [vmem:[#allocation35_spill] sm:$0xff] }
 0x1a2   :  { %v2118_v36 = vmul.f32 %v3345_v26, %v7381_v58  ;;  %3025 = vst [vmem:[#allocation7 + $0x60] sm:$0xff] %v2731_v0  ;;  %v2740_v53 = vadd.f32 %v5193_v4, %v2430_v11  ;;  %v2741_v39 = vadd.f32 %v5197_v52, %v2431_v15  ;;  %v2119_v33 = vmul.f32 %v3345_v26, %v7382_v44  ;;  %v7384_v58 = vld [vmem:[#allocation36_spill] sm:$0xff]  ;;  %v5422_v35 = vpop.xlane.xlu0 %1484  ;;  %v7385_v15 = vld [vmem:[#allocation37_spill] sm:$0xff] }
 0x1a3   :  { %v2427_v31 = vmul.f32 %v5191_v54, %v2117_v37  ;;  %3026 = vst [vmem:[#allocation7 + $0x68] sm:$0xff] %v2732_v24  ;;  %3027 = vst [vmem:[#allocation7 + $0x70] sm:$0xff] %v2733_v57  ;;  %v2742_v18 = vadd.f32 %v5217_v48, %v2432_v60  ;;  %v2126_v28 = vmul.f32 %v3347_v49, %v7383_v61  ;;  %v7386_v24 = vld [vmem:[#allocation38_spill] sm:$0xff]  ;;  %v7387_v61 = vld [vmem:[#allocation39_spill] sm:$0xff] }
 0x1a4   :  { %v2428_v23 = vmul.f32 %v5195_v55, %v2118_v36  ;;  %v2127_v0 = vmul.f32 %v3347_v49, %v7384_v58  ;;  %3034 = vst [vmem:[#allocation7 + $0xa8] sm:$0xff] %v2740_v53  ;;  %3035 = vst [vmem:[#allocation7 + $0xb0] sm:$0xff] %v2741_v39  ;;  %v2429_v26 = vmul.f32 %v5208_v62, %v2119_v33  ;;  %v7388_v33 = vld [vmem:[#allocation40_spill] sm:$0xff] }
 0x1a5   :  { %v2737_v11 = vadd.f32 %v5193_v4, %v2427_v31  ;;  %v2128_v37 = vmul.f32 %v3347_v49, %v7385_v15  ;;  %v2123_v57 = vmul.f32 %v3349_v1, %v7386_v24  ;;  %3036 = vst [vmem:[#allocation7 + $0xb8] sm:$0xff] %v2742_v18  ;;  %v2436_v36 = vmul.f32 %v5191_v54, %v2126_v28  ;;  %v5436_v15 = vpop.xlane.xlu1 %1496 }
 0x1a6   :  { %v2738_v60 = vadd.f32 %v5197_v52, %v2428_v23  ;;  %v2437_v44 = vmul.f32 %v5195_v55, %v2127_v0  ;;  %v2124_v58 = vmul.f32 %v3349_v1, %v7387_v61  ;;  %v2739_v53 = vadd.f32 %v5217_v48, %v2429_v26  ;;  %v5442_v24 = vpop.xlane.xlu0 %1492 }
 0x1a7   :  { %3031 = vst [vmem:[#allocation7 + $0x90] sm:$0xff] %v2737_v11  ;;  %v2438_v39 = vmul.f32 %v5208_v62, %v2128_v37  ;;  %v2125_v31 = vmul.f32 %v3349_v1, %v7388_v33  ;;  %v2433_v49 = vmul.f32 %v5191_v54, %v2123_v57  ;;  %v2746_v18 = vadd.f32 %v5193_v4, %v2436_v36  ;;  %v7390_v33 = vld [vmem:[#allocation260_spill] sm:$0xff] }
 0x1a8   :  { %3032 = vst [vmem:[#allocation7 + $0x98] sm:$0xff] %v2738_v60  ;;  %v2747_v23 = vadd.f32 %v5197_v52, %v2437_v44  ;;  %v2434_v28 = vmul.f32 %v5195_v55, %v2124_v58  ;;  %v1911_v0 = vadd.f32 1e-06, %v5364_v43  ;;  %3033 = vst [vmem:[#allocation7 + $0xa0] sm:$0xff] %v2739_v53  ;;  %v1910_v37 = vadd.f32 1e-06, %v5366_v10 }
 0x1a9   :  { %v2748_v26 = vadd.f32 %v5217_v48, %v2438_v39  ;;  %v2435_v1 = vmul.f32 %v5208_v62, %v2125_v31  ;;  %v2743_v11 = vadd.f32 %v5193_v4, %v2433_v49  ;;  %3040 = vst [vmem:[#allocation7 + $0xd8] sm:$0xff] %v2746_v18  ;;  %v1815_v60 = vmul.f32 0.0026041667, %v5354_v27  ;;  %v5456_v61 = vpop.xlane.xlu1 %1504  ;;  %v7391_v18 = vld [vmem:[#allocation261_spill] sm:$0xff] }
 0x1aa   :  { %3041 = vst [vmem:[#allocation7 + $0xe0] sm:$0xff] %v2747_v23  ;;  %v2744_v57 = vadd.f32 %v5197_v52, %v2434_v28  ;;  %3350 = vrsqrt.f32 %v1911_v0  ;;  %v1814_v43 = vmul.f32 0.0026041667, %v5360_v5  ;;  %v1743_v44 = vadd.f32 %v5322_v30, %v5316_v56  ;;  %v5461_v39 = vpop.xlane.xlu0 %1500  ;;  %v7389_v30 = vld [vmem:[#allocation259_spill] sm:$0xff] }
 0x1ab   :  { %3042 = vst [vmem:[#allocation7 + $0xe8] sm:$0xff] %v2748_v26  ;;  %v2745_v36 = vadd.f32 %v5217_v48, %v2435_v1  ;;  %3037 = vst [vmem:[#allocation7 + $0xc0] sm:$0xff] %v2743_v11  ;;  %3352 = vrsqrt.f32 %v1910_v37  ;;  %v1739_v10 = vadd.f32 %v5328_v47, %v5326_v46  ;;  %v1913_v58 = vadd.f32 1e-06, %v1815_v60 }
 0x1ac   :  { %3038 = vst [vmem:[#allocation7 + $0xc8] sm:$0xff] %v2744_v57  ;;  %v1912_v53 = vadd.f32 1e-06, %v1814_v43  ;;  %v1817_v27 = vmul.f32 0.0026041667, %v5376_v50  ;;  %v1372_v5 = vmul.f32 %v5103_v13, %v5103_v13  ;;  %1744 = vadd.xlane.f32.xlu1 %v1743_v44  ;;  %v1373_v46 = vmul.f32 %v7389_v30, %v7389_v30  ;;  %v7392_v44 = vld [vmem:[#allocation264_spill] sm:$0xff] }
 0x1ad   :  { %3039 = vst [vmem:[#allocation7 + $0xd0] sm:$0xff] %v2745_v36  ;;  %1740 = vadd.xlane.f32.xlu0 %v1739_v10  ;;  %v1816_v56 = vmul.f32 0.0026041667, %v5382_v8  ;;  %v1368_v47 = vmul.f32 %v5108_v20, %v5108_v20  ;;  %v1369_v31 = vmul.f32 %v7390_v33, %v7390_v33  ;;  %3354 = vrsqrt.f32 %v1913_v58  ;;  %v5477_v37 = vpop.xlane.xlu1 %1512  ;;  %v7393_v10 = vld [vmem:[#allocation265_spill] sm:$0xff] }
 0x1ae   :  { %v1915_v50 = vadd.f32 1e-06, %v1817_v27  ;;  %v1750_v49 = vadd.f32 %v1372_v5, %v5332_v32  ;;  %v1370_v23 = vmul.f32 %v7391_v18, %v7391_v18  ;;  %3356 = vrsqrt.f32 %v1912_v53  ;;  %v5481_v43 = vpop.xlane.xlu0 %1508  ;;  %v7394_v27 = vld [vmem:[#allocation266_spill] sm:$0xff] }
 0x1af   :  { %v1914_v28 = vadd.f32 1e-06, %v1816_v56  ;;  %v1746_v0 = vadd.f32 %v1369_v31, %v1368_v47  ;;  %v1819_v8 = vmul.f32 0.0026041667, %v5396_v63  ;;  %v1818_v1 = vmul.f32 0.0026041667, %v5402_v16 }
 0x1b0   :  { %3358 = vrsqrt.f32 %v1915_v50  ;;  %v1751_v26 = vadd.f32 %v1750_v49, %v1373_v46  ;;  %v1377_v11 = vmul.f32 %v5127_v2, %v5127_v2  ;;  %v1378_v60 = vmul.f32 %v5129_v51, %v5129_v51 }
 0x1b1   :  { %3360 = vrsqrt.f32 %v1914_v28  ;;  %v1747_v57 = vadd.f32 %v1746_v0, %v1370_v23  ;;  %v1917_v32 = vadd.f32 1e-06, %v1819_v8  ;;  %v1916_v36 = vadd.f32 1e-06, %v1818_v1  ;;  %v7395_v23 = vld [vmem:[#allocation268_spill] sm:$0xff]  ;;  %v7396_v0 = vld [vmem:[#allocation269_spill] sm:$0xff] }
 0x1b2   :  { %1752 = vadd.xlane.f32.xlu1 %v1751_v26  ;;  %v1379_v63 = vmul.f32 %v5131_v42, %v5131_v42  ;;  %v1374_v16 = vmul.f32 %v7392_v44, %v7392_v44  ;;  %v1375_v58 = vmul.f32 %v7393_v10, %v7393_v10  ;;  %v1758_v53 = vadd.f32 %v1378_v60, %v1377_v11  ;;  %v7397_v60 = vld [vmem:[#allocation272_spill] sm:$0xff]  ;;  %v7410_v10 = vld [vmem:[#allocation53_spill] sm:$0xff] }
 0x1b3   :  { %1748 = vadd.xlane.f32.xlu0 %v1747_v57  ;;  %3362 = vrsqrt.f32 %v1917_v32  ;;  %v1376_v5 = vmul.f32 %v7394_v27, %v7394_v27  ;;  %v1821_v56 = vmul.f32 0.0026041667, %v5416_v14  ;;  %v1820_v47 = vmul.f32 0.0026041667, %v5422_v35  ;;  %v5503_v35 = vpop.xlane.xlu1 %1520  ;;  %v7408_v27 = vld [vmem:[#allocation51_spill] sm:$0xff] }
 0x1b4   :  { %3364 = vrsqrt.f32 %v1916_v36  ;;  %v1754_v46 = vadd.f32 %v1375_v58, %v1374_v16  ;;  %v1383_v31 = vmul.f32 %v5153_v7, %v5153_v7  ;;  %v1759_v50 = vadd.f32 %v1758_v53, %v1379_v63  ;;  %v5510_v16 = vpop.xlane.xlu0 %1516  ;;  %v7398_v53 = vld [vmem:[#allocation41_spill] sm:$0xff] }
 0x1b5   :  { %v1919_v49 = vadd.f32 1e-06, %v1821_v56  ;;  %v1384_v28 = vmul.f32 %v7395_v23, %v7395_v23  ;;  %v1385_v8 = vmul.f32 %v7396_v0, %v7396_v0  ;;  %v1918_v1 = vadd.f32 1e-06, %v1820_v47  ;;  %v7399_v56 = vld [vmem:[#allocation42_spill] sm:$0xff]  ;;  %v7400_v47 = vld [vmem:[#allocation43_spill] sm:$0xff] }
 0x1b6   :  { %v1755_v26 = vadd.f32 %v1754_v46, %v1376_v5  ;;  %v1380_v14 = vmul.f32 %v5162_v59, %v5162_v59  ;;  %v1381_v11 = vmul.f32 %v5164_v34, %v5164_v34  ;;  %1760 = vadd.xlane.f32.xlu1 %v1759_v50  ;;  %v5507_v36 = vmul.f32 %v7397_v60, %v7397_v60  ;;  %v7401_v50 = vld [vmem:[#allocation44_spill] sm:$0xff]  ;;  %v7403_v59 = vld [vmem:[#allocation46_spill] sm:$0xff] }
 0x1b7   :  { %v3351_v57 = vpop.eup %3350  ;;  %3366 = vrsqrt.f32 %v1919_v49  ;;  %v1766_v32 = vadd.f32 %v1384_v28, %v1383_v31  ;;  %v1823_v63 = vmul.f32 0.0026041667, %v5436_v15  ;;  %v7402_v31 = vld [vmem:[#allocation45_spill] sm:$0xff] }
 0x1b8   :  { %v3353_v58 = vpop.eup %3352  ;;  %v2132_v5 = vmul.f32 %v3351_v57, %v7398_v53  ;;  %v2133_v46 = vmul.f32 %v3351_v57, %v7399_v56  ;;  %v2134_v34 = vmul.f32 %v3351_v57, %v7400_v47  ;;  %1756 = vadd.xlane.f32.xlu0 %v1755_v26  ;;  %3368 = vrsqrt.f32 %v1918_v1 }
 0x1b9   :  { %v2129_v49 = vmul.f32 %v3353_v58, %v7401_v50  ;;  %v2130_v28 = vmul.f32 %v3353_v58, %v7402_v31  ;;  %v2131_v60 = vmul.f32 %v3353_v58, %v7403_v59  ;;  %v1767_v0 = vadd.f32 %v1766_v32, %v1385_v8 }
 0x1ba   :  { %v2442_v15 = vmul.f32 %v5191_v54, %v2132_v5  ;;  %v2443_v23 = vmul.f32 %v5195_v55, %v2133_v46  ;;  %v2444_v7 = vmul.f32 %v5208_v62, %v2134_v34  ;;  %v5521_v53 = vadd.f32 %v1381_v11, %v1380_v14  ;;  %v3355_v56 = vpop.eup %3354  ;;  %v7404_v34 = vld [vmem:[#allocation47_spill] sm:$0xff]  ;;  %v5532_v11 = vpop.xlane.xlu1 %1528 }
 0x1bb   :  { %v2439_v57 = vmul.f32 %v5191_v54, %v2129_v49  ;;  %v2440_v26 = vmul.f32 %v5195_v55, %v2130_v28  ;;  %v2441_v1 = vmul.f32 %v5208_v62, %v2131_v60  ;;  %1768 = vadd.xlane.f32.xlu1 %v1767_v0  ;;  %v5526_v47 = vadd.f32 1e-06, %v1823_v63  ;;  %v3357_v59 = vpop.eup %3356  ;;  %v7405_v60 = vld [vmem:[#allocation48_spill] sm:$0xff]  ;;  %v5538_v49 = vpop.xlane.xlu0 %1524 }
 0x1bc   :  { %v2752_v8 = vadd.f32 %v5193_v4, %v2442_v15  ;;  %v2753_v32 = vadd.f32 %v5197_v52, %v2443_v23  ;;  %v2754_v58 = vadd.f32 %v5217_v48, %v2444_v7  ;;  %v2138_v14 = vmul.f32 %v3355_v56, %v7404_v34  ;;  %v7406_v7 = vld [vmem:[#allocation49_spill] sm:$0xff]  ;;  %v7407_v15 = vld [vmem:[#allocation50_spill] sm:$0xff] }
 0x1bd   :  { %v3359_v5 = vpop.eup %3358  ;;  %v2749_v46 = vadd.f32 %v5193_v4, %v2439_v57  ;;  %v2750_v50 = vadd.f32 %v5197_v52, %v2440_v26  ;;  %v2751_v0 = vadd.f32 %v5217_v48, %v2441_v1  ;;  %v2139_v63 = vmul.f32 %v3355_v56, %v7405_v60  ;;  %v7409_v1 = vld [vmem:[#allocation52_spill] sm:$0xff] }
 0x1be   :  { %v3361_v31 = vpop.eup %3360  ;;  %3046 = vst [vmem:[#allocation7 + $0x108] sm:$0xff] %v2752_v8  ;;  %3047 = vst [vmem:[#allocation7 + $0x110] sm:$0xff] %v2753_v32  ;;  %v2140_v23 = vmul.f32 %v3355_v56, %v7406_v7  ;;  %v2448_v28 = vmul.f32 %v5191_v54, %v2138_v14  ;;  %v2135_v34 = vmul.f32 %v3357_v59, %v7407_v15  ;;  %v7411_v8 = vld [vmem:[#allocation54_spill] sm:$0xff]  ;;  %3370 = vrsqrt.f32 %v5526_v47 }
 0x1bf   :  { %3048 = vst [vmem:[#allocation7 + $0x118] sm:$0xff] %v2754_v58  ;;  %v2136_v57 = vmul.f32 %v3357_v59, %v7408_v27  ;;  %3043 = vst [vmem:[#allocation7 + $0xf0] sm:$0xff] %v2749_v46  ;;  %v2449_v26 = vmul.f32 %v5195_v55, %v2139_v63  ;;  %v2137_v60 = vmul.f32 %v3357_v59, %v7409_v1  ;;  %v7412_v63 = vld [vmem:[#allocation55_spill] sm:$0xff]  ;;  %v5560_v1 = vpop.xlane.xlu1 %1536  ;;  %v7429_v47 = vld [vmem:[#allocation274_spill] sm:$0xff] }
 0x1c0   :  { %3044 = vst [vmem:[#allocation7 + $0xf8] sm:$0xff] %v2750_v50  ;;  %3045 = vst [vmem:[#allocation7 + $0x100] sm:$0xff] %v2751_v0  ;;  %v2144_v44 = vmul.f32 %v3359_v5, %v7410_v10  ;;  %v2145_v32 = vmul.f32 %v3359_v5, %v7411_v8  ;;  %v3363_v58 = vpop.eup %3362  ;;  %v2450_v56 = vmul.f32 %v5208_v62, %v2140_v23  ;;  %v5566_v8 = vpop.xlane.xlu0 %1532 }
 0x1c1   :  { %v2758_v14 = vadd.f32 %v5193_v4, %v2448_v28  ;;  %v2445_v7 = vmul.f32 %v5191_v54, %v2135_v34  ;;  %v2446_v27 = vmul.f32 %v5195_v55, %v2136_v57  ;;  %v3365_v46 = vpop.eup %3364  ;;  %v2759_v50 = vadd.f32 %v5197_v52, %v2449_v26 }
 0x1c2   :  { %v2447_v0 = vmul.f32 %v5208_v62, %v2137_v60  ;;  %v2146_v59 = vmul.f32 %v3359_v5, %v7412_v63  ;;  %v2454_v10 = vmul.f32 %v5191_v54, %v2144_v44  ;;  %v2760_v15 = vadd.f32 %v5217_v48, %v2450_v56  ;;  %v7413_v60 = vld [vmem:[#allocation56_spill] sm:$0xff]  ;;  %v7416_v63 = vld [vmem:[#allocation59_spill] sm:$0xff] }
 0x1c3   :  { %3052 = vst [vmem:[#allocation7 + $0x138] sm:$0xff] %v2758_v14  ;;  %v2755_v23 = vadd.f32 %v5193_v4, %v2445_v7  ;;  %v2756_v28 = vadd.f32 %v5197_v52, %v2446_v27  ;;  %v2455_v34 = vmul.f32 %v5195_v55, %v2145_v32  ;;  %3053 = vst [vmem:[#allocation7 + $0x140] sm:$0xff] %v2759_v50  ;;  %v7414_v32 = vld [vmem:[#allocation57_spill] sm:$0xff]  ;;  %v7415_v27 = vld [vmem:[#allocation58_spill] sm:$0xff] }
 0x1c4   :  { %v2757_v57 = vadd.f32 %v5217_v48, %v2447_v0  ;;  %v2456_v26 = vmul.f32 %v5208_v62, %v2146_v59  ;;  %v2764_v5 = vadd.f32 %v5193_v4, %v2454_v10  ;;  %v2141_v44 = vmul.f32 %v3361_v31, %v7413_v60  ;;  %v3367_v56 = vpop.eup %3366  ;;  %3054 = vst [vmem:[#allocation7 + $0x148] sm:$0xff] %v2760_v15  ;;  %v7417_v60 = vld [vmem:[#allocation60_spill] sm:$0xff]  ;;  %v7418_v15 = vld [vmem:[#allocation61_spill] sm:$0xff] }
 0x1c5   :  { %3049 = vst [vmem:[#allocation7 + $0x120] sm:$0xff] %v2755_v23  ;;  %3050 = vst [vmem:[#allocation7 + $0x128] sm:$0xff] %v2756_v28  ;;  %v2765_v14 = vadd.f32 %v5197_v52, %v2455_v34  ;;  %v2142_v7 = vmul.f32 %v3361_v31, %v7414_v32  ;;  %v2143_v50 = vmul.f32 %v3361_v31, %v7415_v27  ;;  %v3369_v42 = vpop.eup %3368  ;;  %v7419_v32 = vld [vmem:[#allocation62_spill] sm:$0xff] }
 0x1c6   :  { %v2150_v0 = vmul.f32 %v3363_v58, %v7416_v63  ;;  %3051 = vst [vmem:[#allocation7 + $0x130] sm:$0xff] %v2757_v57  ;;  %v2766_v59 = vadd.f32 %v5217_v48, %v2456_v26  ;;  %3058 = vst [vmem:[#allocation7 + $0x168] sm:$0xff] %v2764_v5  ;;  %v2451_v10 = vmul.f32 %v5191_v54, %v2141_v44  ;;  %v7420_v44 = vld [vmem:[#allocation63_spill] sm:$0xff] }
 0x1c7   :  { %v2151_v51 = vmul.f32 %v3363_v58, %v7417_v60  ;;  %v2152_v23 = vmul.f32 %v3363_v58, %v7418_v15  ;;  %3059 = vst [vmem:[#allocation7 + $0x170] sm:$0xff] %v2765_v14  ;;  %v2452_v28 = vmul.f32 %v5195_v55, %v2142_v7  ;;  %v2453_v34 = vmul.f32 %v5208_v62, %v2143_v50  ;;  %v7421_v50 = vld [vmem:[#allocation64_spill] sm:$0xff] }
 0x1c8   :  { %v2460_v31 = vmul.f32 %v5191_v54, %v2150_v0  ;;  %v2147_v27 = vmul.f32 %v3365_v46, %v7419_v32  ;;  %3060 = vst [vmem:[#allocation7 + $0x178] sm:$0xff] %v2766_v59  ;;  %v2761_v57 = vadd.f32 %v5193_v4, %v2451_v10  ;;  %v2148_v63 = vmul.f32 %v3365_v46, %v7420_v44  ;;  %v5588_v0 = vpop.xlane.xlu1 %1544 }
 0x1c9   :  { %v2461_v26 = vmul.f32 %v5195_v55, %v2151_v51  ;;  %v2462_v5 = vmul.f32 %v5208_v62, %v2152_v23  ;;  %v2762_v58 = vadd.f32 %v5197_v52, %v2452_v28  ;;  %v2763_v14 = vadd.f32 %v5217_v48, %v2453_v34  ;;  %v5594_v23 = vpop.xlane.xlu0 %1540  ;;  %v7422_v34 = vld [vmem:[#allocation65_spill] sm:$0xff] }
 0x1ca   :  { %v2770_v7 = vadd.f32 %v5193_v4, %v2460_v31  ;;  %v2149_v60 = vmul.f32 %v3365_v46, %v7421_v50  ;;  %3055 = vst [vmem:[#allocation7 + $0x150] sm:$0xff] %v2761_v57  ;;  %v2457_v51 = vmul.f32 %v5191_v54, %v2147_v27  ;;  %v2458_v15 = vmul.f32 %v5195_v55, %v2148_v63  ;;  %v7423_v31 = vld [vmem:[#allocation66_spill] sm:$0xff]  ;;  %v7424_v57 = vld [vmem:[#allocation67_spill] sm:$0xff]  ;;  %v7426_v50 = vld [vmem:[#allocation69_spill] sm:$0xff] }
 0x1cb   :  { %v2771_v59 = vadd.f32 %v5197_v52, %v2461_v26  ;;  %v2772_v10 = vadd.f32 %v5217_v48, %v2462_v5  ;;  %3056 = vst [vmem:[#allocation7 + $0x158] sm:$0xff] %v2762_v58  ;;  %3057 = vst [vmem:[#allocation7 + $0x160] sm:$0xff] %v2763_v14  ;;  %v2156_v46 = vmul.f32 %v3367_v56, %v7422_v34  ;;  %v7425_v5 = vld [vmem:[#allocation68_spill] sm:$0xff] }
 0x1cc   :  { %3064 = vst [vmem:[#allocation7 + $0x198] sm:$0xff] %v2770_v7  ;;  %v2459_v28 = vmul.f32 %v5208_v62, %v2149_v60  ;;  %v2157_v32 = vmul.f32 %v3367_v56, %v7423_v31  ;;  %v2158_v44 = vmul.f32 %v3367_v56, %v7424_v57  ;;  %v2767_v26 = vadd.f32 %v5193_v4, %v2457_v51  ;;  %v7427_v56 = vld [vmem:[#allocation70_spill] sm:$0xff] }
 0x1cd   :  { %3065 = vst [vmem:[#allocation7 + $0x1a0] sm:$0xff] %v2771_v59  ;;  %3066 = vst [vmem:[#allocation7 + $0x1a8] sm:$0xff] %v2772_v10  ;;  %v2768_v27 = vadd.f32 %v5197_v52, %v2458_v15  ;;  %v2153_v63 = vmul.f32 %v3369_v42, %v7425_v5  ;;  %v2154_v58 = vmul.f32 %v3369_v42, %v7426_v50 }
 0x1ce   :  { %v2769_v14 = vadd.f32 %v5217_v48, %v2459_v28  ;;  %v2466_v7 = vmul.f32 %v5191_v54, %v2156_v46  ;;  %v2467_v60 = vmul.f32 %v5195_v55, %v2157_v32  ;;  %v2468_v34 = vmul.f32 %v5208_v62, %v2158_v44  ;;  %3061 = vst [vmem:[#allocation7 + $0x180] sm:$0xff] %v2767_v26  ;;  %v5617_v32 = vpop.xlane.xlu1 %1552  ;;  %v7428_v26 = vld [vmem:[#allocation273_spill] sm:$0xff] }
 0x1cf   :  { %3062 = vst [vmem:[#allocation7 + $0x188] sm:$0xff] %v2768_v27  ;;  %v2155_v59 = vmul.f32 %v3369_v42, %v7427_v56  ;;  %v2463_v10 = vmul.f32 %v5191_v54, %v2153_v63  ;;  %v2464_v51 = vmul.f32 %v5195_v55, %v2154_v58  ;;  %v1763_v15 = vadd.f32 %v5521_v53, %v5507_v36  ;;  %v5623_v53 = vpop.xlane.xlu0 %1548  ;;  %v7430_v63 = vld [vmem:[#allocation275_spill] sm:$0xff]  ;;  %v7431_v58 = vld [vmem:[#allocation276_spill] sm:$0xff]  ;;  %v7433_v56 = vld [vmem:[#allocation278_spill] sm:$0xff] }
 0x1d0   :  { %3063 = vst [vmem:[#allocation7 + $0x190] sm:$0xff] %v2769_v14  ;;  %v2776_v28 = vadd.f32 %v5193_v4, %v2466_v7  ;;  %v2777_v46 = vadd.f32 %v5197_v52, %v2467_v60  ;;  %v2778_v31 = vadd.f32 %v5217_v48, %v2468_v34  ;;  %v1822_v36 = vmul.f32 0.0026041667, %v5442_v24  ;;  %v7432_v60 = vld [vmem:[#allocation277_spill] sm:$0xff] }
 0x1d1   :  { %v2465_v42 = vmul.f32 %v5208_v62, %v2155_v59  ;;  %v2773_v57 = vadd.f32 %v5193_v4, %v2463_v10  ;;  %v2774_v44 = vadd.f32 %v5197_v52, %v2464_v51  ;;  %1764 = vadd.xlane.f32.xlu0 %v1763_v15  ;;  %v1389_v27 = vmul.f32 %v7428_v26, %v7428_v26 }
 0x1d2   :  { %3070 = vst [vmem:[#allocation7 + $0x1c8] sm:$0xff] %v2776_v28  ;;  %3071 = vst [vmem:[#allocation7 + $0x1d0] sm:$0xff] %v2777_v46  ;;  %v1390_v5 = vmul.f32 %v7429_v47, %v7429_v47  ;;  %v1391_v50 = vmul.f32 %v7430_v63, %v7430_v63  ;;  %v1386_v14 = vmul.f32 %v7431_v58, %v7431_v58  ;;  %v1920_v24 = vadd.f32 1e-06, %v1822_v36 }
 0x1d3   :  { %3072 = vst [vmem:[#allocation7 + $0x1d8] sm:$0xff] %v2778_v31  ;;  %v2775_v7 = vadd.f32 %v5217_v48, %v2465_v42  ;;  %3067 = vst [vmem:[#allocation7 + $0x1b0] sm:$0xff] %v2773_v57  ;;  %v1387_v34 = vmul.f32 %v7432_v60, %v7432_v60  ;;  %v1388_v59 = vmul.f32 %v7433_v56, %v7433_v56  ;;  %v1825_v51 = vmul.f32 0.0026041667, %v5456_v61  ;;  %v7434_v31 = vld [vmem:[#allocation280_spill] sm:$0xff]  ;;  %v7435_v57 = vld [vmem:[#allocation281_spill] sm:$0xff] }
 0x1d4   :  { %3068 = vst [vmem:[#allocation7 + $0x1b8] sm:$0xff] %v2774_v44  ;;  %v1774_v10 = vadd.f32 %v1390_v5, %v1389_v27  ;;  %v1824_v15 = vmul.f32 0.0026041667, %v5461_v39  ;;  %v1395_v28 = vmul.f32 %v5201_v40, %v5201_v40  ;;  %3372 = vrsqrt.f32 %v1920_v24  ;;  %v7436_v27 = vld [vmem:[#allocation282_spill] sm:$0xff]  ;;  %v5648_v5 = vpop.xlane.xlu1 %1560  ;;  %v7437_v40 = vld [vmem:[#allocation283_spill] sm:$0xff] }
 0x1d5   :  { %3069 = vst [vmem:[#allocation7 + $0x1c0] sm:$0xff] %v2775_v7  ;;  %v1770_v46 = vadd.f32 %v1387_v34, %v1386_v14  ;;  %v1396_v42 = vmul.f32 %v7434_v31, %v7434_v31  ;;  %v1397_v44 = vmul.f32 %v7435_v57, %v7435_v57  ;;  %v1923_v60 = vadd.f32 1e-06, %v1825_v51  ;;  %v7438_v14 = vld [vmem:[#allocation284_spill] sm:$0xff]  ;;  %v5654_v34 = vpop.xlane.xlu0 %1556  ;;  %v7439_v51 = vld [vmem:[#allocation285_spill] sm:$0xff] }
 0x1d6   :  { %v1775_v36 = vadd.f32 %v1774_v10, %v1391_v50  ;;  %v1922_v56 = vadd.f32 1e-06, %v1824_v15  ;;  %v1392_v61 = vmul.f32 %v7436_v27, %v7436_v27  ;;  %v1393_v7 = vmul.f32 %v7437_v40, %v7437_v40 }
 0x1d7   :  { %v1771_v39 = vadd.f32 %v1770_v46, %v1388_v59  ;;  %v1782_v58 = vadd.f32 %v1396_v42, %v1395_v28  ;;  %v1394_v24 = vmul.f32 %v7438_v14, %v7438_v14  ;;  %3374 = vrsqrt.f32 %v1923_v60  ;;  %v7440_v46 = vld [vmem:[#allocation286_spill] sm:$0xff] }
 0x1d8   :  { %1776 = vadd.xlane.f32.xlu1 %v1775_v36  ;;  %v1827_v50 = vmul.f32 0.0026041667, %v5477_v37  ;;  %v1826_v10 = vmul.f32 0.0026041667, %v5481_v43  ;;  %v1401_v15 = vmul.f32 %v7439_v51, %v7439_v51  ;;  %3376 = vrsqrt.f32 %v1922_v56 }
 0x1d9   :  { %1772 = vadd.xlane.f32.xlu0 %v1771_v39  ;;  %v1783_v59 = vadd.f32 %v1782_v58, %v1397_v44  ;;  %v1778_v28 = vadd.f32 %v1393_v7, %v1392_v61  ;;  %v1402_v42 = vmul.f32 %v7440_v46, %v7440_v46  ;;  %v1403_v36 = vmul.f32 %v5233_v41, %v5233_v41  ;;  %v7441_v61 = vld [vmem:[#allocation291_spill] sm:$0xff]  ;;  %v5674_v7 = vpop.xlane.xlu1 %1568 }
 0x1da   :  { %v1925_v40 = vadd.f32 1e-06, %v1827_v50  ;;  %v1924_v14 = vadd.f32 1e-06, %v1826_v10  ;;  %v1398_v37 = vmul.f32 %v5236_v21, %v5236_v21  ;;  %v1399_v51 = vmul.f32 %v5238_v25, %v5238_v25  ;;  %v3371_v50 = vpop.eup %3370 }
 0x1db   :  { %v1779_v60 = vadd.f32 %v1778_v28, %v1394_v24  ;;  %v1790_v43 = vadd.f32 %v1402_v42, %v1401_v15  ;;  %v1400_v58 = vmul.f32 %v5240_v19, %v5240_v19  ;;  %v1829_v56 = vmul.f32 0.0026041667, %v5503_v35  ;;  %v7442_v15 = vld [vmem:[#allocation292_spill] sm:$0xff]  ;;  %v5678_v42 = vpop.xlane.xlu0 %1564 }
 0x1dc   :  { %1784 = vadd.xlane.f32.xlu1 %v1783_v59  ;;  %3378 = vrsqrt.f32 %v1925_v40  ;;  %v1828_v44 = vmul.f32 0.0026041667, %v5510_v16  ;;  %v1407_v39 = vmul.f32 %v7441_v61, %v7441_v61  ;;  %v1786_v10 = vadd.f32 %v1399_v51, %v1398_v37  ;;  %v7443_v40 = vld [vmem:[#allocation71_spill] sm:$0xff]  ;;  %v7444_v35 = vld [vmem:[#allocation72_spill] sm:$0xff]  ;;  %v7445_v16 = vld [vmem:[#allocation73_spill] sm:$0xff] }
 0x1dd   :  { %1780 = vadd.xlane.f32.xlu0 %v1779_v60  ;;  %3380 = vrsqrt.f32 %v1924_v14  ;;  %v1791_v24 = vadd.f32 %v1790_v43, %v1403_v36  ;;  %v1408_v28 = vmul.f32 %v7442_v15, %v7442_v15  ;;  %v2162_v59 = vmul.f32 %v3371_v50, %v7443_v40  ;;  %v7449_v40 = vld [vmem:[#allocation76_spill] sm:$0xff] }
 0x1de   :  { %v2163_v19 = vmul.f32 %v3371_v50, %v7444_v35  ;;  %v2164_v25 = vmul.f32 %v3371_v50, %v7445_v16  ;;  %v1927_v21 = vadd.f32 1e-06, %v1829_v56  ;;  %v1787_v61 = vadd.f32 %v1786_v10, %v1400_v58  ;;  %v7446_v10 = vld [vmem:[#allocation296_spill] sm:$0xff] }
 0x1df   :  { %v1926_v41 = vadd.f32 1e-06, %v1828_v44  ;;  %v1409_v60 = vmul.f32 %v5257_v45, %v5257_v45  ;;  %v1798_v14 = vadd.f32 %v1408_v28, %v1407_v39  ;;  %v2472_v51 = vmul.f32 %v5191_v54, %v2162_v59  ;;  %v5702_v16 = vpop.xlane.xlu0 %1572 }
 0x1e0   :  { %v2473_v36 = vmul.f32 %v5195_v55, %v2163_v19  ;;  %v2474_v37 = vmul.f32 %v5208_v62, %v2164_v25  ;;  %1792 = vadd.xlane.f32.xlu1 %v1791_v24  ;;  %3382 = vrsqrt.f32 %v1927_v21  ;;  %v1404_v56 = vmul.f32 %v5260_v9, %v5260_v9  ;;  %v5697_v21 = vpop.xlane.xlu1 %1576  ;;  %v7448_v24 = vld [vmem:[#allocation75_spill] sm:$0xff] }
 0x1e1   :  { %1788 = vadd.xlane.f32.xlu0 %v1787_v61  ;;  %3384 = vrsqrt.f32 %v1926_v41  ;;  %v1799_v43 = vadd.f32 %v1798_v14, %v1409_v60  ;;  %v1405_v58 = vmul.f32 %v5262_v22, %v5262_v22  ;;  %v3373_v44 = vpop.eup %3372  ;;  %v2782_v39 = vadd.f32 %v5193_v4, %v2472_v51  ;;  %v7447_v41 = vld [vmem:[#allocation74_spill] sm:$0xff] }
 0x1e2   :  { %v2783_v50 = vadd.f32 %v5197_v52, %v2473_v36  ;;  %v2784_v19 = vadd.f32 %v5217_v48, %v2474_v37  ;;  %v1406_v25 = vmul.f32 %v7446_v10, %v7446_v10  ;;  %v2159_v61 = vmul.f32 %v3373_v44, %v7447_v41 }
 0x1e3   :  { %v2160_v28 = vmul.f32 %v3373_v44, %v7448_v24  ;;  %v2161_v59 = vmul.f32 %v3373_v44, %v7449_v40  ;;  %v1794_v35 = vadd.f32 %v1405_v58, %v1404_v56  ;;  %3076 = vst [vmem:[#allocation7 + $0x1f8] sm:$0xff] %v2782_v39  ;;  %v1831_v60 = vmul.f32 0.0026041667, %v5532_v11  ;;  %v7450_v39 = vld [vmem:[#allocation77_spill] sm:$0xff]  ;;  %v7452_v24 = vld [vmem:[#allocation79_spill] sm:$0xff] }
 0x1e4   :  { %3077 = vst [vmem:[#allocation7 + $0x200] sm:$0xff] %v2783_v50  ;;  %3078 = vst [vmem:[#allocation7 + $0x208] sm:$0xff] %v2784_v19  ;;  %1800 = vadd.xlane.f32.xlu1 %v1799_v43  ;;  %v1830_v14 = vmul.f32 0.0026041667, %v5538_v49  ;;  %v5707_v51 = vmul.f32 0.0026041667, %v5560_v1  ;;  %v3375_v36 = vpop.eup %3374  ;;  %v2469_v37 = vmul.f32 %v5191_v54, %v2159_v61 }
 0x1e5   :  { %v2470_v41 = vmul.f32 %v5195_v55, %v2160_v28  ;;  %v2471_v56 = vmul.f32 %v5208_v62, %v2161_v59  ;;  %v1795_v58 = vadd.f32 %v1794_v35, %v1406_v25  ;;  %v3377_v44 = vpop.eup %3376  ;;  %v2168_v50 = vmul.f32 %v3375_v36, %v7450_v39  ;;  %v7451_v19 = vld [vmem:[#allocation78_spill] sm:$0xff]  ;;  %v7453_v61 = vld [vmem:[#allocation80_spill] sm:$0xff]  ;;  %v7454_v35 = vld [vmem:[#allocation81_spill] sm:$0xff] }
 0x1e6   :  { %v2169_v43 = vmul.f32 %v3375_v36, %v7451_v19  ;;  %v2170_v11 = vmul.f32 %v3375_v36, %v7452_v24  ;;  %v1929_v40 = vadd.f32 1e-06, %v1831_v60  ;;  %v2779_v49 = vadd.f32 %v5193_v4, %v2469_v37  ;;  %v5723_v19 = vpop.xlane.xlu1 %1584  ;;  %v7455_v36 = vld [vmem:[#allocation82_spill] sm:$0xff] }
 0x1e7   :  { %v2780_v1 = vadd.f32 %v5197_v52, %v2470_v41  ;;  %v2781_v10 = vadd.f32 %v5217_v48, %v2471_v56  ;;  %v2165_v22 = vmul.f32 %v3377_v44, %v7453_v61  ;;  %1796 = vadd.xlane.f32.xlu0 %v1795_v58  ;;  %v2478_v28 = vmul.f32 %v5191_v54, %v2168_v50  ;;  %v5727_v58 = vpop.xlane.xlu0 %1580 }
 0x1e8   :  { %v2479_v25 = vmul.f32 %v5195_v55, %v2169_v43  ;;  %v2480_v59 = vmul.f32 %v5208_v62, %v2170_v11  ;;  %v2166_v39 = vmul.f32 %v3377_v44, %v7454_v35  ;;  %3073 = vst [vmem:[#allocation7 + $0x1e0] sm:$0xff] %v2779_v49  ;;  %v2167_v37 = vmul.f32 %v3377_v44, %v7455_v36  ;;  %v7456_v44 = vld [vmem:[#allocation83_spill] sm:$0xff] }
 0x1e9   :  { %v3379_v60 = vpop.eup %3378  ;;  %3074 = vst [vmem:[#allocation7 + $0x1e8] sm:$0xff] %v2780_v1  ;;  %3075 = vst [vmem:[#allocation7 + $0x1f0] sm:$0xff] %v2781_v10  ;;  %v2475_v41 = vmul.f32 %v5191_v54, %v2165_v22  ;;  %3386 = vrsqrt.f32 %v1929_v40  ;;  %v1928_v56 = vadd.f32 1e-06, %v1830_v14  ;;  %v2788_v43 = vadd.f32 %v5193_v4, %v2478_v28  ;;  %v7457_v22 = vld [vmem:[#allocation84_spill] sm:$0xff]  ;;  %v7458_v28 = vld [vmem:[#allocation85_spill] sm:$0xff] }
 0x1ea   :  { %v3381_v50 = vpop.eup %3380  ;;  %v2789_v24 = vadd.f32 %v5197_v52, %v2479_v25  ;;  %v2790_v11 = vadd.f32 %v5217_v48, %v2480_v59  ;;  %v2476_v61 = vmul.f32 %v5195_v55, %v2166_v39  ;;  %v2477_v49 = vmul.f32 %v5208_v62, %v2167_v37  ;;  %v7459_v25 = vld [vmem:[#allocation86_spill] sm:$0xff]  ;;  %v7460_v59 = vld [vmem:[#allocation87_spill] sm:$0xff] }
 0x1eb   :  { %v2785_v10 = vadd.f32 %v5193_v4, %v2475_v41  ;;  %v2174_v1 = vmul.f32 %v3379_v60, %v7456_v44  ;;  %v2175_v40 = vmul.f32 %v3379_v60, %v7457_v22  ;;  %3082 = vst [vmem:[#allocation7 + $0x228] sm:$0xff] %v2788_v43  ;;  %v2176_v35 = vmul.f32 %v3379_v60, %v7458_v28  ;;  %v7461_v22 = vld [vmem:[#allocation88_spill] sm:$0xff]  ;;  %v7462_v28 = vld [vmem:[#allocation89_spill] sm:$0xff] }
 0x1ec   :  { %3083 = vst [vmem:[#allocation7 + $0x230] sm:$0xff] %v2789_v24  ;;  %3084 = vst [vmem:[#allocation7 + $0x238] sm:$0xff] %v2790_v11  ;;  %v2786_v14 = vadd.f32 %v5197_v52, %v2476_v61  ;;  %v2171_v36 = vmul.f32 %v3381_v50, %v7459_v25  ;;  %v2172_v9 = vmul.f32 %v3381_v50, %v7460_v59  ;;  %v5749_v59 = vpop.xlane.xlu1 %1592  ;;  %3388 = vrsqrt.f32 %v1928_v56 }
 0x1ed   :  { %v3383_v39 = vpop.eup %3382  ;;  %v2787_v37 = vadd.f32 %v5217_v48, %v2477_v49  ;;  %3079 = vst [vmem:[#allocation7 + $0x210] sm:$0xff] %v2785_v10  ;;  %v2484_v41 = vmul.f32 %v5191_v54, %v2174_v1  ;;  %v2485_v44 = vmul.f32 %v5195_v55, %v2175_v40  ;;  %v2173_v43 = vmul.f32 %v3381_v50, %v7461_v22  ;;  %v7463_v50 = vld [vmem:[#allocation90_spill] sm:$0xff]  ;;  %v7464_v22 = vld [vmem:[#allocation91_spill] sm:$0xff] }
 0x1ee   :  { %v3385_v24 = vpop.eup %3384  ;;  %3080 = vst [vmem:[#allocation7 + $0x218] sm:$0xff] %v2786_v14  ;;  %v2486_v11 = vmul.f32 %v5208_v62, %v2176_v35  ;;  %v2481_v60 = vmul.f32 %v5191_v54, %v2171_v36  ;;  %v2482_v61 = vmul.f32 %v5195_v55, %v2172_v9  ;;  %v2180_v25 = vmul.f32 %v3383_v39, %v7462_v28  ;;  %v5755_v14 = vpop.xlane.xlu0 %1588 }
 0x1ef   :  { %3081 = vst [vmem:[#allocation7 + $0x220] sm:$0xff] %v2787_v37  ;;  %v2794_v49 = vadd.f32 %v5193_v4, %v2484_v41  ;;  %v2795_v10 = vadd.f32 %v5197_v52, %v2485_v44  ;;  %v2483_v1 = vmul.f32 %v5208_v62, %v2173_v43  ;;  %v2181_v40 = vmul.f32 %v3383_v39, %v7463_v50  ;;  %v7465_v43 = vld [vmem:[#allocation92_spill] sm:$0xff] }
 0x1f0   :  { %v2796_v35 = vadd.f32 %v5217_v48, %v2486_v11  ;;  %v2791_v36 = vadd.f32 %v5193_v4, %v2481_v60  ;;  %v2792_v9 = vadd.f32 %v5197_v52, %v2482_v61  ;;  %v2182_v28 = vmul.f32 %v3383_v39, %v7464_v22  ;;  %v7466_v60 = vld [vmem:[#allocation93_spill] sm:$0xff]  ;;  %v7467_v61 = vld [vmem:[#allocation94_spill] sm:$0xff] }
 0x1f1   :  { %3088 = vst [vmem:[#allocation7 + $0x258] sm:$0xff] %v2794_v49  ;;  %3089 = vst [vmem:[#allocation7 + $0x260] sm:$0xff] %v2795_v10  ;;  %v2793_v37 = vadd.f32 %v5217_v48, %v2483_v1  ;;  %v2490_v41 = vmul.f32 %v5191_v54, %v2180_v25  ;;  %v2491_v44 = vmul.f32 %v5195_v55, %v2181_v40  ;;  %v1931_v10 = vadd.f32 1e-06, %v5707_v51 }
 0x1f2   :  { %v2177_v50 = vmul.f32 %v3385_v24, %v7465_v43  ;;  %3090 = vst [vmem:[#allocation7 + $0x268] sm:$0xff] %v2796_v35  ;;  %3085 = vst [vmem:[#allocation7 + $0x240] sm:$0xff] %v2791_v36  ;;  %v2492_v11 = vmul.f32 %v5208_v62, %v2182_v28  ;;  %v2178_v45 = vmul.f32 %v3385_v24, %v7466_v60  ;;  %v1832_v36 = vmul.f32 0.0026041667, %v5566_v8  ;;  %v5781_v51 = vpop.xlane.xlu0 %1596  ;;  %v7469_v43 = vld [vmem:[#allocation96_spill] sm:$0xff] }
 0x1f3   :  { %3086 = vst [vmem:[#allocation7 + $0x248] sm:$0xff] %v2792_v9  ;;  %v2179_v15 = vmul.f32 %v3385_v24, %v7467_v61  ;;  %3087 = vst [vmem:[#allocation7 + $0x250] sm:$0xff] %v2793_v37  ;;  %v2800_v39 = vadd.f32 %v5193_v4, %v2490_v41  ;;  %v2801_v49 = vadd.f32 %v5197_v52, %v2491_v44  ;;  %v5776_v9 = vpop.xlane.xlu1 %1600  ;;  %3390 = vrsqrt.f32 %v1931_v10  ;;  %v7468_v41 = vld [vmem:[#allocation95_spill] sm:$0xff] }
 0x1f4   :  { %v2487_v25 = vmul.f32 %v5191_v54, %v2177_v50  ;;  %v2802_v1 = vadd.f32 %v5217_v48, %v2492_v11  ;;  %v2488_v40 = vmul.f32 %v5195_v55, %v2178_v45  ;;  %v1835_v24 = vmul.f32 0.0026041667, %v5588_v0  ;;  %v7470_v11 = vld [vmem:[#allocation97_spill] sm:$0xff] }
 0x1f5   :  { %v2489_v35 = vmul.f32 %v5208_v62, %v2179_v15  ;;  %3094 = vst [vmem:[#allocation7 + $0x288] sm:$0xff] %v2800_v39  ;;  %3095 = vst [vmem:[#allocation7 + $0x290] sm:$0xff] %v2801_v49  ;;  %v1834_v22 = vmul.f32 0.0026041667, %v5594_v23  ;;  %v1930_v8 = vadd.f32 1e-06, %v1832_v36 }
 0x1f6   :  { %v2797_v56 = vadd.f32 %v5193_v4, %v2487_v25  ;;  %v3387_v28 = vpop.eup %3386  ;;  %3096 = vst [vmem:[#allocation7 + $0x298] sm:$0xff] %v2802_v1  ;;  %v2798_v45 = vadd.f32 %v5197_v52, %v2488_v40  ;;  %v1837_v37 = vmul.f32 0.0026041667, %v5617_v32  ;;  %v1933_v60 = vadd.f32 1e-06, %v1835_v24  ;;  %v5800_v24 = vpop.xlane.xlu0 %1604 }
 0x1f7   :  { %v2799_v15 = vadd.f32 %v5217_v48, %v2489_v35  ;;  %v2186_v44 = vmul.f32 %v3387_v28, %v7468_v41  ;;  %v2187_v50 = vmul.f32 %v3387_v28, %v7469_v43  ;;  %v2188_v0 = vmul.f32 %v3387_v28, %v7470_v11  ;;  %v5795_v35 = vpop.xlane.xlu1 %1608  ;;  %v7471_v11 = vld [vmem:[#allocation98_spill] sm:$0xff] }
 0x1f8   :  { %3091 = vst [vmem:[#allocation7 + $0x270] sm:$0xff] %v2797_v56  ;;  %3092 = vst [vmem:[#allocation7 + $0x278] sm:$0xff] %v2798_v45  ;;  %3392 = vrsqrt.f32 %v1930_v8  ;;  %v1932_v23 = vadd.f32 1e-06, %v1834_v22  ;;  %v1935_v61 = vadd.f32 1e-06, %v1837_v37 }
 0x1f9   :  { %3093 = vst [vmem:[#allocation7 + $0x280] sm:$0xff] %v2799_v15  ;;  %v1836_v39 = vmul.f32 0.0026041667, %v5623_v53  ;;  %v2496_v49 = vmul.f32 %v5191_v54, %v2186_v44  ;;  %v2497_v25 = vmul.f32 %v5195_v55, %v2187_v50  ;;  %v2498_v32 = vmul.f32 %v5208_v62, %v2188_v0  ;;  %v3389_v44 = vpop.eup %3388 }
 0x1fa   :  { %3394 = vrsqrt.f32 %v1933_v60  ;;  %v1839_v1 = vmul.f32 0.0026041667, %v5648_v5  ;;  %v1838_v40 = vmul.f32 0.0026041667, %v5654_v34  ;;  %v1841_v45 = vmul.f32 0.0026041667, %v5674_v7 }
 0x1fb   :  { %3396 = vrsqrt.f32 %v1932_v23  ;;  %v1934_v10 = vadd.f32 1e-06, %v1836_v39  ;;  %v2806_v36 = vadd.f32 %v5193_v4, %v2496_v49  ;;  %v2807_v56 = vadd.f32 %v5197_v52, %v2497_v25  ;;  %v7472_v60 = vld [vmem:[#allocation99_spill] sm:$0xff] }
 0x1fc   :  { %v2808_v53 = vadd.f32 %v5217_v48, %v2498_v32  ;;  %3398 = vrsqrt.f32 %v1935_v61  ;;  %v1937_v22 = vadd.f32 1e-06, %v1839_v1  ;;  %v1936_v28 = vadd.f32 1e-06, %v1838_v40  ;;  %v7474_v1 = vld [vmem:[#allocation101_spill] sm:$0xff] }
 0x1fd   :  { %3100 = vst [vmem:[#allocation7 + $0x2b8] sm:$0xff] %v2806_v36  ;;  %3101 = vst [vmem:[#allocation7 + $0x2c0] sm:$0xff] %v2807_v56  ;;  %3400 = vrsqrt.f32 %v1934_v10  ;;  %v1840_v5 = vmul.f32 0.0026041667, %v5678_v42  ;;  %v1843_v34 = vmul.f32 0.0026041667, %v5697_v21  ;;  %v2183_v0 = vmul.f32 %v3389_v44, %v7471_v11  ;;  %v5811_v21 = vpop.xlane.xlu1 %1616 }
 0x1fe   :  { %3102 = vst [vmem:[#allocation7 + $0x2c8] sm:$0xff] %v2808_v53  ;;  %v1842_v15 = vmul.f32 0.0026041667, %v5702_v16  ;;  %3402 = vrsqrt.f32 %v1937_v22  ;;  %v1939_v8 = vadd.f32 1e-06, %v1841_v45  ;;  %v2184_v23 = vmul.f32 %v3389_v44, %v7472_v60  ;;  %v7473_v42 = vld [vmem:[#allocation100_spill] sm:$0xff] }
 0x1ff   :  { %v1845_v37 = vmul.f32 0.0026041667, %v5723_v19  ;;  %v1844_v41 = vmul.f32 0.0026041667, %v5727_v58  ;;  %3404 = vrsqrt.f32 %v1936_v28  ;;  %v1938_v43 = vadd.f32 1e-06, %v1840_v5  ;;  %v5814_v58 = vpop.xlane.xlu0 %1612 }
 0x200   :  { %v1941_v7 = vadd.f32 1e-06, %v1843_v34  ;;  %v1940_v50 = vadd.f32 1e-06, %v1842_v15  ;;  %v2185_v61 = vmul.f32 %v3389_v44, %v7473_v42  ;;  %3406 = vrsqrt.f32 %v1939_v8  ;;  %v3391_v49 = vpop.eup %3390  ;;  %v7475_v36 = vld [vmem:[#allocation102_spill] sm:$0xff]  ;;  %v7476_v53 = vld [vmem:[#allocation103_spill] sm:$0xff] }
 0x201   :  { %3408 = vrsqrt.f32 %v1938_v43  ;;  %v1943_v16 = vadd.f32 1e-06, %v1845_v37  ;;  %v1942_v39 = vadd.f32 1e-06, %v1844_v41  ;;  %v1847_v19 = vmul.f32 0.0026041667, %v5749_v59  ;;  %v5833_v60 = vpop.xlane.xlu1 %1624 }
 0x202   :  { %v2493_v25 = vmul.f32 %v5191_v54, %v2183_v0  ;;  %v2494_v32 = vmul.f32 %v5195_v55, %v2184_v23  ;;  %v2495_v10 = vmul.f32 %v5208_v62, %v2185_v61  ;;  %3410 = vrsqrt.f32 %v1941_v7  ;;  %v7477_v41 = vld [vmem:[#allocation104_spill] sm:$0xff]  ;;  %v7478_v43 = vld [vmem:[#allocation105_spill] sm:$0xff] }
 0x203   :  { %v2192_v40 = vmul.f32 %v3391_v49, %v7474_v1  ;;  %v2193_v56 = vmul.f32 %v3391_v49, %v7475_v36  ;;  %v2194_v22 = vmul.f32 %v3391_v49, %v7476_v53  ;;  %3412 = vrsqrt.f32 %v1940_v50  ;;  %v7479_v50 = vld [vmem:[#allocation106_spill] sm:$0xff]  ;;  %v7481_v1 = vld [vmem:[#allocation108_spill] sm:$0xff] }
 0x204   :  { %v2803_v28 = vadd.f32 %v5193_v4, %v2493_v25  ;;  %v2804_v59 = vadd.f32 %v5197_v52, %v2494_v32  ;;  %v2805_v45 = vadd.f32 %v5217_v48, %v2495_v10  ;;  %3414 = vrsqrt.f32 %v1943_v16  ;;  %v5839_v25 = vpop.xlane.xlu0 %1620 }
 0x205   :  { %v3393_v5 = vpop.eup %3392  ;;  %v2502_v34 = vmul.f32 %v5191_v54, %v2192_v40  ;;  %v2503_v15 = vmul.f32 %v5195_v55, %v2193_v56  ;;  %v2504_v8 = vmul.f32 %v5208_v62, %v2194_v22  ;;  %3416 = vrsqrt.f32 %v1942_v39  ;;  %v7480_v39 = vld [vmem:[#allocation107_spill] sm:$0xff]  ;;  %v7482_v56 = vld [vmem:[#allocation109_spill] sm:$0xff] }
 0x206   :  { %3097 = vst [vmem:[#allocation7 + $0x2a0] sm:$0xff] %v2803_v28  ;;  %3098 = vst [vmem:[#allocation7 + $0x2a8] sm:$0xff] %v2804_v59  ;;  %v2189_v44 = vmul.f32 %v3393_v5, %v7477_v41  ;;  %v2190_v7 = vmul.f32 %v3393_v5, %v7478_v43  ;;  %v2191_v11 = vmul.f32 %v3393_v5, %v7479_v50  ;;  %v5831_v0 = vadd.f32 1e-06, %v1847_v19  ;;  %v7483_v28 = vld [vmem:[#allocation110_spill] sm:$0xff]  ;;  %v7485_v50 = vld [vmem:[#allocation112_spill] sm:$0xff] }
 0x207   :  { %v3395_v37 = vpop.eup %3394  ;;  %3099 = vst [vmem:[#allocation7 + $0x2b0] sm:$0xff] %v2805_v45  ;;  %v2812_v42 = vadd.f32 %v5193_v4, %v2502_v34  ;;  %v2813_v61 = vadd.f32 %v5197_v52, %v2503_v15  ;;  %v2814_v16 = vadd.f32 %v5217_v48, %v2504_v8  ;;  %v7484_v45 = vld [vmem:[#allocation111_spill] sm:$0xff] }
 0x208   :  { %v3397_v23 = vpop.eup %3396  ;;  %v2198_v49 = vmul.f32 %v3395_v37, %v7480_v39  ;;  %v2499_v32 = vmul.f32 %v5191_v54, %v2189_v44  ;;  %v2500_v10 = vmul.f32 %v5195_v55, %v2190_v7  ;;  %v2501_v19 = vmul.f32 %v5208_v62, %v2191_v11 }
 0x209   :  { %v2199_v40 = vmul.f32 %v3395_v37, %v7481_v1  ;;  %v3399_v36 = vpop.eup %3398  ;;  %3106 = vst [vmem:[#allocation7 + $0x2e8] sm:$0xff] %v2812_v42  ;;  %3107 = vst [vmem:[#allocation7 + $0x2f0] sm:$0xff] %v2813_v61  ;;  %v2200_v53 = vmul.f32 %v3395_v37, %v7482_v56  ;;  %v2195_v59 = vmul.f32 %v3397_v23, %v7483_v28  ;;  %v5861_v1 = vpop.xlane.xlu1 %1632  ;;  %3418 = vrsqrt.f32 %v5831_v0 }
 0x20a   :  { %3108 = vst [vmem:[#allocation7 + $0x2f8] sm:$0xff] %v2814_v16  ;;  %v2508_v22 = vmul.f32 %v5191_v54, %v2198_v49  ;;  %v2196_v5 = vmul.f32 %v3397_v23, %v7484_v45  ;;  %v3401_v34 = vpop.eup %3400  ;;  %v2809_v15 = vadd.f32 %v5193_v4, %v2499_v32  ;;  %v2810_v8 = vadd.f32 %v5197_v52, %v2500_v10  ;;  %v7486_v49 = vld [vmem:[#allocation113_spill] sm:$0xff]  ;;  %v7487_v10 = vld [vmem:[#allocation114_spill] sm:$0xff] }
 0x20b   :  { %v2811_v41 = vadd.f32 %v5217_v48, %v2501_v19  ;;  %v2509_v44 = vmul.f32 %v5195_v55, %v2199_v40  ;;  %v3403_v43 = vpop.eup %3402  ;;  %v2510_v7 = vmul.f32 %v5208_v62, %v2200_v53  ;;  %v2197_v11 = vmul.f32 %v3397_v23, %v7485_v50  ;;  %v7490_v50 = vld [vmem:[#allocation117_spill] sm:$0xff] }
 0x20c   :  { %v2818_v37 = vadd.f32 %v5193_v4, %v2508_v22  ;;  %v2505_v42 = vmul.f32 %v5191_v54, %v2195_v59  ;;  %v3405_v61 = vpop.eup %3404  ;;  %3103 = vst [vmem:[#allocation7 + $0x2d0] sm:$0xff] %v2809_v15  ;;  %3104 = vst [vmem:[#allocation7 + $0x2d8] sm:$0xff] %v2810_v8  ;;  %v2506_v39 = vmul.f32 %v5195_v55, %v2196_v5  ;;  %v7488_v22 = vld [vmem:[#allocation115_spill] sm:$0xff]  ;;  %v5867_v59 = vpop.xlane.xlu0 %1628 }
 0x20d   :  { %3105 = vst [vmem:[#allocation7 + $0x2e0] sm:$0xff] %v2811_v41  ;;  %v2819_v16 = vadd.f32 %v5197_v52, %v2509_v44  ;;  %v2204_v32 = vmul.f32 %v3399_v36, %v7486_v49  ;;  %v2205_v19 = vmul.f32 %v3399_v36, %v7487_v10  ;;  %v3407_v40 = vpop.eup %3406  ;;  %v2820_v56 = vadd.f32 %v5217_v48, %v2510_v7  ;;  %v7489_v41 = vld [vmem:[#allocation116_spill] sm:$0xff] }
 0x20e   :  { %3112 = vst [vmem:[#allocation7 + $0x318] sm:$0xff] %v2818_v37  ;;  %v2507_v23 = vmul.f32 %v5208_v62, %v2197_v11  ;;  %v2815_v53 = vadd.f32 %v5193_v4, %v2505_v42  ;;  %v2206_v28 = vmul.f32 %v3399_v36, %v7488_v22  ;;  %v5869_v45 = vpop.eup %3408  ;;  %v2816_v5 = vadd.f32 %v5197_v52, %v2506_v39  ;;  %v7491_v42 = vld [vmem:[#allocation118_spill] sm:$0xff] }
 0x20f   :  { %3113 = vst [vmem:[#allocation7 + $0x320] sm:$0xff] %v2819_v16  ;;  %v2514_v15 = vmul.f32 %v5191_v54, %v2204_v32  ;;  %v2515_v8 = vmul.f32 %v5195_v55, %v2205_v19  ;;  %v2201_v44 = vmul.f32 %v3401_v34, %v7489_v41  ;;  %v5875_v7 = vpop.eup %3410  ;;  %3114 = vst [vmem:[#allocation7 + $0x328] sm:$0xff] %v2820_v56  ;;  %v7492_v19 = vld [vmem:[#allocation119_spill] sm:$0xff] }
 0x210   :  { %v2817_v37 = vadd.f32 %v5217_v48, %v2507_v23  ;;  %3109 = vst [vmem:[#allocation7 + $0x300] sm:$0xff] %v2815_v53  ;;  %v2516_v36 = vmul.f32 %v5208_v62, %v2206_v28  ;;  %v2202_v11 = vmul.f32 %v3401_v34, %v7490_v50  ;;  %v2203_v16 = vmul.f32 %v3401_v34, %v7491_v42  ;;  %v5881_v49 = vpop.eup %3412  ;;  %v7493_v28 = vld [vmem:[#allocation120_spill] sm:$0xff]  ;;  %v7495_v42 = vld [vmem:[#allocation122_spill] sm:$0xff] }
 0x211   :  { %3110 = vst [vmem:[#allocation7 + $0x308] sm:$0xff] %v2816_v5  ;;  %v2824_v39 = vadd.f32 %v5193_v4, %v2514_v15  ;;  %v2825_v32 = vadd.f32 %v5197_v52, %v2515_v8  ;;  %v2511_v10 = vmul.f32 %v5191_v54, %v2201_v44  ;;  %v2210_v56 = vmul.f32 %v3403_v43, %v7492_v19  ;;  %v5887_v22 = vpop.eup %3414  ;;  %v7494_v8 = vld [vmem:[#allocation121_spill] sm:$0xff]  ;;  %v5899_v19 = vpop.xlane.xlu1 %1640 }
 0x212   :  { %3111 = vst [vmem:[#allocation7 + $0x310] sm:$0xff] %v2817_v37  ;;  %v2826_v23 = vadd.f32 %v5217_v48, %v2516_v36  ;;  %v2512_v53 = vmul.f32 %v5195_v55, %v2202_v11  ;;  %v2513_v34 = vmul.f32 %v5208_v62, %v2203_v16  ;;  %v2211_v41 = vmul.f32 %v3403_v43, %v7493_v28  ;;  %v5893_v5 = vpop.eup %3416  ;;  %v7496_v28 = vld [vmem:[#allocation123_spill] sm:$0xff] }
 0x213   :  { %3118 = vst [vmem:[#allocation7 + $0x348] sm:$0xff] %v2824_v39  ;;  %3119 = vst [vmem:[#allocation7 + $0x350] sm:$0xff] %v2825_v32  ;;  %v2821_v15 = vadd.f32 %v5193_v4, %v2511_v10  ;;  %v2212_v44 = vmul.f32 %v3403_v43, %v7494_v8  ;;  %v2520_v50 = vmul.f32 %v5191_v54, %v2210_v56  ;;  %v5905_v32 = vpop.xlane.xlu0 %1636  ;;  %v7497_v56 = vld [vmem:[#allocation124_spill] sm:$0xff] }
 0x214   :  { %v2207_v37 = vmul.f32 %v3405_v61, %v7495_v42  ;;  %3120 = vst [vmem:[#allocation7 + $0x358] sm:$0xff] %v2826_v23  ;;  %v2822_v36 = vadd.f32 %v5197_v52, %v2512_v53  ;;  %v2823_v11 = vadd.f32 %v5217_v48, %v2513_v34  ;;  %v2521_v16 = vmul.f32 %v5195_v55, %v2211_v41  ;;  %v7498_v34 = vld [vmem:[#allocation125_spill] sm:$0xff] }
 0x215   :  { %v2208_v39 = vmul.f32 %v3405_v61, %v7496_v28  ;;  %3115 = vst [vmem:[#allocation7 + $0x330] sm:$0xff] %v2821_v15  ;;  %v2522_v43 = vmul.f32 %v5208_v62, %v2212_v44  ;;  %v2830_v10 = vadd.f32 %v5193_v4, %v2520_v50  ;;  %v2209_v8 = vmul.f32 %v3405_v61, %v7497_v56  ;;  %v7499_v28 = vld [vmem:[#allocation126_spill] sm:$0xff]  ;;  %v7500_v61 = vld [vmem:[#allocation127_spill] sm:$0xff] }
 0x216   :  { %v2517_v42 = vmul.f32 %v5191_v54, %v2207_v37  ;;  %3116 = vst [vmem:[#allocation7 + $0x338] sm:$0xff] %v2822_v36  ;;  %3117 = vst [vmem:[#allocation7 + $0x340] sm:$0xff] %v2823_v11  ;;  %v2831_v23 = vadd.f32 %v5197_v52, %v2521_v16  ;;  %v2216_v41 = vmul.f32 %v3407_v40, %v7498_v34  ;;  %v7501_v16 = vld [vmem:[#allocation128_spill] sm:$0xff] }
 0x217   :  { %v2518_v53 = vmul.f32 %v5195_v55, %v2208_v39  ;;  %v2217_v46 = vmul.f32 %v3407_v40, %v7499_v28  ;;  %v2832_v15 = vadd.f32 %v5217_v48, %v2522_v43  ;;  %3124 = vst [vmem:[#allocation7 + $0x378] sm:$0xff] %v2830_v10  ;;  %v2519_v44 = vmul.f32 %v5208_v62, %v2209_v8  ;;  %v7502_v8 = vld [vmem:[#allocation129_spill] sm:$0xff]  ;;  %v7504_v28 = vld [vmem:[#allocation131_spill] sm:$0xff] }
 0x218   :  { %v2827_v50 = vadd.f32 %v5193_v4, %v2517_v42  ;;  %v2218_v56 = vmul.f32 %v3407_v40, %v7500_v61  ;;  %3125 = vst [vmem:[#allocation7 + $0x380] sm:$0xff] %v2831_v23  ;;  %v2526_v36 = vmul.f32 %v5191_v54, %v2216_v41  ;;  %v2213_v39 = vmul.f32 %v5869_v45, %v7501_v16  ;;  %v7503_v40 = vld [vmem:[#allocation130_spill] sm:$0xff] }
 0x219   :  { %v2828_v37 = vadd.f32 %v5197_v52, %v2518_v53  ;;  %v2527_v11 = vmul.f32 %v5195_v55, %v2217_v46  ;;  %3126 = vst [vmem:[#allocation7 + $0x388] sm:$0xff] %v2832_v15  ;;  %v2829_v43 = vadd.f32 %v5217_v48, %v2519_v44  ;;  %v2214_v42 = vmul.f32 %v5869_v45, %v7502_v8  ;;  %v5930_v53 = vpop.xlane.xlu1 %1648  ;;  %v5937_v44 = vpop.xlane.xlu0 %1644  ;;  %v7507_v8 = vld [vmem:[#allocation134_spill] sm:$0xff] }
 0x21a   :  { %3121 = vst [vmem:[#allocation7 + $0x360] sm:$0xff] %v2827_v50  ;;  %v2528_v10 = vmul.f32 %v5208_v62, %v2218_v56  ;;  %v2215_v23 = vmul.f32 %v5869_v45, %v7503_v40  ;;  %v2836_v46 = vadd.f32 %v5193_v4, %v2526_v36  ;;  %v2523_v41 = vmul.f32 %v5191_v54, %v2213_v39  ;;  %v7505_v56 = vld [vmem:[#allocation132_spill] sm:$0xff] }
 0x21b   :  { %3122 = vst [vmem:[#allocation7 + $0x368] sm:$0xff] %v2828_v37  ;;  %v2837_v34 = vadd.f32 %v5197_v52, %v2527_v11  ;;  %v2222_v15 = vmul.f32 %v5875_v7, %v7504_v28  ;;  %3123 = vst [vmem:[#allocation7 + $0x370] sm:$0xff] %v2829_v43  ;;  %v2524_v61 = vmul.f32 %v5195_v55, %v2214_v42  ;;  %v7506_v11 = vld [vmem:[#allocation133_spill] sm:$0xff] }
 0x21c   :  { %v2838_v50 = vadd.f32 %v5217_v48, %v2528_v10  ;;  %v2525_v45 = vmul.f32 %v5208_v62, %v2215_v23  ;;  %v2223_v37 = vmul.f32 %v5875_v7, %v7505_v56  ;;  %3130 = vst [vmem:[#allocation7 + $0x3a8] sm:$0xff] %v2836_v46  ;;  %v2833_v36 = vadd.f32 %v5193_v4, %v2523_v41  ;;  %v7508_v23 = vld [vmem:[#allocation135_spill] sm:$0xff]  ;;  %v7509_v41 = vld [vmem:[#allocation136_spill] sm:$0xff] }
 0x21d   :  { %3131 = vst [vmem:[#allocation7 + $0x3b0] sm:$0xff] %v2837_v34  ;;  %v2224_v16 = vmul.f32 %v5875_v7, %v7506_v11  ;;  %v2532_v39 = vmul.f32 %v5191_v54, %v2222_v15  ;;  %v2219_v43 = vmul.f32 %v5881_v49, %v7507_v8  ;;  %v2834_v10 = vadd.f32 %v5197_v52, %v2524_v61  ;;  %v5966_v11 = vpop.xlane.xlu1 %1656  ;;  %v7512_v8 = vld [vmem:[#allocation140_spill] sm:$0xff] }
 0x21e   :  { %3132 = vst [vmem:[#allocation7 + $0x3b8] sm:$0xff] %v2838_v50  ;;  %v2835_v42 = vadd.f32 %v5217_v48, %v2525_v45  ;;  %v2533_v40 = vmul.f32 %v5195_v55, %v2223_v37  ;;  %v2220_v46 = vmul.f32 %v5881_v49, %v7508_v23  ;;  %3127 = vst [vmem:[#allocation7 + $0x390] sm:$0xff] %v2833_v36  ;;  %v7510_v45 = vld [vmem:[#allocation138_spill] sm:$0xff]  ;;  %v7511_v37 = vld [vmem:[#allocation139_spill] sm:$0xff] }
 0x21f   :  { %v2534_v34 = vmul.f32 %v5208_v62, %v2224_v16  ;;  %v2842_v7 = vadd.f32 %v5193_v4, %v2532_v39  ;;  %v2221_v28 = vmul.f32 %v5881_v49, %v7509_v41  ;;  %v2529_v15 = vmul.f32 %v5191_v54, %v2219_v43  ;;  %3128 = vst [vmem:[#allocation7 + $0x398] sm:$0xff] %v2834_v10  ;;  %v5973_v10 = vpop.xlane.xlu0 %1652 }
 0x220   :  { %3129 = vst [vmem:[#allocation7 + $0x3a0] sm:$0xff] %v2835_v42  ;;  %v2843_v50 = vadd.f32 %v5197_v52, %v2533_v40  ;;  %v2530_v61 = vmul.f32 %v5195_v55, %v2220_v46  ;;  %v2228_v56 = vmul.f32 %v5887_v22, %v7510_v45  ;;  %v2229_v36 = vmul.f32 %v5887_v22, %v7511_v37  ;;  %v7513_v46 = vld [vmem:[#allocation141_spill] sm:$0xff] }
 0x221   :  { %v2844_v16 = vadd.f32 %v5217_v48, %v2534_v34  ;;  %3136 = vst [vmem:[#allocation7 + $0x3d8] sm:$0xff] %v2842_v7  ;;  %v2531_v49 = vmul.f32 %v5208_v62, %v2221_v28  ;;  %v2839_v39 = vadd.f32 %v5193_v4, %v2529_v15  ;;  %v2230_v43 = vmul.f32 %v5887_v22, %v7512_v8  ;;  %v7514_v28 = vld [vmem:[#allocation142_spill] sm:$0xff]  ;;  %v7515_v15 = vld [vmem:[#allocation143_spill] sm:$0xff]  ;;  %v1665_v0 = vpop.xlane.xlu1 %1664 }
 0x222   :  { %3137 = vst [vmem:[#allocation7 + $0x3e0] sm:$0xff] %v2843_v50  ;;  %v2840_v42 = vadd.f32 %v5197_v52, %v2530_v61  ;;  %v2538_v40 = vmul.f32 %v5191_v54, %v2228_v56  ;;  %v2539_v23 = vmul.f32 %v5195_v55, %v2229_v36  ;;  %v2225_v34 = vmul.f32 %v5893_v5, %v7513_v46 }
 0x223   :  { %3138 = vst [vmem:[#allocation7 + $0x3e8] sm:$0xff] %v2844_v16  ;;  %v2841_v7 = vadd.f32 %v5217_v48, %v2531_v49  ;;  %3133 = vst [vmem:[#allocation7 + $0x3c0] sm:$0xff] %v2839_v39  ;;  %v2540_v41 = vmul.f32 %v5208_v62, %v2230_v43  ;;  %v2226_v22 = vmul.f32 %v5893_v5, %v7514_v28  ;;  %v1846_v49 = vmul.f32 0.0026041667, %v5755_v14  ;;  %v1661_v14 = vpop.xlane.xlu0 %1660 }
 0x224   :  { %v2227_v50 = vmul.f32 %v5893_v5, %v7515_v15  ;;  %3134 = vst [vmem:[#allocation7 + $0x3c8] sm:$0xff] %v2840_v42  ;;  %v2848_v61 = vadd.f32 %v5193_v4, %v2538_v40  ;;  %v2849_v45 = vadd.f32 %v5197_v52, %v2539_v23  ;;  %v2535_v56 = vmul.f32 %v5191_v54, %v2225_v34 }
 0x225   :  { %3135 = vst [vmem:[#allocation7 + $0x3d0] sm:$0xff] %v2841_v7  ;;  %v2850_v37 = vadd.f32 %v5217_v48, %v2540_v41  ;;  %v2536_v36 = vmul.f32 %v5195_v55, %v2226_v22  ;;  %v1849_v39 = vmul.f32 0.0026041667, %v5776_v9  ;;  %v1848_v8 = vmul.f32 0.0026041667, %v5781_v51 }
 0x226   :  { %v2537_v16 = vmul.f32 %v5208_v62, %v2227_v50  ;;  %3142 = vst [vmem:[#allocation7 + $0x408] sm:$0xff] %v2848_v61  ;;  %3143 = vst [vmem:[#allocation7 + $0x410] sm:$0xff] %v2849_v45  ;;  %v2845_v5 = vadd.f32 %v5193_v4, %v2535_v56  ;;  %v1851_v43 = vmul.f32 0.0026041667, %v5795_v35  ;;  %v1944_v23 = vadd.f32 1e-06, %v1846_v49 }
 0x227   :  { %3144 = vst [vmem:[#allocation7 + $0x418] sm:$0xff] %v2850_v37  ;;  %v2846_v42 = vadd.f32 %v5197_v52, %v2536_v36  ;;  %v1850_v46 = vmul.f32 0.0026041667, %v5800_v24  ;;  %v1947_v34 = vadd.f32 1e-06, %v1849_v39  ;;  %v1673_v36 = vpop.xlane.xlu1 %1672 }
 0x228   :  { %v2847_v40 = vadd.f32 %v5217_v48, %v2537_v16  ;;  %3139 = vst [vmem:[#allocation7 + $0x3f0] sm:$0xff] %v2845_v5  ;;  %v1946_v7 = vadd.f32 1e-06, %v1848_v8  ;;  %v1949_v41 = vadd.f32 1e-06, %v1851_v43  ;;  %3420 = vrsqrt.f32 %v1944_v23  ;;  %v1669_v16 = vpop.xlane.xlu0 %1668 }
 0x229   :  { %3140 = vst [vmem:[#allocation7 + $0x3f8] sm:$0xff] %v2846_v42  ;;  %v1948_v9 = vadd.f32 1e-06, %v1850_v46  ;;  %v1853_v51 = vmul.f32 0.0026041667, %v5811_v21  ;;  %3422 = vrsqrt.f32 %v1947_v34 }
 0x22a   :  { %3141 = vst [vmem:[#allocation7 + $0x400] sm:$0xff] %v2847_v40  ;;  %v1852_v35 = vmul.f32 0.0026041667, %v5814_v58  ;;  %v1855_v28 = vmul.f32 0.0026041667, %v5833_v60  ;;  %3424 = vrsqrt.f32 %v1946_v7 }
 0x22b   :  { %v1854_v22 = vmul.f32 0.0026041667, %v5839_v25  ;;  %v1857_v24 = vmul.f32 0.0026041667, %v5861_v1  ;;  %v1951_v15 = vadd.f32 1e-06, %v1853_v51  ;;  %3426 = vrsqrt.f32 %v1949_v41  ;;  %v1681_v41 = vpop.xlane.xlu1 %1680 }
 0x22c   :  { %v1950_v50 = vadd.f32 1e-06, %v1852_v35  ;;  %v1856_v61 = vmul.f32 0.0026041667, %v5867_v59  ;;  %v1953_v45 = vadd.f32 1e-06, %v1855_v28  ;;  %3428 = vrsqrt.f32 %v1948_v9  ;;  %v6022_v35 = vpop.xlane.xlu0 %1676 }
 0x22d   :  { %v1952_v56 = vadd.f32 1e-06, %v1854_v22  ;;  %v1955_v37 = vadd.f32 1e-06, %v1857_v24  ;;  %v1859_v58 = vmul.f32 0.0026041667, %v5899_v19  ;;  %3430 = vrsqrt.f32 %v1951_v15  ;;  %v3419_v19 = vpop.eup %3418 }
 0x22e   :  { %v1954_v21 = vadd.f32 1e-06, %v1856_v61  ;;  %v1858_v60 = vmul.f32 0.0026041667, %v5905_v32  ;;  %v1861_v25 = vmul.f32 0.0026041667, %v5930_v53  ;;  %3432 = vrsqrt.f32 %v1950_v50 }
 0x22f   :  { %v1860_v1 = vmul.f32 0.0026041667, %v5937_v44  ;;  %v1863_v49 = vmul.f32 0.0026041667, %v5966_v11  ;;  %v1957_v59 = vadd.f32 1e-06, %v1859_v58  ;;  %3434 = vrsqrt.f32 %v1953_v45 }
 0x230   :  { %v1956_v5 = vadd.f32 1e-06, %v1858_v60  ;;  %v1862_v39 = vmul.f32 0.0026041667, %v5973_v10  ;;  %v1959_v8 = vadd.f32 1e-06, %v1861_v25  ;;  %3436 = vrsqrt.f32 %v1952_v56 }
 0x231   :  { %v1958_v43 = vadd.f32 1e-06, %v1860_v1  ;;  %v1961_v42 = vadd.f32 1e-06, %v1863_v49  ;;  %v1865_v40 = vmul.f32 0.0026041667, %v1665_v0  ;;  %3438 = vrsqrt.f32 %v1955_v37 }
 0x232   :  { %v6013_v32 = vadd.f32 1e-06, %v1862_v39  ;;  %v1864_v23 = vmul.f32 0.0026041667, %v1661_v14  ;;  %v7516_v53 = vld [vmem:[#allocation144_spill] sm:$0xff]  ;;  %v7517_v44 = vld [vmem:[#allocation145_spill] sm:$0xff]  ;;  %3440 = vrsqrt.f32 %v1954_v21 }
 0x233   :  { %v2234_v46 = vmul.f32 %v3419_v19, %v7516_v53  ;;  %v2235_v34 = vmul.f32 %v3419_v19, %v7517_v44  ;;  %v7518_v11 = vld [vmem:[#allocation146_spill] sm:$0xff]  ;;  %v6018_v10 = vadd.f32 1e-06, %v1865_v40  ;;  %v1867_v51 = vmul.f32 0.0026041667, %v1673_v36  ;;  %v7519_v36 = vld [vmem:[#allocation147_spill] sm:$0xff] }
 0x234   :  { %v2236_v7 = vmul.f32 %v3419_v19, %v7518_v11  ;;  %v6020_v9 = vadd.f32 1e-06, %v1864_v23  ;;  %3442 = vrsqrt.f32 %v1957_v59  ;;  %v6029_v24 = vmul.f32 0.0026041667, %v1669_v16  ;;  %v7520_v58 = vld [vmem:[#allocation148_spill] sm:$0xff]  ;;  %v7521_v25 = vld [vmem:[#allocation149_spill] sm:$0xff]  ;;  %v6048_v11 = vpop.xlane.xlu0 %1684 }
 0x235   :  { %v2544_v28 = vmul.f32 %v5191_v54, %v2234_v46  ;;  %v2545_v0 = vmul.f32 %v5195_v55, %v2235_v34  ;;  %3444 = vrsqrt.f32 %v1956_v5  ;;  %v6027_v22 = vadd.f32 1e-06, %v1867_v51  ;;  %v3421_v50 = vpop.eup %3420  ;;  %v7522_v49 = vld [vmem:[#allocation151_spill] sm:$0xff]  ;;  %v7523_v5 = vld [vmem:[#allocation152_spill] sm:$0xff]  ;;  %v7524_v19 = vld [vmem:[#allocation153_spill] sm:$0xff]  ;;  %v6046_v34 = vpop.xlane.xlu1 %1688 }
 0x236   :  { %v2546_v14 = vmul.f32 %v5208_v62, %v2236_v7  ;;  %v6031_v15 = vmul.f32 0.0026041667, %v1681_v41  ;;  %3446 = vrsqrt.f32 %v1959_v8  ;;  %v3423_v37 = vpop.eup %3422  ;;  %v2231_v21 = vmul.f32 %v3421_v50, %v7519_v36  ;;  %v7525_v44 = vld [vmem:[#allocation154_spill] sm:$0xff] }
 0x237   :  { %v2854_v61 = vadd.f32 %v5193_v4, %v2544_v28  ;;  %v2855_v45 = vadd.f32 %v5197_v52, %v2545_v0  ;;  %v2232_v60 = vmul.f32 %v3421_v50, %v7520_v58  ;;  %v2233_v1 = vmul.f32 %v3421_v50, %v7521_v25  ;;  %v3425_v16 = vpop.eup %3424  ;;  %v7526_v28 = vld [vmem:[#allocation155_spill] sm:$0xff] }
 0x238   :  { %v2856_v56 = vadd.f32 %v5217_v48, %v2546_v14  ;;  %3448 = vrsqrt.f32 %v1958_v43  ;;  %v2240_v59 = vmul.f32 %v3423_v37, %v7522_v49  ;;  %v2241_v39 = vmul.f32 %v3423_v37, %v7523_v5  ;;  %v3427_v8 = vpop.eup %3426  ;;  %v7528_v5 = vld [vmem:[#allocation158_spill] sm:$0xff] }
 0x239   :  { %3148 = vst [vmem:[#allocation7 + $0x438] sm:$0xff] %v2854_v61  ;;  %3149 = vst [vmem:[#allocation7 + $0x440] sm:$0xff] %v2855_v45  ;;  %v2242_v40 = vmul.f32 %v3423_v37, %v7524_v19  ;;  %3450 = vrsqrt.f32 %v1961_v42  ;;  %v2541_v23 = vmul.f32 %v5191_v54, %v2231_v21  ;;  %v2542_v53 = vmul.f32 %v5195_v55, %v2232_v60  ;;  %v3429_v7 = vpop.eup %3428 }
 0x23a   :  { %3150 = vst [vmem:[#allocation7 + $0x448] sm:$0xff] %v2856_v56  ;;  %v2543_v46 = vmul.f32 %v5208_v62, %v2233_v1  ;;  %v2237_v43 = vmul.f32 %v3425_v16, %v7525_v44  ;;  %v2550_v41 = vmul.f32 %v5191_v54, %v2240_v59  ;;  %v2551_v51 = vmul.f32 %v5195_v55, %v2241_v39  ;;  %v3431_v14 = vpop.eup %3430  ;;  %v7527_v56 = vld [vmem:[#allocation156_spill] sm:$0xff]  ;;  %v7529_v39 = vld [vmem:[#allocation159_spill] sm:$0xff]  ;;  %v7531_v44 = vld [vmem:[#allocation161_spill] sm:$0xff] }
 0x23b   :  { %v2552_v42 = vmul.f32 %v5208_v62, %v2242_v40  ;;  %v2238_v0 = vmul.f32 %v3425_v16, %v7526_v28  ;;  %v2851_v50 = vadd.f32 %v5193_v4, %v2541_v23  ;;  %v2852_v61 = vadd.f32 %v5197_v52, %v2542_v53  ;;  %v3433_v36 = vpop.eup %3432  ;;  %v7530_v53 = vld [vmem:[#allocation160_spill] sm:$0xff] }
 0x23c   :  { %v2853_v45 = vadd.f32 %v5217_v48, %v2543_v46  ;;  %v2239_v37 = vmul.f32 %v3425_v16, %v7527_v56  ;;  %v2860_v21 = vadd.f32 %v5193_v4, %v2550_v41  ;;  %v2861_v58 = vadd.f32 %v5197_v52, %v2551_v51  ;;  %v6062_v1 = vpop.eup %3434  ;;  %v7532_v41 = vld [vmem:[#allocation162_spill] sm:$0xff]  ;;  %v6082_v56 = vpop.xlane.xlu0 %1692 }
 0x23d   :  { %v2862_v60 = vadd.f32 %v5217_v48, %v2552_v42  ;;  %v2547_v25 = vmul.f32 %v5191_v54, %v2237_v43  ;;  %3145 = vst [vmem:[#allocation7 + $0x420] sm:$0xff] %v2851_v50  ;;  %3146 = vst [vmem:[#allocation7 + $0x428] sm:$0xff] %v2852_v61  ;;  %v2548_v49 = vmul.f32 %v5195_v55, %v2238_v0  ;;  %v6068_v40 = vpop.eup %3436  ;;  %3452 = vrsqrt.f32 %v6013_v32 }
 0x23e   :  { %3147 = vst [vmem:[#allocation7 + $0x430] sm:$0xff] %v2853_v45  ;;  %v2549_v59 = vmul.f32 %v5208_v62, %v2239_v37  ;;  %v2246_v16 = vmul.f32 %v3427_v8, %v7528_v5  ;;  %v2247_v19 = vmul.f32 %v3427_v8, %v7529_v39  ;;  %3154 = vst [vmem:[#allocation7 + $0x468] sm:$0xff] %v2860_v21  ;;  %v6074_v42 = vpop.eup %3438  ;;  %v6080_v45 = vpop.xlane.xlu1 %1696  ;;  %v7533_v21 = vld [vmem:[#allocation163_spill] sm:$0xff]  ;;  %3454 = vrsqrt.f32 %v6018_v10 }
 0x23f   :  { %3155 = vst [vmem:[#allocation7 + $0x470] sm:$0xff] %v2861_v58  ;;  %3156 = vst [vmem:[#allocation7 + $0x478] sm:$0xff] %v2862_v60  ;;  %v2857_v23 = vadd.f32 %v5193_v4, %v2547_v25  ;;  %v2248_v46 = vmul.f32 %v3427_v8, %v7530_v53  ;;  %v2243_v43 = vmul.f32 %v3429_v7, %v7531_v44  ;;  %v6084_v37 = vpop.eup %3440  ;;  %3456 = vrsqrt.f32 %v6020_v9 }
 0x240   :  { %v2244_v51 = vmul.f32 %v3429_v7, %v7532_v41  ;;  %v2858_v28 = vadd.f32 %v5197_v52, %v2548_v49  ;;  %v2859_v0 = vadd.f32 %v5217_v48, %v2549_v59  ;;  %v2556_v50 = vmul.f32 %v5191_v54, %v2246_v16  ;;  %v7534_v16 = vld [vmem:[#allocation164_spill] sm:$0xff] }
 0x241   :  { %v2557_v61 = vmul.f32 %v5195_v55, %v2247_v19  ;;  %3151 = vst [vmem:[#allocation7 + $0x450] sm:$0xff] %v2857_v23  ;;  %v2558_v8 = vmul.f32 %v5208_v62, %v2248_v46  ;;  %v2245_v58 = vmul.f32 %v3429_v7, %v7533_v21  ;;  %v2553_v60 = vmul.f32 %v5191_v54, %v2243_v43  ;;  %v6090_v49 = vpop.eup %3442  ;;  %v7535_v19 = vld [vmem:[#allocation165_spill] sm:$0xff] }
 0x242   :  { %v2554_v25 = vmul.f32 %v5195_v55, %v2244_v51  ;;  %3152 = vst [vmem:[#allocation7 + $0x458] sm:$0xff] %v2858_v28  ;;  %3153 = vst [vmem:[#allocation7 + $0x460] sm:$0xff] %v2859_v0  ;;  %v2866_v59 = vadd.f32 %v5193_v4, %v2556_v50  ;;  %v2252_v39 = vmul.f32 %v3431_v14, %v7534_v16  ;;  %v6096_v53 = vpop.eup %3444  ;;  %v7536_v51 = vld [vmem:[#allocation166_spill] sm:$0xff]  ;;  %3458 = vrsqrt.f32 %v6027_v22 }
 0x243   :  { %v2867_v5 = vadd.f32 %v5197_v52, %v2557_v61  ;;  %v2253_v23 = vmul.f32 %v3431_v14, %v7535_v19  ;;  %v2868_v7 = vadd.f32 %v5217_v48, %v2558_v8  ;;  %v2555_v46 = vmul.f32 %v5208_v62, %v2245_v58  ;;  %v6102_v41 = vpop.eup %3446  ;;  %v7537_v61 = vld [vmem:[#allocation168_spill] sm:$0xff]  ;;  %v7538_v58 = vld [vmem:[#allocation169_spill] sm:$0xff] }
 0x244   :  { %v2863_v44 = vadd.f32 %v5193_v4, %v2553_v60  ;;  %v2864_v43 = vadd.f32 %v5197_v52, %v2554_v25  ;;  %3160 = vst [vmem:[#allocation7 + $0x498] sm:$0xff] %v2866_v59  ;;  %v2254_v28 = vmul.f32 %v3431_v14, %v7536_v51  ;;  %v2562_v0 = vmul.f32 %v5191_v54, %v2252_v39  ;;  %v7539_v25 = vld [vmem:[#allocation170_spill] sm:$0xff] }
 0x245   :  { %3161 = vst [vmem:[#allocation7 + $0x4a0] sm:$0xff] %v2867_v5  ;;  %v2563_v50 = vmul.f32 %v5195_v55, %v2253_v23  ;;  %v2249_v21 = vmul.f32 %v3433_v36, %v7537_v61  ;;  %v6108_v16 = vpop.eup %3448  ;;  %3162 = vst [vmem:[#allocation7 + $0x4a8] sm:$0xff] %v2868_v7  ;;  %v2865_v8 = vadd.f32 %v5217_v48, %v2555_v46  ;;  %v7540_v5 = vld [vmem:[#allocation172_spill] sm:$0xff]  ;;  %v6121_v46 = vpop.xlane.xlu1 %1704  ;;  %v7541_v61 = vld [vmem:[#allocation173_spill] sm:$0xff]  ;;  %v1871_v10 = vmul.f32 0.0026041667, %v6046_v34 }
 0x246   :  { %3157 = vst [vmem:[#allocation7 + $0x480] sm:$0xff] %v2863_v44  ;;  %3158 = vst [vmem:[#allocation7 + $0x488] sm:$0xff] %v2864_v43  ;;  %v2250_v60 = vmul.f32 %v3433_v36, %v7538_v58  ;;  %v2251_v59 = vmul.f32 %v3433_v36, %v7539_v25  ;;  %v2258_v14 = vmul.f32 %v6062_v1, %v7540_v5  ;;  %v6115_v19 = vpop.eup %3450  ;;  %v6123_v44 = vpop.xlane.xlu0 %1700  ;;  %v7542_v25 = vld [vmem:[#allocation174_spill] sm:$0xff]  ;;  %v7543_v5 = vld [vmem:[#allocation175_spill] sm:$0xff] }
 0x247   :  { %v2564_v39 = vmul.f32 %v5208_v62, %v2254_v28  ;;  %v2872_v23 = vadd.f32 %v5193_v4, %v2562_v0  ;;  %v2873_v51 = vadd.f32 %v5197_v52, %v2563_v50  ;;  %v2559_v7 = vmul.f32 %v5191_v54, %v2249_v21  ;;  %3159 = vst [vmem:[#allocation7 + $0x490] sm:$0xff] %v2865_v8 }
 0x248   :  { %v2560_v36 = vmul.f32 %v5195_v55, %v2250_v60  ;;  %v2561_v43 = vmul.f32 %v5208_v62, %v2251_v59  ;;  %v2259_v58 = vmul.f32 %v6062_v1, %v7541_v61  ;;  %v2260_v28 = vmul.f32 %v6062_v1, %v7542_v25 }
 0x249   :  { %v2874_v0 = vadd.f32 %v5217_v48, %v2564_v39  ;;  %3166 = vst [vmem:[#allocation7 + $0x4c8] sm:$0xff] %v2872_v23  ;;  %3167 = vst [vmem:[#allocation7 + $0x4d0] sm:$0xff] %v2873_v51  ;;  %v2869_v50 = vadd.f32 %v5193_v4, %v2559_v7  ;;  %v2568_v21 = vmul.f32 %v5191_v54, %v2258_v14  ;;  %v7544_v39 = vld [vmem:[#allocation176_spill] sm:$0xff]  ;;  %v7545_v51 = vld [vmem:[#allocation177_spill] sm:$0xff] }
 0x24a   :  { %v2255_v8 = vmul.f32 %v6068_v40, %v7543_v5  ;;  %v2870_v60 = vadd.f32 %v5197_v52, %v2560_v36  ;;  %v2871_v59 = vadd.f32 %v5217_v48, %v2561_v43  ;;  %v2569_v61 = vmul.f32 %v5195_v55, %v2259_v58  ;;  %v7546_v58 = vld [vmem:[#allocation178_spill] sm:$0xff]  ;;  %v7548_v5 = vld [vmem:[#allocation180_spill] sm:$0xff] }
 0x24b   :  { %v2570_v27 = vmul.f32 %v5208_v62, %v2260_v28  ;;  %3168 = vst [vmem:[#allocation7 + $0x4d8] sm:$0xff] %v2874_v0  ;;  %3163 = vst [vmem:[#allocation7 + $0x4b0] sm:$0xff] %v2869_v50  ;;  %v2878_v1 = vadd.f32 %v5193_v4, %v2568_v21  ;;  %v2256_v23 = vmul.f32 %v6068_v40, %v7544_v39  ;;  %v7547_v28 = vld [vmem:[#allocation179_spill] sm:$0xff] }
 0x24c   :  { %v2257_v14 = vmul.f32 %v6068_v40, %v7545_v51  ;;  %v2565_v7 = vmul.f32 %v5191_v54, %v2255_v8  ;;  %3164 = vst [vmem:[#allocation7 + $0x4b8] sm:$0xff] %v2870_v60  ;;  %3165 = vst [vmem:[#allocation7 + $0x4c0] sm:$0xff] %v2871_v59  ;;  %v2879_v36 = vadd.f32 %v5197_v52, %v2569_v61  ;;  %v6157_v60 = vpop.xlane.xlu1 %1712  ;;  %v6159_v59 = vpop.xlane.xlu0 %1708 }
 0x24d   :  { %v2880_v43 = vadd.f32 %v5217_v48, %v2570_v27  ;;  %v2264_v25 = vmul.f32 %v6074_v42, %v7546_v58  ;;  %v2265_v0 = vmul.f32 %v6074_v42, %v7547_v28  ;;  %3172 = vst [vmem:[#allocation7 + $0x4f8] sm:$0xff] %v2878_v1  ;;  %v2566_v50 = vmul.f32 %v5195_v55, %v2256_v23  ;;  %v7549_v1 = vld [vmem:[#allocation181_spill] sm:$0xff]  ;;  %v7550_v23 = vld [vmem:[#allocation182_spill] sm:$0xff]  ;;  %v7551_v58 = vld [vmem:[#allocation183_spill] sm:$0xff] }
 0x24e   :  { %v2567_v21 = vmul.f32 %v5208_v62, %v2257_v14  ;;  %v2875_v40 = vadd.f32 %v5193_v4, %v2565_v7  ;;  %v2266_v8 = vmul.f32 %v6074_v42, %v7548_v5  ;;  %3173 = vst [vmem:[#allocation7 + $0x500] sm:$0xff] %v2879_v36  ;;  %v2261_v39 = vmul.f32 %v6084_v37, %v7549_v1  ;;  %v7554_v1 = vld [vmem:[#allocation186_spill] sm:$0xff] }
 0x24f   :  { %3174 = vst [vmem:[#allocation7 + $0x508] sm:$0xff] %v2880_v43  ;;  %v2574_v27 = vmul.f32 %v5191_v54, %v2264_v25  ;;  %v2575_v61 = vmul.f32 %v5195_v55, %v2265_v0  ;;  %v2262_v51 = vmul.f32 %v6084_v37, %v7550_v23  ;;  %v2876_v14 = vadd.f32 %v5197_v52, %v2566_v50  ;;  %v7555_v23 = vld [vmem:[#allocation187_spill] sm:$0xff] }
 0x250   :  { %v2877_v42 = vadd.f32 %v5217_v48, %v2567_v21  ;;  %3169 = vst [vmem:[#allocation7 + $0x4e0] sm:$0xff] %v2875_v40  ;;  %v2576_v7 = vmul.f32 %v5208_v62, %v2266_v8  ;;  %v2263_v36 = vmul.f32 %v6084_v37, %v7551_v58  ;;  %v2571_v28 = vmul.f32 %v5191_v54, %v2261_v39  ;;  %v7552_v40 = vld [vmem:[#allocation184_spill] sm:$0xff]  ;;  %v7553_v8 = vld [vmem:[#allocation185_spill] sm:$0xff] }
 0x251   :  { %v2884_v43 = vadd.f32 %v5193_v4, %v2574_v27  ;;  %v2885_v25 = vadd.f32 %v5197_v52, %v2575_v61  ;;  %v2572_v0 = vmul.f32 %v5195_v55, %v2262_v51  ;;  %3170 = vst [vmem:[#allocation7 + $0x4e8] sm:$0xff] %v2876_v14  ;;  %v2270_v5 = vmul.f32 %v6090_v49, %v7552_v40  ;;  %v7556_v58 = vld [vmem:[#allocation188_spill] sm:$0xff] }
 0x252   :  { %3171 = vst [vmem:[#allocation7 + $0x4f0] sm:$0xff] %v2877_v42  ;;  %v2886_v50 = vadd.f32 %v5217_v48, %v2576_v7  ;;  %v2573_v21 = vmul.f32 %v5208_v62, %v2263_v36  ;;  %v2271_v37 = vmul.f32 %v6090_v49, %v7553_v8  ;;  %v2881_v27 = vadd.f32 %v5193_v4, %v2571_v28  ;;  %v7557_v28 = vld [vmem:[#allocation189_spill] sm:$0xff] }
 0x253   :  { %3178 = vst [vmem:[#allocation7 + $0x528] sm:$0xff] %v2884_v43  ;;  %3179 = vst [vmem:[#allocation7 + $0x530] sm:$0xff] %v2885_v25  ;;  %v2882_v61 = vadd.f32 %v5197_v52, %v2572_v0  ;;  %v2272_v39 = vmul.f32 %v6090_v49, %v7554_v1  ;;  %v2267_v51 = vmul.f32 %v6096_v53, %v7555_v23  ;;  %v6193_v43 = vpop.xlane.xlu1 %1720  ;;  %v6195_v25 = vpop.xlane.xlu0 %1716  ;;  %v7559_v1 = vld [vmem:[#allocation191_spill] sm:$0xff]  ;;  %v7560_v23 = vld [vmem:[#allocation192_spill] sm:$0xff] }
 0x254   :  { %3180 = vst [vmem:[#allocation7 + $0x538] sm:$0xff] %v2886_v50  ;;  %v2883_v14 = vadd.f32 %v5217_v48, %v2573_v21  ;;  %v2580_v42 = vmul.f32 %v5191_v54, %v2270_v5  ;;  %v2581_v7 = vmul.f32 %v5195_v55, %v2271_v37  ;;  %v2268_v36 = vmul.f32 %v6096_v53, %v7556_v58  ;;  %v7558_v21 = vld [vmem:[#allocation190_spill] sm:$0xff]  ;;  %v7561_v58 = vld [vmem:[#allocation193_spill] sm:$0xff] }
 0x255   :  { %3175 = vst [vmem:[#allocation7 + $0x510] sm:$0xff] %v2881_v27  ;;  %3176 = vst [vmem:[#allocation7 + $0x518] sm:$0xff] %v2882_v61  ;;  %v2582_v49 = vmul.f32 %v5208_v62, %v2272_v39  ;;  %v2269_v0 = vmul.f32 %v6096_v53, %v7557_v28  ;;  %v2577_v50 = vmul.f32 %v5191_v54, %v2267_v51 }
 0x256   :  { %v2276_v40 = vmul.f32 %v6102_v41, %v7558_v21  ;;  %3177 = vst [vmem:[#allocation7 + $0x520] sm:$0xff] %v2883_v14  ;;  %v2890_v5 = vadd.f32 %v5193_v4, %v2580_v42  ;;  %v2891_v8 = vadd.f32 %v5197_v52, %v2581_v7  ;;  %v2578_v37 = vmul.f32 %v5195_v55, %v2268_v36 }
 0x257   :  { %v2277_v27 = vmul.f32 %v6102_v41, %v7559_v1  ;;  %v2892_v61 = vadd.f32 %v5217_v48, %v2582_v49  ;;  %v2579_v39 = vmul.f32 %v5208_v62, %v2269_v0  ;;  %v2887_v53 = vadd.f32 %v5193_v4, %v2577_v50  ;;  %v7562_v0 = vld [vmem:[#allocation194_spill] sm:$0xff]  ;;  %v7563_v50 = vld [vmem:[#allocation195_spill] sm:$0xff] }
 0x258   :  { %v2278_v51 = vmul.f32 %v6102_v41, %v7560_v23  ;;  %3184 = vst [vmem:[#allocation7 + $0x558] sm:$0xff] %v2890_v5  ;;  %3185 = vst [vmem:[#allocation7 + $0x560] sm:$0xff] %v2891_v8  ;;  %v2888_v14 = vadd.f32 %v5197_v52, %v2578_v37  ;;  %v2586_v42 = vmul.f32 %v5191_v54, %v2276_v40  ;;  %v7564_v37 = vld [vmem:[#allocation137_spill] sm:$0xff]  ;;  %v7565_v23 = vld [vmem:[#allocation196_spill] sm:$0xff] }
 0x259   :  { %v2587_v7 = vmul.f32 %v5195_v55, %v2277_v27  ;;  %v2273_v36 = vmul.f32 %v6108_v16, %v7561_v58  ;;  %3186 = vst [vmem:[#allocation7 + $0x568] sm:$0xff] %v2892_v61  ;;  %v2889_v49 = vadd.f32 %v5217_v48, %v2579_v39  ;;  %3181 = vst [vmem:[#allocation7 + $0x540] sm:$0xff] %v2887_v53  ;;  %v1729_v27 = vpop.xlane.xlu1 %1728  ;;  %v6229_v61 = vpop.xlane.xlu0 %1724 }
 0x25a   :  { %v2588_v28 = vmul.f32 %v5208_v62, %v2278_v51  ;;  %v2274_v41 = vmul.f32 %v6108_v16, %v7562_v0  ;;  %v2275_v21 = vmul.f32 %v6108_v16, %v7563_v50  ;;  %3182 = vst [vmem:[#allocation7 + $0x548] sm:$0xff] %v2888_v14  ;;  %v2896_v40 = vadd.f32 %v5193_v4, %v2586_v42  ;;  %v7566_v42 = vld [vmem:[#allocation197_spill] sm:$0xff] }
 0x25b   :  { %v2897_v5 = vadd.f32 %v5197_v52, %v2587_v7  ;;  %v2583_v8 = vmul.f32 %v5191_v54, %v2273_v36  ;;  %v2282_v1 = vmul.f32 %v6115_v19, %v7564_v37  ;;  %3183 = vst [vmem:[#allocation7 + $0x550] sm:$0xff] %v2889_v49  ;;  %v2283_v51 = vmul.f32 %v6115_v19, %v7565_v23 }
 0x25c   :  { %v2898_v39 = vadd.f32 %v5217_v48, %v2588_v28  ;;  %v2584_v53 = vmul.f32 %v5195_v55, %v2274_v41  ;;  %v2585_v16 = vmul.f32 %v5208_v62, %v2275_v21  ;;  %3190 = vst [vmem:[#allocation7 + $0x588] sm:$0xff] %v2896_v40  ;;  %v2284_v7 = vmul.f32 %v6115_v19, %v7566_v42 }
 0x25d   :  { %3191 = vst [vmem:[#allocation7 + $0x590] sm:$0xff] %v2897_v5  ;;  %v2893_v14 = vadd.f32 %v5193_v4, %v2583_v8  ;;  %v2592_v58 = vmul.f32 %v5191_v54, %v2282_v1  ;;  %v2593_v28 = vmul.f32 %v5195_v55, %v2283_v51  ;;  %v1964_v19 = vadd.f32 1e-06, %v6029_v24  ;;  %v1737_v9 = vpop.xlane.xlu1 %1736  ;;  %v1733_v8 = vpop.xlane.xlu0 %1732 }
 0x25e   :  { %3192 = vst [vmem:[#allocation7 + $0x598] sm:$0xff] %v2898_v39  ;;  %v2894_v36 = vadd.f32 %v5197_v52, %v2584_v53  ;;  %v2895_v49 = vadd.f32 %v5217_v48, %v2585_v16  ;;  %v2594_v0 = vmul.f32 %v5208_v62, %v2284_v7  ;;  %v1967_v50 = vadd.f32 1e-06, %v6031_v15 }
 0x25f   :  { %3187 = vst [vmem:[#allocation7 + $0x570] sm:$0xff] %v2893_v14  ;;  %v2902_v41 = vadd.f32 %v5193_v4, %v2592_v58  ;;  %v2903_v32 = vadd.f32 %v5197_v52, %v2593_v28  ;;  %v1868_v21 = vmul.f32 0.0026041667, %v6022_v35  ;;  %v1870_v5 = vmul.f32 0.0026041667, %v6048_v11 }
 0x260   :  { %3188 = vst [vmem:[#allocation7 + $0x578] sm:$0xff] %v2894_v36  ;;  %3189 = vst [vmem:[#allocation7 + $0x580] sm:$0xff] %v2895_v49  ;;  %v2904_v40 = vadd.f32 %v5217_v48, %v2594_v0  ;;  %3460 = vrsqrt.f32 %v1964_v19  ;;  %v1873_v37 = vmul.f32 0.0026041667, %v6080_v45  ;;  %v1872_v15 = vmul.f32 0.0026041667, %v6082_v56 }
 0x261   :  { %3196 = vst [vmem:[#allocation7 + $0x5b8] sm:$0xff] %v2902_v41  ;;  %3197 = vst [vmem:[#allocation7 + $0x5c0] sm:$0xff] %v2903_v32  ;;  %v1966_v24 = vadd.f32 1e-06, %v1868_v21  ;;  %3462 = vrsqrt.f32 %v1967_v50  ;;  %v1969_v35 = vadd.f32 1e-06, %v1871_v10  ;;  %v1745_v7 = vpop.xlane.xlu1 %1744  ;;  %v1741_v58 = vpop.xlane.xlu0 %1740 }
 0x262   :  { %3198 = vst [vmem:[#allocation7 + $0x5c8] sm:$0xff] %v2904_v40  ;;  %v1968_v1 = vadd.f32 1e-06, %v1870_v5  ;;  %v1875_v39 = vmul.f32 0.0026041667, %v6121_v46  ;;  %v7567_v19 = vld [vmem:[#allocation198_spill] sm:$0xff] }
 0x263   :  { %3464 = vrsqrt.f32 %v1966_v24  ;;  %v1971_v22 = vadd.f32 1e-06, %v1873_v37  ;;  %v1970_v34 = vadd.f32 1e-06, %v1872_v15  ;;  %v1874_v11 = vmul.f32 0.0026041667, %v6123_v44 }
 0x264   :  { %3466 = vrsqrt.f32 %v1969_v35  ;;  %v1973_v53 = vadd.f32 1e-06, %v1875_v39  ;;  %v1877_v16 = vmul.f32 0.0026041667, %v6157_v60  ;;  %v1876_v23 = vmul.f32 0.0026041667, %v6159_v59 }
 0x265   :  { %3468 = vrsqrt.f32 %v1968_v1  ;;  %v1972_v45 = vadd.f32 1e-06, %v1874_v11  ;;  %v1879_v56 = vmul.f32 0.0026041667, %v6193_v43  ;;  %v1878_v51 = vmul.f32 0.0026041667, %v6195_v25  ;;  %v3453_v25 = vpop.eup %3452 }
 0x266   :  { %3470 = vrsqrt.f32 %v1971_v22  ;;  %v1975_v14 = vadd.f32 1e-06, %v1877_v16  ;;  %v1974_v46 = vadd.f32 1e-06, %v1876_v23  ;;  %v1881_v42 = vmul.f32 0.0026041667, %v1729_v27  ;;  %v3455_v41 = vpop.eup %3454 }
 0x267   :  { %3472 = vrsqrt.f32 %v1970_v34  ;;  %v6264_v44 = vadd.f32 1e-06, %v1879_v56  ;;  %v6266_v36 = vadd.f32 1e-06, %v1878_v51  ;;  %v1880_v60 = vmul.f32 0.0026041667, %v6229_v61  ;;  %v3457_v10 = vpop.eup %3456 }
 0x268   :  { %3474 = vrsqrt.f32 %v1973_v53  ;;  %v6269_v59 = vadd.f32 1e-06, %v1881_v42  ;;  %v6271_v49 = vmul.f32 0.0026041667, %v1737_v9  ;;  %v6273_v43 = vmul.f32 0.0026041667, %v1733_v8  ;;  %v3459_v11 = vpop.eup %3458 }
 0x269   :  { %3476 = vrsqrt.f32 %v1972_v45  ;;  %v6275_v28 = vadd.f32 1e-06, %v1880_v60  ;;  %v6277_v27 = vmul.f32 0.0026041667, %v1745_v7  ;;  %v6279_v0 = vmul.f32 0.0026041667, %v1741_v58 }
 0x26a   :  { %v2279_v32 = vmul.f32 %v3453_v25, %v7567_v19  ;;  %v7568_v50 = vld [vmem:[#allocation199_spill] sm:$0xff]  ;;  %v7569_v21 = vld [vmem:[#allocation200_spill] sm:$0xff]  ;;  %3478 = vrsqrt.f32 %v1975_v14  ;;  %v7570_v5 = vld [vmem:[#allocation201_spill] sm:$0xff] }
 0x26b   :  { %v2280_v61 = vmul.f32 %v3453_v25, %v7568_v50  ;;  %v2281_v40 = vmul.f32 %v3453_v25, %v7569_v21  ;;  %v2288_v9 = vmul.f32 %v3455_v41, %v7570_v5  ;;  %v7571_v8 = vld [vmem:[#allocation202_spill] sm:$0xff]  ;;  %v7572_v37 = vld [vmem:[#allocation203_spill] sm:$0xff]  ;;  %3480 = vrsqrt.f32 %v1974_v46  ;;  %v7574_v45 = vld [vmem:[#allocation204_spill] sm:$0xff] }
 0x26c   :  { %v2289_v24 = vmul.f32 %v3455_v41, %v7571_v8  ;;  %v2290_v15 = vmul.f32 %v3455_v41, %v7572_v37  ;;  %v2589_v35 = vmul.f32 %v5191_v54, %v2279_v32  ;;  %v7573_v22 = vld [vmem:[#allocation150_spill] sm:$0xff]  ;;  %v2286_v56 = vmul.f32 %v3457_v10, %v7574_v45  ;;  %v7575_v7 = vld [vmem:[#allocation205_spill] sm:$0xff]  ;;  %v6307_v8 = vpop.xlane.xlu1 %1752 }
 0x26d   :  { %v2590_v1 = vmul.f32 %v5195_v55, %v2280_v61  ;;  %v2591_v39 = vmul.f32 %v5208_v62, %v2281_v40  ;;  %v2285_v34 = vmul.f32 %v3457_v10, %v7573_v22  ;;  %v2598_v53 = vmul.f32 %v5191_v54, %v2288_v9  ;;  %v3461_v51 = vpop.eup %3460  ;;  %v7576_v40 = vld [vmem:[#allocation157_spill] sm:$0xff] }
 0x26e   :  { %v2599_v16 = vmul.f32 %v5195_v55, %v2289_v24  ;;  %v2600_v23 = vmul.f32 %v5208_v62, %v2290_v15  ;;  %v2899_v14 = vadd.f32 %v5193_v4, %v2589_v35  ;;  %v2287_v58 = vmul.f32 %v3457_v10, %v7575_v7  ;;  %v3463_v60 = vpop.eup %3462  ;;  %v7577_v10 = vld [vmem:[#allocation206_spill] sm:$0xff]  ;;  %v6309_v24 = vpop.xlane.xlu0 %1748  ;;  %v7578_v35 = vld [vmem:[#allocation207_spill] sm:$0xff] }
 0x26f   :  { %v2900_v46 = vadd.f32 %v5197_v52, %v2590_v1  ;;  %v2901_v42 = vadd.f32 %v5217_v48, %v2591_v39  ;;  %v2908_v25 = vadd.f32 %v5193_v4, %v2598_v53  ;;  %v2595_v32 = vmul.f32 %v5191_v54, %v2285_v34  ;;  %v7579_v39 = vld [vmem:[#allocation208_spill] sm:$0xff]  ;;  %v7580_v34 = vld [vmem:[#allocation209_spill] sm:$0xff] }
 0x270   :  { %v2909_v41 = vadd.f32 %v5197_v52, %v2599_v16  ;;  %v2910_v19 = vadd.f32 %v5217_v48, %v2600_v23  ;;  %v3465_v50 = vpop.eup %3464  ;;  %3193 = vst [vmem:[#allocation7 + $0x5a0] sm:$0xff] %v2899_v14  ;;  %v2596_v61 = vmul.f32 %v5195_v55, %v2286_v56  ;;  %v2597_v21 = vmul.f32 %v5208_v62, %v2287_v58 }
 0x271   :  { %3194 = vst [vmem:[#allocation7 + $0x5a8] sm:$0xff] %v2900_v46  ;;  %3195 = vst [vmem:[#allocation7 + $0x5b0] sm:$0xff] %v2901_v42  ;;  %v2294_v5 = vmul.f32 %v3459_v11, %v7576_v40  ;;  %v2295_v9 = vmul.f32 %v3459_v11, %v7577_v10  ;;  %v3467_v37 = vpop.eup %3466  ;;  %v2905_v15 = vadd.f32 %v5193_v4, %v2595_v32  ;;  %v7583_v40 = vld [vmem:[#allocation212_spill] sm:$0xff]  ;;  %3482 = vrsqrt.f32 %v6264_v44 }
 0x272   :  { %3202 = vst [vmem:[#allocation7 + $0x5e8] sm:$0xff] %v2908_v25  ;;  %3203 = vst [vmem:[#allocation7 + $0x5f0] sm:$0xff] %v2909_v41  ;;  %v2296_v1 = vmul.f32 %v3459_v11, %v7578_v35  ;;  %v2291_v22 = vmul.f32 %v3461_v51, %v7579_v39  ;;  %v2292_v53 = vmul.f32 %v3461_v51, %v7580_v34  ;;  %v6315_v16 = vpop.eup %3468  ;;  %v7581_v11 = vld [vmem:[#allocation210_spill] sm:$0xff]  ;;  %v7584_v39 = vld [vmem:[#allocation213_spill] sm:$0xff]  ;;  %3484 = vrsqrt.f32 %v6266_v36 }
 0x273   :  { %3204 = vst [vmem:[#allocation7 + $0x5f8] sm:$0xff] %v2910_v19  ;;  %v2906_v23 = vadd.f32 %v5197_v52, %v2596_v61  ;;  %v2907_v45 = vadd.f32 %v5217_v48, %v2597_v21  ;;  %v2604_v56 = vmul.f32 %v5191_v54, %v2294_v5  ;;  %v2605_v14 = vmul.f32 %v5195_v55, %v2295_v9  ;;  %v6321_v46 = vpop.eup %3470  ;;  %v7582_v61 = vld [vmem:[#allocation211_spill] sm:$0xff] }
 0x274   :  { %3199 = vst [vmem:[#allocation7 + $0x5d0] sm:$0xff] %v2905_v15  ;;  %v2606_v42 = vmul.f32 %v5208_v62, %v2296_v1  ;;  %v2293_v7 = vmul.f32 %v3461_v51, %v7581_v11  ;;  %v2601_v58 = vmul.f32 %v5191_v54, %v2291_v22  ;;  %v2602_v25 = vmul.f32 %v5195_v55, %v2292_v53  ;;  %v6327_v41 = vpop.eup %3472 }
 0x275   :  { %3200 = vst [vmem:[#allocation7 + $0x5d8] sm:$0xff] %v2906_v23  ;;  %3201 = vst [vmem:[#allocation7 + $0x5e0] sm:$0xff] %v2907_v45  ;;  %v2914_v19 = vadd.f32 %v5193_v4, %v2604_v56  ;;  %v2915_v32 = vadd.f32 %v5197_v52, %v2605_v14  ;;  %v2300_v21 = vmul.f32 %v3463_v60, %v7582_v61  ;;  %v6333_v10 = vpop.eup %3474  ;;  %v7585_v23 = vld [vmem:[#allocation167_spill] sm:$0xff]  ;;  %v6345_v56 = vpop.xlane.xlu1 %1760  ;;  %3486 = vrsqrt.f32 %v6269_v59 }
 0x276   :  { %v2301_v5 = vmul.f32 %v3463_v60, %v7583_v40  ;;  %v2916_v51 = vadd.f32 %v5217_v48, %v2606_v42  ;;  %v2603_v9 = vmul.f32 %v5208_v62, %v2293_v7  ;;  %v2911_v15 = vadd.f32 %v5193_v4, %v2601_v58  ;;  %v6339_v1 = vpop.eup %3476  ;;  %v6347_v14 = vpop.xlane.xlu0 %1756  ;;  %v7586_v7 = vld [vmem:[#allocation214_spill] sm:$0xff] }
 0x277   :  { %v2912_v35 = vadd.f32 %v5197_v52, %v2602_v25  ;;  %3208 = vst [vmem:[#allocation7 + $0x618] sm:$0xff] %v2914_v19  ;;  %3209 = vst [vmem:[#allocation7 + $0x620] sm:$0xff] %v2915_v32  ;;  %v2302_v22 = vmul.f32 %v3463_v60, %v7584_v39  ;;  %v2610_v34 = vmul.f32 %v5191_v54, %v2300_v21  ;;  %v6349_v42 = vpop.eup %3478  ;;  %v7587_v60 = vld [vmem:[#allocation215_spill] sm:$0xff]  ;;  %3488 = vrsqrt.f32 %v6275_v28 }
 0x278   :  { %v2611_v53 = vmul.f32 %v5195_v55, %v2301_v5  ;;  %v2297_v45 = vmul.f32 %v3465_v50, %v7585_v23  ;;  %3210 = vst [vmem:[#allocation7 + $0x628] sm:$0xff] %v2916_v51  ;;  %v2913_v11 = vadd.f32 %v5217_v48, %v2603_v9  ;;  %3205 = vst [vmem:[#allocation7 + $0x600] sm:$0xff] %v2911_v15  ;;  %v7588_v19 = vld [vmem:[#allocation171_spill] sm:$0xff]  ;;  %v6355_v61 = vpop.eup %3480  ;;  %v1982_v36 = vadd.f32 1e-06, %v6279_v0 }
 0x279   :  { %3206 = vst [vmem:[#allocation7 + $0x608] sm:$0xff] %v2912_v35  ;;  %v2298_v58 = vmul.f32 %v3465_v50, %v7586_v7  ;;  %v2299_v25 = vmul.f32 %v3465_v50, %v7587_v60  ;;  %v2306_v32 = vmul.f32 %v3467_v37, %v7588_v19  ;;  %v2612_v21 = vmul.f32 %v5208_v62, %v2302_v22  ;;  %v7589_v35 = vld [vmem:[#allocation216_spill] sm:$0xff]  ;;  %v7590_v50 = vld [vmem:[#allocation217_spill] sm:$0xff]  ;;  %v7592_v19 = vld [vmem:[#allocation219_spill] sm:$0xff] }
 0x27a   :  { %v2920_v40 = vadd.f32 %v5193_v4, %v2610_v34  ;;  %v2921_v5 = vadd.f32 %v5197_v52, %v2611_v53  ;;  %v2607_v51 = vmul.f32 %v5191_v54, %v2297_v45  ;;  %3207 = vst [vmem:[#allocation7 + $0x610] sm:$0xff] %v2913_v11  ;;  %v2307_v39 = vmul.f32 %v3467_v37, %v7589_v35  ;;  %v7591_v53 = vld [vmem:[#allocation218_spill] sm:$0xff] }
 0x27b   :  { %v2608_v9 = vmul.f32 %v5195_v55, %v2298_v58  ;;  %v2609_v15 = vmul.f32 %v5208_v62, %v2299_v25  ;;  %v2308_v23 = vmul.f32 %v3467_v37, %v7590_v50  ;;  %v2922_v7 = vadd.f32 %v5217_v48, %v2612_v21 }
 0x27c   :  { %3214 = vst [vmem:[#allocation7 + $0x648] sm:$0xff] %v2920_v40  ;;  %3215 = vst [vmem:[#allocation7 + $0x650] sm:$0xff] %v2921_v5  ;;  %v2917_v22 = vadd.f32 %v5193_v4, %v2607_v51  ;;  %v2616_v34 = vmul.f32 %v5191_v54, %v2306_v32  ;;  %v2303_v45 = vmul.f32 %v6315_v16, %v7591_v53  ;;  %v7593_v40 = vld [vmem:[#allocation220_spill] sm:$0xff]  ;;  %v6380_v51 = vpop.xlane.xlu1 %1768  ;;  %v7596_v53 = vld [vmem:[#allocation223_spill] sm:$0xff]  ;;  %v1886_v59 = vmul.f32 0.0026041667, %v6309_v24 }
 0x27d   :  { %v2918_v11 = vadd.f32 %v5197_v52, %v2608_v9  ;;  %v2919_v58 = vadd.f32 %v5217_v48, %v2609_v15  ;;  %v2617_v60 = vmul.f32 %v5195_v55, %v2307_v39  ;;  %v2618_v25 = vmul.f32 %v5208_v62, %v2308_v23  ;;  %3216 = vst [vmem:[#allocation7 + $0x658] sm:$0xff] %v2922_v7  ;;  %v6382_v9 = vpop.xlane.xlu0 %1764  ;;  %v7594_v39 = vld [vmem:[#allocation221_spill] sm:$0xff]  ;;  %v7595_v23 = vld [vmem:[#allocation222_spill] sm:$0xff] }
 0x27e   :  { %3211 = vst [vmem:[#allocation7 + $0x630] sm:$0xff] %v2917_v22  ;;  %v2926_v37 = vadd.f32 %v5193_v4, %v2616_v34  ;;  %v2304_v21 = vmul.f32 %v6315_v16, %v7592_v19  ;;  %v2305_v32 = vmul.f32 %v6315_v16, %v7593_v40  ;;  %v2613_v5 = vmul.f32 %v5191_v54, %v2303_v45  ;;  %v7598_v19 = vld [vmem:[#allocation225_spill] sm:$0xff] }
 0x27f   :  { %3212 = vst [vmem:[#allocation7 + $0x638] sm:$0xff] %v2918_v11  ;;  %3213 = vst [vmem:[#allocation7 + $0x640] sm:$0xff] %v2919_v58  ;;  %v2927_v15 = vadd.f32 %v5197_v52, %v2617_v60  ;;  %v2928_v35 = vadd.f32 %v5217_v48, %v2618_v25  ;;  %v2312_v50 = vmul.f32 %v6321_v46, %v7594_v39  ;;  %v7597_v60 = vld [vmem:[#allocation224_spill] sm:$0xff]  ;;  %v1891_v28 = vmul.f32 0.0026041667, %v6380_v51 }
 0x280   :  { %v2313_v7 = vmul.f32 %v6321_v46, %v7595_v23  ;;  %3220 = vst [vmem:[#allocation7 + $0x678] sm:$0xff] %v2926_v37  ;;  %v2614_v16 = vmul.f32 %v5195_v55, %v2304_v21  ;;  %v2615_v22 = vmul.f32 %v5208_v62, %v2305_v32  ;;  %v2923_v34 = vadd.f32 %v5193_v4, %v2613_v5 }
 0x281   :  { %v2314_v45 = vmul.f32 %v6321_v46, %v7596_v53  ;;  %3221 = vst [vmem:[#allocation7 + $0x680] sm:$0xff] %v2927_v15  ;;  %3222 = vst [vmem:[#allocation7 + $0x688] sm:$0xff] %v2928_v35  ;;  %v2622_v11 = vmul.f32 %v5191_v54, %v2312_v50  ;;  %v2309_v25 = vmul.f32 %v6327_v41, %v7597_v60  ;;  %v7599_v46 = vld [vmem:[#allocation226_spill] sm:$0xff]  ;;  %v6416_v53 = vpop.xlane.xlu1 %1776  ;;  %v7602_v60 = vld [vmem:[#allocation229_spill] sm:$0xff]  ;;  %v1890_v0 = vmul.f32 0.0026041667, %v6382_v9 }
 0x282   :  { %v2623_v58 = vmul.f32 %v5195_v55, %v2313_v7  ;;  %v2310_v37 = vmul.f32 %v6327_v41, %v7598_v19  ;;  %v2924_v21 = vadd.f32 %v5197_v52, %v2614_v16  ;;  %v2925_v40 = vadd.f32 %v5217_v48, %v2615_v22  ;;  %3217 = vst [vmem:[#allocation7 + $0x660] sm:$0xff] %v2923_v34  ;;  %v7600_v16 = vld [vmem:[#allocation227_spill] sm:$0xff]  ;;  %v7601_v34 = vld [vmem:[#allocation228_spill] sm:$0xff]  ;;  %v7603_v19 = vld [vmem:[#allocation230_spill] sm:$0xff] }
 0x283   :  { %v2624_v32 = vmul.f32 %v5208_v62, %v2314_v45  ;;  %v2311_v5 = vmul.f32 %v6327_v41, %v7599_v46  ;;  %v2932_v15 = vadd.f32 %v5193_v4, %v2622_v11  ;;  %v2619_v39 = vmul.f32 %v5191_v54, %v2309_v25  ;;  %v6418_v45 = vpop.xlane.xlu0 %1772  ;;  %v7604_v46 = vld [vmem:[#allocation231_spill] sm:$0xff] }
 0x284   :  { %v2933_v35 = vadd.f32 %v5197_v52, %v2623_v58  ;;  %v2620_v50 = vmul.f32 %v5195_v55, %v2310_v37  ;;  %3218 = vst [vmem:[#allocation7 + $0x668] sm:$0xff] %v2924_v21  ;;  %3219 = vst [vmem:[#allocation7 + $0x670] sm:$0xff] %v2925_v40  ;;  %v2318_v22 = vmul.f32 %v6333_v10, %v7600_v16  ;;  %v1989_v24 = vadd.f32 1e-06, %v1891_v28 }
 0x285   :  { %v2934_v23 = vadd.f32 %v5217_v48, %v2624_v32  ;;  %v2621_v7 = vmul.f32 %v5208_v62, %v2311_v5  ;;  %v2319_v41 = vmul.f32 %v6333_v10, %v7601_v34  ;;  %3226 = vst [vmem:[#allocation7 + $0x6a8] sm:$0xff] %v2932_v15  ;;  %v2929_v11 = vadd.f32 %v5193_v4, %v2619_v39  ;;  %v7607_v34 = vld [vmem:[#allocation234_spill] sm:$0xff] }
 0x286   :  { %3227 = vst [vmem:[#allocation7 + $0x6b0] sm:$0xff] %v2933_v35  ;;  %v2930_v58 = vadd.f32 %v5197_v52, %v2620_v50  ;;  %v2320_v25 = vmul.f32 %v6333_v10, %v7602_v60  ;;  %v2315_v37 = vmul.f32 %v6339_v1, %v7603_v19  ;;  %v2628_v40 = vmul.f32 %v5191_v54, %v2318_v22  ;;  %v7605_v35 = vld [vmem:[#allocation232_spill] sm:$0xff]  ;;  %v7606_v50 = vld [vmem:[#allocation233_spill] sm:$0xff]  ;;  %v7608_v60 = vld [vmem:[#allocation235_spill] sm:$0xff] }
 0x287   :  { %3228 = vst [vmem:[#allocation7 + $0x6b8] sm:$0xff] %v2934_v23  ;;  %v2931_v21 = vadd.f32 %v5217_v48, %v2621_v7  ;;  %v2629_v32 = vmul.f32 %v5195_v55, %v2319_v41  ;;  %v2316_v5 = vmul.f32 %v6339_v1, %v7604_v46  ;;  %3223 = vst [vmem:[#allocation7 + $0x690] sm:$0xff] %v2929_v11  ;;  %v1785_v46 = vpop.xlane.xlu1 %1784 }
 0x288   :  { %3224 = vst [vmem:[#allocation7 + $0x698] sm:$0xff] %v2930_v58  ;;  %v2630_v15 = vmul.f32 %v5208_v62, %v2320_v25  ;;  %v2317_v10 = vmul.f32 %v6339_v1, %v7605_v35  ;;  %v2625_v39 = vmul.f32 %v5191_v54, %v2315_v37  ;;  %v2324_v23 = vmul.f32 %v6349_v42, %v7606_v50 }
 0x289   :  { %3225 = vst [vmem:[#allocation7 + $0x6a0] sm:$0xff] %v2931_v21  ;;  %v2938_v7 = vadd.f32 %v5193_v4, %v2628_v40  ;;  %v2939_v16 = vadd.f32 %v5197_v52, %v2629_v32  ;;  %v2626_v22 = vmul.f32 %v5195_v55, %v2316_v5  ;;  %v2325_v41 = vmul.f32 %v6349_v42, %v7607_v34  ;;  %v7609_v40 = vld [vmem:[#allocation236_spill] sm:$0xff]  ;;  %v1781_v5 = vpop.xlane.xlu0 %1780 }
 0x28a   :  { %v2940_v11 = vadd.f32 %v5217_v48, %v2630_v15  ;;  %v2627_v58 = vmul.f32 %v5208_v62, %v2317_v10  ;;  %v2935_v1 = vadd.f32 %v5193_v4, %v2625_v39  ;;  %v2326_v25 = vmul.f32 %v6349_v42, %v7608_v60  ;;  %v7610_v42 = vld [vmem:[#allocation237_spill] sm:$0xff]  ;;  %v7611_v39 = vld [vmem:[#allocation238_spill] sm:$0xff] }
 0x28b   :  { %3232 = vst [vmem:[#allocation7 + $0x6d8] sm:$0xff] %v2938_v7  ;;  %3233 = vst [vmem:[#allocation7 + $0x6e0] sm:$0xff] %v2939_v16  ;;  %v2936_v19 = vadd.f32 %v5197_v52, %v2626_v22  ;;  %v2634_v37 = vmul.f32 %v5191_v54, %v2324_v23  ;;  %v2635_v21 = vmul.f32 %v5195_v55, %v2325_v41  ;;  %v1983_v60 = vadd.f32 1e-06, %v6277_v27 }
 0x28c   :  { %v2321_v32 = vmul.f32 %v6355_v61, %v7609_v40  ;;  %3234 = vst [vmem:[#allocation7 + $0x6e8] sm:$0xff] %v2940_v11  ;;  %v2937_v15 = vadd.f32 %v5217_v48, %v2627_v58  ;;  %3229 = vst [vmem:[#allocation7 + $0x6c0] sm:$0xff] %v2935_v1  ;;  %v2636_v35 = vmul.f32 %v5208_v62, %v2326_v25  ;;  %v1981_v11 = vadd.f32 1e-06, %v6271_v49  ;;  %v1793_v49 = vpop.xlane.xlu1 %1792 }
 0x28d   :  { %v2322_v10 = vmul.f32 %v6355_v61, %v7610_v42  ;;  %v2323_v50 = vmul.f32 %v6355_v61, %v7611_v39  ;;  %3230 = vst [vmem:[#allocation7 + $0x6c8] sm:$0xff] %v2936_v19  ;;  %v2944_v23 = vadd.f32 %v5193_v4, %v2634_v37  ;;  %v2945_v7 = vadd.f32 %v5197_v52, %v2635_v21  ;;  %v1789_v19 = vpop.xlane.xlu0 %1788 }
 0x28e   :  { %v2631_v16 = vmul.f32 %v5191_v54, %v2321_v32  ;;  %3231 = vst [vmem:[#allocation7 + $0x6d0] sm:$0xff] %v2937_v15  ;;  %v2946_v22 = vadd.f32 %v5217_v48, %v2636_v35  ;;  %v1980_v58 = vadd.f32 1e-06, %v6273_v43  ;;  %3490 = vrsqrt.f32 %v1981_v11 }
 0x28f   :  { %v2632_v34 = vmul.f32 %v5195_v55, %v2322_v10  ;;  %v2633_v41 = vmul.f32 %v5208_v62, %v2323_v50  ;;  %3238 = vst [vmem:[#allocation7 + $0x708] sm:$0xff] %v2944_v23  ;;  %3239 = vst [vmem:[#allocation7 + $0x710] sm:$0xff] %v2945_v7  ;;  %v1887_v25 = vmul.f32 0.0026041667, %v6307_v8  ;;  %v1889_v43 = vmul.f32 0.0026041667, %v6345_v56 }
 0x290   :  { %v2941_v61 = vadd.f32 %v5193_v4, %v2631_v16  ;;  %3240 = vst [vmem:[#allocation7 + $0x718] sm:$0xff] %v2946_v22  ;;  %3492 = vrsqrt.f32 %v1980_v58  ;;  %v1888_v37 = vmul.f32 0.0026041667, %v6347_v14  ;;  %v1984_v21 = vadd.f32 1e-06, %v1886_v59  ;;  %v1801_v39 = vpop.xlane.xlu1 %1800  ;;  %v7614_v58 = vld [vmem:[#allocation241_spill] sm:$0xff] }
 0x291   :  { %v2942_v44 = vadd.f32 %v5197_v52, %v2632_v34  ;;  %v2943_v1 = vadd.f32 %v5217_v48, %v2633_v41  ;;  %3494 = vrsqrt.f32 %v1983_v60  ;;  %v1985_v27 = vadd.f32 1e-06, %v1887_v25  ;;  %v1797_v50 = vpop.xlane.xlu0 %1796  ;;  %v7612_v34 = vld [vmem:[#allocation239_spill] sm:$0xff]  ;;  %v7615_v60 = vld [vmem:[#allocation242_spill] sm:$0xff] }
 0x292   :  { %3235 = vst [vmem:[#allocation7 + $0x6f0] sm:$0xff] %v2941_v61  ;;  %3496 = vrsqrt.f32 %v1982_v36  ;;  %v1987_v8 = vadd.f32 1e-06, %v1889_v43  ;;  %v1986_v40 = vadd.f32 1e-06, %v1888_v37  ;;  %v7613_v61 = vld [vmem:[#allocation240_spill] sm:$0xff] }
 0x293   :  { %3236 = vst [vmem:[#allocation7 + $0x6f8] sm:$0xff] %v2942_v44  ;;  %3237 = vst [vmem:[#allocation7 + $0x700] sm:$0xff] %v2943_v1  ;;  %3498 = vrsqrt.f32 %v1985_v27  ;;  %v1988_v32 = vadd.f32 1e-06, %v1890_v0  ;;  %v1893_v15 = vmul.f32 0.0026041667, %v6416_v53  ;;  %v3483_v53 = vpop.eup %3482 }
 0x294   :  { %v1892_v35 = vmul.f32 0.0026041667, %v6418_v45  ;;  %3500 = vrsqrt.f32 %v1984_v21  ;;  %v1895_v56 = vmul.f32 0.0026041667, %v1785_v46  ;;  %v1894_v14 = vmul.f32 0.0026041667, %v1781_v5  ;;  %v3485_v22 = vpop.eup %3484 }
 0x295   :  { %v1897_v42 = vmul.f32 0.0026041667, %v1793_v49  ;;  %3502 = vrsqrt.f32 %v1987_v8  ;;  %v1991_v51 = vadd.f32 1e-06, %v1893_v15  ;;  %v1896_v10 = vmul.f32 0.0026041667, %v1789_v19  ;;  %v3487_v1 = vpop.eup %3486 }
 0x296   :  { %3504 = vrsqrt.f32 %v1986_v40  ;;  %v1990_v9 = vadd.f32 1e-06, %v1892_v35  ;;  %v6483_v23 = vadd.f32 1e-06, %v1895_v56  ;;  %v6485_v7 = vadd.f32 1e-06, %v1894_v14  ;;  %v3489_v43 = vpop.eup %3488 }
 0x297   :  { %3506 = vrsqrt.f32 %v1989_v24  ;;  %v6487_v16 = vadd.f32 1e-06, %v1897_v42  ;;  %v6489_v45 = vadd.f32 1e-06, %v1896_v10  ;;  %v6491_v46 = vmul.f32 0.0026041667, %v1801_v39 }
 0x298   :  { %3508 = vrsqrt.f32 %v1988_v32  ;;  %v6493_v5 = vmul.f32 0.0026041667, %v1797_v50  ;;  %v2330_v41 = vmul.f32 %v3483_v53, %v7612_v34  ;;  %v2331_v11 = vmul.f32 %v3483_v53, %v7613_v61  ;;  %v7616_v25 = vld [vmem:[#allocation243_spill] sm:$0xff]  ;;  %v7617_v49 = vld [vmem:[#allocation244_spill] sm:$0xff] }
 0x299   :  { %v2332_v44 = vmul.f32 %v3483_v53, %v7614_v58  ;;  %3510 = vrsqrt.f32 %v1991_v51  ;;  %v2327_v36 = vmul.f32 %v3485_v22, %v7615_v60  ;;  %v2328_v59 = vmul.f32 %v3485_v22, %v7616_v25 }
 0x29a   :  { %v2329_v19 = vmul.f32 %v3485_v22, %v7617_v49  ;;  %3512 = vrsqrt.f32 %v1990_v9  ;;  %v2640_v37 = vmul.f32 %v5191_v54, %v2330_v41  ;;  %v2641_v28 = vmul.f32 %v5195_v55, %v2331_v11  ;;  %v7618_v11 = vld [vmem:[#allocation246_spill] sm:$0xff] }
 0x29b   :  { %v2642_v27 = vmul.f32 %v5208_v62, %v2332_v44  ;;  %v2336_v21 = vmul.f32 %v3487_v1, %v5021_v3  ;;  %v3491_v0 = vpop.eup %3490  ;;  %v2637_v8 = vmul.f32 %v5191_v54, %v2327_v36  ;;  %v2638_v40 = vmul.f32 %v5195_v55, %v2328_v59  ;;  %v7619_v44 = vld [vmem:[#allocation247_spill] sm:$0xff] }
 0x29c   :  { %v2639_v24 = vmul.f32 %v5208_v62, %v2329_v19  ;;  %v2337_v32 = vmul.f32 %v3487_v1, %v7356_v38  ;;  %v2950_v35 = vadd.f32 %v5193_v4, %v2640_v37  ;;  %v2951_v56 = vadd.f32 %v5197_v52, %v2641_v28 }
 0x29d   :  { %v3493_v15 = vpop.eup %3492  ;;  %v2952_v14 = vadd.f32 %v5217_v48, %v2642_v27  ;;  %v2338_v42 = vmul.f32 %v3487_v1, %v5025_v6  ;;  %v2947_v3 = vadd.f32 %v5193_v4, %v2637_v8  ;;  %v2948_v10 = vadd.f32 %v5197_v52, %v2638_v40  ;;  %v7621_v8 = vld [vmem:[#allocation249_spill] sm:$0xff] }
 0x29e   :  { %v3495_v51 = vpop.eup %3494  ;;  %v2949_v39 = vadd.f32 %v5217_v48, %v2639_v24  ;;  %v2646_v50 = vmul.f32 %v5191_v54, %v2336_v21  ;;  %3244 = vst [vmem:[#allocation7 + $0x738] sm:$0xff] %v2950_v35  ;;  %3245 = vst [vmem:[#allocation7 + $0x740] sm:$0xff] %v2951_v56  ;;  %v2647_v38 = vmul.f32 %v5195_v55, %v2337_v32  ;;  %v7622_v24 = vld [vmem:[#allocation250_spill] sm:$0xff]  ;;  %3514 = vrsqrt.f32 %v6483_v23 }
 0x29f   :  { %v6517_v9 = vpop.eup %3496  ;;  %3246 = vst [vmem:[#allocation7 + $0x748] sm:$0xff] %v2952_v14  ;;  %v2648_v53 = vmul.f32 %v5208_v62, %v2338_v42  ;;  %v2333_v6 = vmul.f32 %v3489_v43, %v5030_v12  ;;  %v2334_v22 = vmul.f32 %v3489_v43, %v5032_v29  ;;  %3241 = vst [vmem:[#allocation7 + $0x720] sm:$0xff] %v2947_v3  ;;  %3516 = vrsqrt.f32 %v6485_v7 }
 0x2a0   :  { %v6523_v34 = vpop.eup %3498  ;;  %3242 = vst [vmem:[#allocation7 + $0x728] sm:$0xff] %v2948_v10  ;;  %3243 = vst [vmem:[#allocation7 + $0x730] sm:$0xff] %v2949_v39  ;;  %v2956_v41 = vadd.f32 %v5193_v4, %v2646_v50  ;;  %v2335_v61 = vmul.f32 %v3489_v43, %v5034_v17  ;;  %v2342_v58 = vmul.f32 %v3491_v0, %v7618_v11  ;;  %v7620_v17 = vld [vmem:[#allocation248_spill] sm:$0xff]  ;;  %v7623_v10 = vld [vmem:[#allocation251_spill] sm:$0xff]  ;;  %3518 = vrsqrt.f32 %v6487_v16 }
 0x2a1   :  { %v2343_v1 = vmul.f32 %v3491_v0, %v7619_v44  ;;  %v6529_v60 = vpop.eup %3500  ;;  %v2957_v36 = vadd.f32 %v5197_v52, %v2647_v38  ;;  %v2958_v12 = vadd.f32 %v5217_v48, %v2648_v53  ;;  %v2643_v29 = vmul.f32 %v5191_v54, %v2333_v6  ;;  %v7624_v53 = vld [vmem:[#allocation252_spill] sm:$0xff]  ;;  %v7645_v16 = vld [vmem:[#allocation279_spill] sm:$0xff] }
 0x2a2   :  { %v2644_v25 = vmul.f32 %v5195_v55, %v2334_v22  ;;  %v6535_v59 = vpop.eup %3502  ;;  %3250 = vst [vmem:[#allocation7 + $0x768] sm:$0xff] %v2956_v41  ;;  %v2645_v49 = vmul.f32 %v5208_v62, %v2335_v61  ;;  %v2344_v19 = vmul.f32 %v3491_v0, %v7620_v17  ;;  %v2652_v43 = vmul.f32 %v5191_v54, %v2342_v58  ;;  %v7625_v61 = vld [vmem:[#allocation253_spill] sm:$0xff]  ;;  %v7626_v58 = vld [vmem:[#allocation254_spill] sm:$0xff] }
 0x2a3   :  { %v2653_v37 = vmul.f32 %v5195_v55, %v2343_v1  ;;  %v6541_v28 = vpop.eup %3504  ;;  %3251 = vst [vmem:[#allocation7 + $0x770] sm:$0xff] %v2957_v36  ;;  %3252 = vst [vmem:[#allocation7 + $0x778] sm:$0xff] %v2958_v12  ;;  %v2953_v27 = vadd.f32 %v5193_v4, %v2643_v29  ;;  %v2339_v40 = vmul.f32 %v3493_v15, %v7621_v8  ;;  %v7627_v1 = vld [vmem:[#allocation255_spill] sm:$0xff]  ;;  %3520 = vrsqrt.f32 %v6489_v45  ;;  %v7648_v45 = vld [vmem:[#allocation284_spill] sm:$0xff] }
 0x2a4   :  { %v2954_v21 = vadd.f32 %v5197_v52, %v2644_v25  ;;  %v2340_v32 = vmul.f32 %v3493_v15, %v7622_v24  ;;  %v6547_v35 = vpop.eup %3506  ;;  %v2955_v0 = vadd.f32 %v5217_v48, %v2645_v49  ;;  %v2654_v56 = vmul.f32 %v5208_v62, %v2344_v19  ;;  %v7630_v24 = vld [vmem:[#allocation258_spill] sm:$0xff] }
 0x2a5   :  { %v2962_v14 = vadd.f32 %v5193_v4, %v2652_v43  ;;  %v2963_v42 = vadd.f32 %v5197_v52, %v2653_v37  ;;  %v6553_v3 = vpop.eup %3508  ;;  %3247 = vst [vmem:[#allocation7 + $0x750] sm:$0xff] %v2953_v27  ;;  %v2341_v39 = vmul.f32 %v3493_v15, %v7623_v10  ;;  %v2649_v50 = vmul.f32 %v5191_v54, %v2339_v40  ;;  %v7628_v43 = vld [vmem:[#allocation256_spill] sm:$0xff]  ;;  %v7629_v37 = vld [vmem:[#allocation257_spill] sm:$0xff] }
 0x2a6   :  { %3248 = vst [vmem:[#allocation7 + $0x758] sm:$0xff] %v2954_v21  ;;  %v2650_v38 = vmul.f32 %v5195_v55, %v2340_v32  ;;  %v2348_v6 = vmul.f32 %v3495_v51, %v7624_v53  ;;  %v6559_v22 = vpop.eup %3510  ;;  %3249 = vst [vmem:[#allocation7 + $0x760] sm:$0xff] %v2955_v0  ;;  %v2964_v41 = vadd.f32 %v5217_v48, %v2654_v56  ;;  %v1996_v7 = vadd.f32 1e-06, %v6493_v5 }
 0x2a7   :  { %3256 = vst [vmem:[#allocation7 + $0x798] sm:$0xff] %v2962_v14  ;;  %3257 = vst [vmem:[#allocation7 + $0x7a0] sm:$0xff] %v2963_v42  ;;  %v2349_v11 = vmul.f32 %v3495_v51, %v7625_v61  ;;  %v2350_v44 = vmul.f32 %v3495_v51, %v7626_v58  ;;  %v2345_v15 = vmul.f32 %v6517_v9, %v7627_v1  ;;  %v6566_v36 = vpop.eup %3512 }
 0x2a8   :  { %v2651_v12 = vmul.f32 %v5208_v62, %v2341_v39  ;;  %v2959_v29 = vadd.f32 %v5193_v4, %v2649_v50  ;;  %v2960_v25 = vadd.f32 %v5197_v52, %v2650_v38  ;;  %v2658_v49 = vmul.f32 %v5191_v54, %v2348_v6  ;;  %3258 = vst [vmem:[#allocation7 + $0x7a8] sm:$0xff] %v2964_v41 }
 0x2a9   :  { %v2659_v17 = vmul.f32 %v5195_v55, %v2349_v11  ;;  %v2660_v19 = vmul.f32 %v5208_v62, %v2350_v44  ;;  %v2346_v51 = vmul.f32 %v6517_v9, %v7628_v43  ;;  %v2347_v27 = vmul.f32 %v6517_v9, %v7629_v37  ;;  %v7633_v43 = vld [vmem:[#allocation264_spill] sm:$0xff]  ;;  %v7634_v37 = vld [vmem:[#allocation265_spill] sm:$0xff] }
 0x2aa   :  { %v2961_v21 = vadd.f32 %v5217_v48, %v2651_v12  ;;  %3253 = vst [vmem:[#allocation7 + $0x780] sm:$0xff] %v2959_v29  ;;  %3254 = vst [vmem:[#allocation7 + $0x788] sm:$0xff] %v2960_v25  ;;  %v2968_v8 = vadd.f32 %v5193_v4, %v2658_v49  ;;  %v2655_v40 = vmul.f32 %v5191_v54, %v2345_v15 }
 0x2ab   :  { %v2354_v32 = vmul.f32 %v6523_v34, %v7630_v24  ;;  %v2969_v0 = vadd.f32 %v5197_v52, %v2659_v17  ;;  %v2970_v56 = vadd.f32 %v5217_v48, %v2660_v19  ;;  %v2656_v14 = vmul.f32 %v5195_v55, %v2346_v51  ;;  %v7636_v24 = vld [vmem:[#allocation267_spill] sm:$0xff] }
 0x2ac   :  { %v2657_v42 = vmul.f32 %v5208_v62, %v2347_v27  ;;  %3255 = vst [vmem:[#allocation7 + $0x790] sm:$0xff] %v2961_v21  ;;  %3262 = vst [vmem:[#allocation7 + $0x7c8] sm:$0xff] %v2968_v8  ;;  %v2965_v9 = vadd.f32 %v5193_v4, %v2655_v40  ;;  %v2355_v10 = vmul.f32 %v6523_v34, %v5103_v13  ;;  %v7635_v8 = vld [vmem:[#allocation266_spill] sm:$0xff] }
 0x2ad   :  { %v2356_v39 = vmul.f32 %v6523_v34, %v7389_v30  ;;  %v2664_v50 = vmul.f32 %v5191_v54, %v2354_v32  ;;  %3263 = vst [vmem:[#allocation7 + $0x7d0] sm:$0xff] %v2969_v0  ;;  %3264 = vst [vmem:[#allocation7 + $0x7d8] sm:$0xff] %v2970_v56  ;;  %v2966_v38 = vadd.f32 %v5197_v52, %v2656_v14 }
 0x2ae   :  { %v2967_v53 = vadd.f32 %v5217_v48, %v2657_v42  ;;  %v2351_v6 = vmul.f32 %v6529_v60, %v5108_v20  ;;  %v2352_v41 = vmul.f32 %v6529_v60, %v7390_v33  ;;  %3259 = vst [vmem:[#allocation7 + $0x7b0] sm:$0xff] %v2965_v9  ;;  %v2665_v13 = vmul.f32 %v5195_v55, %v2355_v10  ;;  %v7631_v33 = vld [vmem:[#allocation262_spill] sm:$0xff]  ;;  %v7637_v42 = vld [vmem:[#allocation268_spill] sm:$0xff] }
 0x2af   :  { %v2666_v61 = vmul.f32 %v5208_v62, %v2356_v39  ;;  %v2974_v30 = vadd.f32 %v5193_v4, %v2664_v50  ;;  %v2353_v34 = vmul.f32 %v6529_v60, %v7391_v18  ;;  %3260 = vst [vmem:[#allocation7 + $0x7b8] sm:$0xff] %v2966_v38  ;;  %v2360_v20 = vmul.f32 %v6535_v59, %v5127_v2  ;;  %v7632_v18 = vld [vmem:[#allocation263_spill] sm:$0xff]  ;;  %v7638_v39 = vld [vmem:[#allocation269_spill] sm:$0xff]  ;;  %v7639_v38 = vld [vmem:[#allocation270_spill] sm:$0xff] }
 0x2b0   :  { %3261 = vst [vmem:[#allocation7 + $0x7c0] sm:$0xff] %v2967_v53  ;;  %v2661_v11 = vmul.f32 %v5191_v54, %v2351_v6  ;;  %v2662_v58 = vmul.f32 %v5195_v55, %v2352_v41  ;;  %v2361_v44 = vmul.f32 %v6535_v59, %v7631_v33  ;;  %v2975_v1 = vadd.f32 %v5197_v52, %v2665_v13 }
 0x2b1   :  { %v2976_v15 = vadd.f32 %v5217_v48, %v2666_v61  ;;  %3268 = vst [vmem:[#allocation7 + $0x7f8] sm:$0xff] %v2974_v30  ;;  %v2663_v12 = vmul.f32 %v5208_v62, %v2353_v34  ;;  %v2362_v60 = vmul.f32 %v6535_v59, %v7632_v18  ;;  %v2670_v49 = vmul.f32 %v5191_v54, %v2360_v20  ;;  %v7640_v61 = vld [vmem:[#allocation271_spill] sm:$0xff] }
 0x2b2   :  { %v2971_v29 = vadd.f32 %v5193_v4, %v2661_v11  ;;  %v2972_v25 = vadd.f32 %v5197_v52, %v2662_v58  ;;  %v2671_v2 = vmul.f32 %v5195_v55, %v2361_v44  ;;  %3269 = vst [vmem:[#allocation7 + $0x800] sm:$0xff] %v2975_v1  ;;  %v2357_v51 = vmul.f32 %v6541_v28, %v7633_v43  ;;  %v7641_v58 = vld [vmem:[#allocation272_spill] sm:$0xff]  ;;  %v7643_v43 = vld [vmem:[#allocation277_spill] sm:$0xff] }
 0x2b3   :  { %3270 = vst [vmem:[#allocation7 + $0x808] sm:$0xff] %v2976_v15  ;;  %v2973_v17 = vadd.f32 %v5217_v48, %v2663_v12  ;;  %v2672_v19 = vmul.f32 %v5208_v62, %v2362_v60  ;;  %v2358_v59 = vmul.f32 %v6541_v28, %v7634_v37  ;;  %v2980_v27 = vadd.f32 %v5193_v4, %v2670_v49 }
 0x2b4   :  { %3265 = vst [vmem:[#allocation7 + $0x7e0] sm:$0xff] %v2971_v29  ;;  %3266 = vst [vmem:[#allocation7 + $0x7e8] sm:$0xff] %v2972_v25  ;;  %v2981_v21 = vadd.f32 %v5197_v52, %v2671_v2  ;;  %v2359_v40 = vmul.f32 %v6541_v28, %v7635_v8  ;;  %v2366_v32 = vmul.f32 %v6547_v35, %v7636_v24 }
 0x2b5   :  { %3267 = vst [vmem:[#allocation7 + $0x7f0] sm:$0xff] %v2973_v17  ;;  %v2982_v0 = vadd.f32 %v5217_v48, %v2672_v19  ;;  %v2667_v56 = vmul.f32 %v5191_v54, %v2357_v51  ;;  %v2668_v14 = vmul.f32 %v5195_v55, %v2358_v59  ;;  %v2367_v9 = vmul.f32 %v6547_v35, %v7637_v42  ;;  %v7644_v51 = vld [vmem:[#allocation278_spill] sm:$0xff] }
 0x2b6   :  { %3274 = vst [vmem:[#allocation7 + $0x828] sm:$0xff] %v2980_v27  ;;  %3275 = vst [vmem:[#allocation7 + $0x830] sm:$0xff] %v2981_v21  ;;  %v2669_v10 = vmul.f32 %v5208_v62, %v2359_v40  ;;  %v2368_v28 = vmul.f32 %v6547_v35, %v7638_v39  ;;  %v2676_v50 = vmul.f32 %v5191_v54, %v2366_v32 }
 0x2b7   :  { %v2363_v53 = vmul.f32 %v6553_v3, %v7639_v38  ;;  %3276 = vst [vmem:[#allocation7 + $0x838] sm:$0xff] %v2982_v0  ;;  %v2977_v6 = vadd.f32 %v5193_v4, %v2667_v56  ;;  %v2978_v41 = vadd.f32 %v5197_v52, %v2668_v14  ;;  %v2677_v13 = vmul.f32 %v5195_v55, %v2367_v9  ;;  %v3515_v0 = vpop.eup %3514 }
 0x2b8   :  { %v2364_v30 = vmul.f32 %v6553_v3, %v7640_v61  ;;  %v2979_v34 = vadd.f32 %v5217_v48, %v2669_v10  ;;  %v2678_v11 = vmul.f32 %v5208_v62, %v2368_v28  ;;  %v2986_v35 = vadd.f32 %v5193_v4, %v2676_v50  ;;  %v3517_v56 = vpop.eup %3516  ;;  %v7646_v10 = vld [vmem:[#allocation282_spill] sm:$0xff]  ;;  %v7647_v28 = vld [vmem:[#allocation283_spill] sm:$0xff] }
 0x2b9   :  { %v2365_v20 = vmul.f32 %v6553_v3, %v7641_v58  ;;  %3271 = vst [vmem:[#allocation7 + $0x810] sm:$0xff] %v2977_v6  ;;  %3272 = vst [vmem:[#allocation7 + $0x818] sm:$0xff] %v2978_v41  ;;  %v2987_v33 = vadd.f32 %v5197_v52, %v2677_v13  ;;  %v2673_v44 = vmul.f32 %v5191_v54, %v2363_v53  ;;  %v3519_v9 = vpop.eup %3518  ;;  %v7649_v41 = vld [vmem:[#allocation285_spill] sm:$0xff] }
 0x2ba   :  { %v2674_v1 = vmul.f32 %v5195_v55, %v2364_v30  ;;  %v2372_v15 = vmul.f32 %v6559_v22, %v7428_v26  ;;  %3273 = vst [vmem:[#allocation7 + $0x820] sm:$0xff] %v2979_v34  ;;  %v2988_v12 = vadd.f32 %v5217_v48, %v2678_v11  ;;  %3280 = vst [vmem:[#allocation7 + $0x858] sm:$0xff] %v2986_v35  ;;  %v7642_v26 = vld [vmem:[#allocation276_spill] sm:$0xff]  ;;  %v3521_v61 = vpop.eup %3520  ;;  %v7650_v34 = vld [vmem:[#allocation286_spill] sm:$0xff] }
 0x2bb   :  { %v2675_v18 = vmul.f32 %v5208_v62, %v2365_v20  ;;  %v2373_v3 = vmul.f32 %v6559_v22, %v7429_v47  ;;  %v2374_v60 = vmul.f32 %v6559_v22, %v7430_v63  ;;  %3281 = vst [vmem:[#allocation7 + $0x860] sm:$0xff] %v2987_v33  ;;  %v2983_v29 = vadd.f32 %v5193_v4, %v2673_v44  ;;  %v7651_v44 = vld [vmem:[#allocation287_spill] sm:$0xff] }
 0x2bc   :  { %v2984_v25 = vadd.f32 %v5197_v52, %v2674_v1  ;;  %v2682_v49 = vmul.f32 %v5191_v54, %v2372_v15  ;;  %v2369_v2 = vmul.f32 %v6566_v36, %v7642_v26  ;;  %3282 = vst [vmem:[#allocation7 + $0x868] sm:$0xff] %v2988_v12  ;;  %v2370_v63 = vmul.f32 %v6566_v36, %v7643_v43  ;;  %v7653_v26 = vld [vmem:[#allocation289_spill] sm:$0xff] }
 0x2bd   :  { %v2985_v17 = vadd.f32 %v5217_v48, %v2675_v18  ;;  %v2683_v19 = vmul.f32 %v5195_v55, %v2373_v3  ;;  %v2684_v47 = vmul.f32 %v5208_v62, %v2374_v60  ;;  %3277 = vst [vmem:[#allocation7 + $0x840] sm:$0xff] %v2983_v29  ;;  %v2371_v37 = vmul.f32 %v6566_v36, %v7644_v51  ;;  %v7656_v51 = vld [vmem:[#allocation292_spill] sm:$0xff] }
 0x2be   :  { %3278 = vst [vmem:[#allocation7 + $0x848] sm:$0xff] %v2984_v25  ;;  %v2992_v22 = vadd.f32 %v5193_v4, %v2682_v49  ;;  %v2679_v59 = vmul.f32 %v5191_v54, %v2369_v2  ;;  %v2680_v8 = vmul.f32 %v5195_v55, %v2370_v63  ;;  %v1997_v36 = vadd.f32 1e-06, %v6491_v46  ;;  %v7652_v25 = vld [vmem:[#allocation288_spill] sm:$0xff]  ;;  %v7655_v63 = vld [vmem:[#allocation291_spill] sm:$0xff] }
 0x2bf   :  { %3279 = vst [vmem:[#allocation7 + $0x850] sm:$0xff] %v2985_v17  ;;  %v2993_v27 = vadd.f32 %v5197_v52, %v2683_v19  ;;  %v2994_v21 = vadd.f32 %v5217_v48, %v2684_v47  ;;  %v2681_v40 = vmul.f32 %v5208_v62, %v2371_v37  ;;  %v2378_v14 = vmul.f32 %v3515_v0, %v7645_v16  ;;  %v7654_v47 = vld [vmem:[#allocation290_spill] sm:$0xff] }
 0x2c0   :  { %3286 = vst [vmem:[#allocation7 + $0x888] sm:$0xff] %v2992_v22  ;;  %v2989_v24 = vadd.f32 %v5193_v4, %v2679_v59  ;;  %v2990_v23 = vadd.f32 %v5197_v52, %v2680_v8  ;;  %3522 = vrsqrt.f32 %v1997_v36  ;;  %v2379_v46 = vmul.f32 %v3515_v0, %v7434_v31 }
 0x2c1   :  { %3287 = vst [vmem:[#allocation7 + $0x890] sm:$0xff] %v2993_v27  ;;  %3288 = vst [vmem:[#allocation7 + $0x898] sm:$0xff] %v2994_v21  ;;  %v2991_v32 = vadd.f32 %v5217_v48, %v2681_v40  ;;  %3524 = vrsqrt.f32 %v1996_v7  ;;  %v2380_v42 = vmul.f32 %v3515_v0, %v7435_v57  ;;  %v2375_v39 = vmul.f32 %v3517_v56, %v7646_v10 }
 0x2c2   :  { %3283 = vst [vmem:[#allocation7 + $0x870] sm:$0xff] %v2989_v24  ;;  %3284 = vst [vmem:[#allocation7 + $0x878] sm:$0xff] %v2990_v23  ;;  %v2376_v50 = vmul.f32 %v3517_v56, %v7647_v28  ;;  %v2377_v38 = vmul.f32 %v3517_v56, %v7648_v45  ;;  %v2688_v5 = vmul.f32 %v5191_v54, %v2378_v14  ;;  %v7657_v24 = vld [vmem:[#allocation293_spill] sm:$0xff]  ;;  %v7658_v56 = vld [vmem:[#allocation294_spill] sm:$0xff] }
 0x2c3   :  { %3285 = vst [vmem:[#allocation7 + $0x880] sm:$0xff] %v2991_v32  ;;  %v2689_v53 = vmul.f32 %v5195_v55, %v2379_v46  ;;  %v2690_v6 = vmul.f32 %v5208_v62, %v2380_v42  ;;  %v2384_v13 = vmul.f32 %v3519_v9, %v7649_v41  ;;  %v2685_v31 = vmul.f32 %v5191_v54, %v2375_v39  ;;  %v7659_v14 = vld [vmem:[#allocation295_spill] sm:$0xff]  ;;  %v7660_v28 = vld [vmem:[#allocation296_spill] sm:$0xff] }
 0x2c4   :  { %v2686_v57 = vmul.f32 %v5195_v55, %v2376_v50  ;;  %v2687_v30 = vmul.f32 %v5208_v62, %v2377_v38  ;;  %v2385_v11 = vmul.f32 %v3519_v9, %v7650_v34  ;;  %v2998_v58 = vadd.f32 %v5193_v4, %v2688_v5 }
 0x2c5   :  { %v2999_v20 = vadd.f32 %v5197_v52, %v2689_v53  ;;  %v3000_v33 = vadd.f32 %v5217_v48, %v2690_v6  ;;  %v2386_v1 = vmul.f32 %v3519_v9, %v7651_v44  ;;  %v2995_v15 = vadd.f32 %v5193_v4, %v2685_v31 }
 0x2c6   :  { %v2996_v12 = vadd.f32 %v5197_v52, %v2686_v57  ;;  %v2997_v18 = vadd.f32 %v5217_v48, %v2687_v30  ;;  %v2694_v3 = vmul.f32 %v5191_v54, %v2384_v13  ;;  %3292 = vst [vmem:[#allocation7 + $0x8b8] sm:$0xff] %v2998_v58  ;;  %v2695_v60 = vmul.f32 %v5195_v55, %v2385_v11 }
 0x2c7   :  { %3293 = vst [vmem:[#allocation7 + $0x8c0] sm:$0xff] %v2999_v20  ;;  %3294 = vst [vmem:[#allocation7 + $0x8c8] sm:$0xff] %v3000_v33  ;;  %v2696_v29 = vmul.f32 %v5208_v62, %v2386_v1  ;;  %v2381_v49 = vmul.f32 %v3521_v61, %v7652_v25  ;;  %v2382_v2 = vmul.f32 %v3521_v61, %v7653_v26 }
 0x2c8   :  { %3289 = vst [vmem:[#allocation7 + $0x8a0] sm:$0xff] %v2995_v15  ;;  %3290 = vst [vmem:[#allocation7 + $0x8a8] sm:$0xff] %v2996_v12  ;;  %v3004_v19 = vadd.f32 %v5193_v4, %v2694_v3  ;;  %v2383_v43 = vmul.f32 %v3521_v61, %v7654_v47  ;;  %v3005_v59 = vadd.f32 %v5197_v52, %v2695_v60 }
 0x2c9   :  { %3291 = vst [vmem:[#allocation7 + $0x8b0] sm:$0xff] %v2997_v18  ;;  %v3006_v27 = vadd.f32 %v5217_v48, %v2696_v29  ;;  %v2691_v21 = vmul.f32 %v5191_v54, %v2381_v49  ;;  %v2692_v8 = vmul.f32 %v5195_v55, %v2382_v2 }
 0x2ca   :  { %3298 = vst [vmem:[#allocation7 + $0x8e8] sm:$0xff] %v3004_v19  ;;  %v2693_v40 = vmul.f32 %v5208_v62, %v2383_v43  ;;  %3299 = vst [vmem:[#allocation7 + $0x8f0] sm:$0xff] %v3005_v59 }
 0x2cb   :  { %3300 = vst [vmem:[#allocation7 + $0x8f8] sm:$0xff] %v3006_v27  ;;  %v3001_v7 = vadd.f32 %v5193_v4, %v2691_v21  ;;  %v3002_v0 = vadd.f32 %v5197_v52, %v2692_v8 }
 0x2cc   :  { %v3003_v42 = vadd.f32 %v5217_v48, %v2693_v40 }
 0x2cd   :  { %v3523_v35 = vpop.eup %3522  ;;  %3295 = vst [vmem:[#allocation7 + $0x8d0] sm:$0xff] %v3001_v7  ;;  %3296 = vst [vmem:[#allocation7 + $0x8d8] sm:$0xff] %v3002_v0 }
 0x2ce   :  { %v3525_v17 = vpop.eup %3524  ;;  %v2390_v22 = vmul.f32 %v3523_v35, %v7655_v63  ;;  %v2391_v37 = vmul.f32 %v3523_v35, %v7656_v51  ;;  %v2392_v36 = vmul.f32 %v3523_v35, %v7657_v24  ;;  %3297 = vst [vmem:[#allocation7 + $0x8e0] sm:$0xff] %v3003_v42 }
 0x2cf   :  { %v2387_v16 = vmul.f32 %v3525_v17, %v7658_v56  ;;  %v2388_v46 = vmul.f32 %v3525_v17, %v7659_v14  ;;  %v2389_v50 = vmul.f32 %v3525_v17, %v7660_v28 }
 0x2d0   :  { %v2700_v23 = vmul.f32 %v5191_v54, %v2390_v22  ;;  %v2701_v32 = vmul.f32 %v5195_v55, %v2391_v37  ;;  %v2702_v9 = vmul.f32 %v5208_v62, %v2392_v36 }
 0x2d1   :  { %v2697_v45 = vmul.f32 %v5191_v54, %v2387_v16  ;;  %v2698_v38 = vmul.f32 %v5195_v55, %v2388_v46  ;;  %v2699_v53 = vmul.f32 %v5208_v62, %v2389_v50 }
 0x2d2   :  { %v3010_v10 = vadd.f32 %v5193_v4, %v2700_v23  ;;  %v3011_v39 = vadd.f32 %v5197_v52, %v2701_v32  ;;  %v3012_v5 = vadd.f32 %v5217_v48, %v2702_v9 }
 0x2d3   :  { %v3007_v6 = vadd.f32 %v5193_v4, %v2697_v45  ;;  %v3008_v41 = vadd.f32 %v5197_v52, %v2698_v38  ;;  %v3009_v13 = vadd.f32 %v5217_v48, %v2699_v53 }
 0x2d4   :  { %3304 = vst [vmem:[#allocation7 + $0x918] sm:$0xff] %v3010_v10  ;;  %3305 = vst [vmem:[#allocation7 + $0x920] sm:$0xff] %v3011_v39 }
 0x2d5   :  { %3306 = vst [vmem:[#allocation7 + $0x928] sm:$0xff] %v3012_v5  ;;  %3301 = vst [vmem:[#allocation7 + $0x900] sm:$0xff] %v3007_v6 }
 0x2d6   :  { %3302 = vst [vmem:[#allocation7 + $0x908] sm:$0xff] %v3008_v41  ;;  %3303 = vst [vmem:[#allocation7 + $0x910] sm:$0xff] %v3009_v13 }
 0x2d7   :  { %3871 = shalt.err (!%p3868_p0)
}
 0x2d8   :  { %3318 = dma.vmem_to_hbm [thread:$0]  %s3313_s1, 37632, %s6752_s2, [#allocation4], %s3887_s12, %s3887_s12, %s3888_s13  }
 0x2d9   :  { %3884 = dma.done.wait [#allocation4], 37632  }
 0x2da   :  { %3885 = vsyncadd [#allocation4], 4294929664 }
 0x2db   :  { %3322 = vsyncpa [#allocation3], 1 }
 0x2dc   :  { %3323 = vsyncpa [#allocation6], 1 }
 0x2dd   :  { %3324 = vsyncpa [#allocation4], 1 }

</bundles_post_ra>
